<compile_context>
chip_gen: v7x
topology: tpu7x:2x2x1
jax: 0.10.0
libtpu: 0.0.40
codegen_flags: <defaults>
</compile_context>

<pallas_src>
import math
import jax
import jax.numpy as jnp
from jax.experimental import pallas as pl
from jax.experimental.pallas import tpu as pltpu

# ---- model hyper-params (small, consistent with the module) ----
D_MODEL = 32
HEADS = 4
D_K = D_MODEL // HEADS
D_FF = 2048          # FeedForward default d_ff
EPS = 1e-6
NEG = -1.0e9

# rows of the packed (10, D_MODEL) small-vector parameter array
(V_NA1, V_NB1, V_NA2, V_NB2, V_NA3, V_NB3,
 V_BO1, V_BQ2, V_BO2, V_BF2) = range(10)


# ============================ kernel-side math ============================
def _norm_k(x, alpha, bias):
    # NormLayer: alpha * (x - mean) / (std + eps) + bias, torch.std is UNBIASED (n-1)
    mean = jnp.mean(x, axis=-1, keepdims=True)
    xc = x - mean
    var = jnp.sum(xc * xc, axis=-1, keepdims=True) * (1.0 / (D_MODEL - 1))
    std = jnp.sqrt(var)
    return alpha * xc * pl.reciprocal(std + EPS, approx=True) + bias


def _softmax_k(s):
    m = jnp.max(s, axis=-1, keepdims=True)
    e = jnp.exp(s - m)
    return e * pl.reciprocal(jnp.sum(e, axis=-1, keepdims=True), approx=True)


def _attention_block(q_all, k_all, v_all, masks, wo, bo, bt, sq, sk):
    """q_all:(bt*sq,D) (pre-scaled by 1/sqrt(d_k)), k_all/v_all:(bt*sk,D),
    masks:(bt,sq,sk) additive biases (0 or -1e9).

    Per batch element: one key transpose, the 4 head score tiles stacked along
    sublanes through a single softmax, and each head's context accumulated
    through the matching sublane-aligned row slice of W_o (no lane concat).
    """
    outs = []
    for b in range(bt):                         # static unroll over batch block
        q = q_all[b * sq:(b + 1) * sq, :]
        k = k_all[b * sk:(b + 1) * sk, :]
        v = v_all[b * sk:(b + 1) * sk, :]
        kt = k.T                                # (D, sk): one transpose per (b, attn)
        m = masks[b]                            # (sq, sk)
        rows = []
        for h in range(HEADS):                  # static unroll over heads
            sl = slice(h * D_K, (h + 1) * D_K)
            rows.append(
                jnp.dot(q[:, sl], kt[sl, :], preferred_element_type=jnp.float32) + m)
        p = _softmax_k(jnp.concatenate(rows, axis=0))   # (HEADS*sq, sk): one softmax
        o = bo                                  # (1, D): broadcasts on first add
        for h in range(HEADS):
            sl = slice(h * D_K, (h + 1) * D_K)
            ctx = jnp.dot(p[h * sq:(h + 1) * sq, :], v[:, sl],
                          preferred_element_type=jnp.float32)               # (sq, D_K)
            o = o + jnp.dot(ctx, wo[sl, :], preferred_element_type=jnp.float32)
        outs.append(o)                          # (sq, D)
    return jnp.concatenate(outs, axis=0)        # (bt*sq, D)


# ---------- Pallas kernel: one grid step == one block of Bt batch elements ----------
def decoder_layer_kernel(
    x_ref, e_ref, tmask_ref, smask_ref,
    vec_ref,
    wqkv1_ref, bqkv1_ref, wo1_ref,
    wq2_ref, wkv2_ref, bkv2_ref, wo2_ref,
    wf1_ref, bf1_ref, wf2_ref,
    o_ref,
):
    bt, s, d = x_ref.shape
    s_enc = e_ref.shape[1]

    x = x_ref[...].reshape(bt * s, d)           # flatten batch block for projections
    e = e_ref[...].reshape(bt * s_enc, d)
    tmask = tmask_ref[...]                      # (bt, s, s)       additive: 0 or -1e9
    smask = smask_ref[...]                      # (bt, s, s_enc)   additive: 0 or -1e9
    vecs = vec_ref[...]                         # (10, D)

    def vrow(i):
        return vecs[i:i + 1, :]                 # keep (1, D) 2-D shape

    # x = x + attn_1(norm_1(x), ..., trg_mask)      (dropout == identity)
    x2 = _norm_k(x, vrow(V_NA1), vrow(V_NB1))
    qkv = jnp.dot(x2, wqkv1_ref[...], preferred_element_type=jnp.float32) + bqkv1_ref[...]
    x = x + _attention_block(qkv[:, 0:D_MODEL],
                             qkv[:, D_MODEL:2 * D_MODEL],
                             qkv[:, 2 * D_MODEL:3 * D_MODEL],
                             tmask, wo1_ref[...], vrow(V_BO1), bt, s, s)

    # x = x + attn_2(norm_2(x), e_outputs, e_outputs, src_mask)
    x2 = _norm_k(x, vrow(V_NA2), vrow(V_NB2))
    q = jnp.dot(x2, wq2_ref[...], preferred_element_type=jnp.float32) + vrow(V_BQ2)
    kv = jnp.dot(e, wkv2_ref[...], preferred_element_type=jnp.float32) + bkv2_ref[...]
    x = x + _attention_block(q,
                             kv[:, 0:D_MODEL],
                             kv[:, D_MODEL:2 * D_MODEL],
                             smask, wo2_ref[...], vrow(V_BO2), bt, s, s_enc)

    # x = x + ff(norm_3(x))    -- bf16 weights, f32 accumulation
    x2 = _norm_k(x, vrow(V_NA3), vrow(V_NB3))
    h = jnp.maximum(
        jnp.dot(x2.astype(jnp.bfloat16), wf1_ref[...],
                preferred_element_type=jnp.float32) + bf1_ref[...], 0.0)
    x = x + jnp.dot(h.astype(jnp.bfloat16), wf2_ref[...],
                    preferred_element_type=jnp.float32) + vrow(V_BF2)

    o_ref[...] = x.reshape(bt, s, d).astype(o_ref.dtype)


# ============================ wrapper ============================
def _pick_block_batch(B, max_bt=8):
    """Largest divisor of B (<= max_bt) that still leaves >= 2 grid steps
    (keeps both v7x TensorCores busy); falls back to 1 when B == 1."""
    best = 1
    for bt in range(1, min(B, max_bt) + 1):
        if B % bt == 0 and (B // bt >= 2 or B == 1):
            best = bt
    return best


def decoder_layer(x, e_outputs, src_mask, trg_mask, params):
    """x: (B,S,D), e_outputs: (B,S_enc,D), src_mask: (B,S,S_enc), trg_mask: (B,S,S)."""
    B, S, D = x.shape
    Bt = _pick_block_batch(B)

    scale = 1.0 / math.sqrt(D_K)

    # Cheap XLA-side prep (outside the kernel): additive masks, fused weights
    # with the 1/sqrt(d_k) scale folded into q projections, bf16 FFN weights,
    # packed small vectors.
    trg_add = (trg_mask * NEG).astype(jnp.float32)
    src_add = (src_mask * NEG).astype(jnp.float32)

    wqkv1 = jnp.concatenate(
        [params["wq1"] * scale, params["wk1"], params["wv1"]], axis=1)              # (D, 3D)
    bqkv1 = jnp.concatenate(
        [params["bq1"] * scale, params["bk1"], params["bv1"]], axis=1)              # (1, 3D)
    wq2 = params["wq2"] * scale                                                     # (D, D)
    wkv2 = jnp.concatenate([params["wk2"], params["wv2"]], axis=1)                  # (D, 2D)
    bkv2 = jnp.concatenate([params["bk2"], params["bv2"]], axis=1)                  # (1, 2D)
    vecs = jnp.concatenate(
        [params["na1"], params["nb1"], params["na2"], params["nb2"],
         params["na3"], params["nb3"], params["bo1"], params["bq2"] * scale,
         params["bo2"], params["bf2"]], axis=0)                                     # (10, D)
    wf1 = params["wf1"].astype(jnp.bfloat16)                                        # (D, D_FF)
    wf2 = params["wf2"].astype(jnp.bfloat16)                                        # (D_FF, D)

    def batch_spec(shape):
        n = len(shape)
        return pl.BlockSpec((Bt,) + tuple(shape[1:]),
                            lambda b, _n=n: (b,) + (0,) * (_n - 1))

    def full_spec(arr):
        return pl.BlockSpec(arr.shape, lambda b, _n=arr.ndim: (0,) * _n)

    param_list = [
        vecs, wqkv1, bqkv1, params["wo1"],
        wq2, wkv2, bkv2, params["wo2"],
        wf1, params["bf1"], wf2,
    ]

    in_specs = [
        batch_spec(x.shape),
        batch_spec(e_outputs.shape),
        batch_spec(trg_add.shape),
        batch_spec(src_add.shape),
    ] + [full_spec(p) for p in param_list]

    return pl.pallas_call(
        decoder_layer_kernel,
        out_shape=jax.ShapeDtypeStruct((B, S, D), x.dtype),
        grid_spec=pltpu.PrefetchScalarGridSpec(
            num_scalar_prefetch=0,
            grid=(B // Bt,),
            in_specs=in_specs,
            out_specs=batch_spec((B, S, D)),
        ),
        compiler_params=pltpu.CompilerParams(
            dimension_semantics=("parallel",),   # shards grid steps across TCs on v7x
            vmem_limit_bytes=16 << 20,           # actual footprint << 16 MiB (v7x-safe)
        ),
    )(x, e_outputs, trg_add, src_add, *param_list)


# ================= pure-JAX reference (torch-faithful math) =================
def _norm_ref(x, alpha, bias):
    mean = jnp.mean(x, axis=-1, keepdims=True)
    xc = x - mean
    var = jnp.sum(xc * xc, axis=-1, keepdims=True) / (x.shape[-1] - 1)
    std = jnp.sqrt(var)
    return alpha * xc / (std + EPS) + bias


def _softmax_ref(s):
    m = jnp.max(s, axis=-1, keepdims=True)
    e = jnp.exp(s - m)
    return e / jnp.sum(e, axis=-1, keepdims=True)


def _mha_ref(q_in, kv_in, mask, wq, bq, wk, bk, wv, bv, wo, bo):
    q = jnp.dot(q_in, wq) + bq
    k = jnp.dot(kv_in, wk) + bk
    v = jnp.dot(kv_in, wv) + bv
    scale = 1.0 / math.sqrt(D_K)
    head_outs = []
    for h in range(HEADS):
        sl = slice(h * D_K, (h + 1) * D_K)
        scores = jnp.dot(q[:, sl], k[:, sl].T) * scale
        scores = jnp.where(mask == 1.0, NEG, scores)
        head_outs.append(jnp.dot(_softmax_ref(scores), v[:, sl]))
    concat = jnp.concatenate(head_outs, axis=-1)
    return jnp.dot(concat, wo) + bo


def decoder_layer_ref(x, e_outputs, src_mask, trg_mask, p):
    outs = []
    for b in range(x.shape[0]):
        xb, eb, tm, sm = x[b], e_outputs[b], trg_mask[b], src_mask[b]
        x2 = _norm_ref(xb, p["na1"], p["nb1"])
        xb = xb + _mha_ref(x2, x2, tm, p["wq1"], p["bq1"], p["wk1"], p["bk1"],
                           p["wv1"], p["bv1"], p["wo1"], p["bo1"])
        x2 = _norm_ref(xb, p["na2"], p["nb2"])
        xb = xb + _mha_ref(x2, eb, sm, p["wq2"], p["bq2"], p["wk2"], p["bk2"],
                           p["wv2"], p["bv2"], p["wo2"], p["bo2"])
        x2 = _norm_ref(xb, p["na3"], p["nb3"])
        hh = jnp.maximum(jnp.dot(x2, p["wf1"]) + p["bf1"], 0.0)
        xb = xb + jnp.dot(hh, p["wf2"]) + p["bf2"]
        outs.append(xb)
    return jnp.stack(outs)


def init_params(key):
    ks = iter(jax.random.split(key, 32))
    s = 0.05
    p = {}
    p["na1"] = jnp.ones((1, D_MODEL), jnp.float32)
    p["nb1"] = jnp.zeros((1, D_MODEL), jnp.float32)
    p["na2"] = 1.0 + s * jax.random.normal(next(ks), (1, D_MODEL), jnp.float32)
    p["nb2"] = s * jax.random.normal(next(ks), (1, D_MODEL), jnp.float32)
    p["na3"] = 1.0 + s * jax.random.normal(next(ks), (1, D_MODEL), jnp.float32)
    p["nb3"] = s * jax.random.normal(next(ks), (1, D_MODEL), jnp.float32)
    for pre in ("1", "2"):
        for name in ("q", "k", "v", "o"):
            p[f"w{name}{pre}"] = s * jax.random.normal(next(ks), (D_MODEL, D_MODEL), jnp.float32)
            p[f"b{name}{pre}"] = s * jax.random.normal(next(ks), (1, D_MODEL), jnp.float32)
    p["wf1"] = s * jax.random.normal(next(ks), (D_MODEL, D_FF), jnp.float32)
    p["bf1"] = s * jax.random.normal(next(ks), (1, D_FF), jnp.float32)
    p["wf2"] = s * jax.random.normal(next(ks), (D_FF, D_MODEL), jnp.float32)
    p["bf2"] = s * jax.random.normal(next(ks), (1, D_MODEL), jnp.float32)
    return p


if __name__ == "__main__":
    B, S, S_ENC = 8, 8, 8          # B=8 -> Bt=4 per grid step, grid=(2,)
    key = jax.random.PRNGKey(0)
    k_x, k_e, k_m, k_p = jax.random.split(key, 4)

    x = jax.random.normal(k_x, (B, S, D_MODEL), jnp.float32)
    e_outputs = jax.random.normal(k_e, (B, S_ENC, D_MODEL), jnp.float32)

    # trg_mask: causal, 1 == masked future positions (matches mask==1 semantics)
    trg_mask = jnp.broadcast_to(
        jnp.triu(jnp.ones((S, S), jnp.float32), k=1), (B, S, S)
    )
    # src_mask: random sparsity (1 == masked); keep at least one key visible per row
    src_mask = jax.random.bernoulli(k_m, 0.2, (B, S, S_ENC)).astype(jnp.float32)
    src_mask = src_mask.at[:, :, 0].set(0.0)

    params = init_params(k_p)

    out = decoder_layer(x, e_outputs, src_mask, trg_mask, params)
    out = jax.block_until_ready(out)

    ref = decoder_layer_ref(x, e_outputs, src_mask, trg_mask, params)
    assert out.shape == (B, S, D_MODEL)
    assert bool(jnp.all(jnp.isfinite(out)))
    assert bool(jnp.allclose(out, ref, rtol=2e-2, atol=2e-2)), \
        f"max abs err {float(jnp.max(jnp.abs(out - ref)))}"

    print("KERNEL_OK")
</pallas_src>

<mosaic_0001>
module attributes {stable_mosaic.version = 11 : i64} {
  func.func @decoder_layer_kernel(%arg0: i32, %arg1: memref<4x8x32xf32, #tpu.memory_space<vmem>>, %arg2: memref<4x8x32xf32, #tpu.memory_space<vmem>>, %arg3: memref<4x8x8xf32, #tpu.memory_space<vmem>>, %arg4: memref<4x8x8xf32, #tpu.memory_space<vmem>>, %arg5: memref<10x32xf32, #tpu.memory_space<vmem>>, %arg6: memref<32x96xf32, #tpu.memory_space<vmem>>, %arg7: memref<1x96xf32, #tpu.memory_space<vmem>>, %arg8: memref<32x32xf32, #tpu.memory_space<vmem>>, %arg9: memref<32x32xf32, #tpu.memory_space<vmem>>, %arg10: memref<32x64xf32, #tpu.memory_space<vmem>>, %arg11: memref<1x64xf32, #tpu.memory_space<vmem>>, %arg12: memref<32x32xf32, #tpu.memory_space<vmem>>, %arg13: memref<32x2048xbf16, #tpu.memory_space<vmem>>, %arg14: memref<1x2048xf32, #tpu.memory_space<vmem>>, %arg15: memref<2048x32xbf16, #tpu.memory_space<vmem>>, %arg16: memref<4x8x32xf32, #tpu.memory_space<vmem>>) attributes {dimension_semantics = [#tpu.dimension_semantics<parallel>], iteration_bounds = array<i64: 2>, scalar_prefetch = 0 : i64, scratch_operands = 0 : i64, tpu.core_type = #tpu.core_type<tc>, window_params = [{transform_indices = @transform_0, window_bounds = array<i64: 4, 8, 32>}, {transform_indices = @transform_1, window_bounds = array<i64: 4, 8, 32>}, {transform_indices = @transform_2, window_bounds = array<i64: 4, 8, 8>}, {transform_indices = @transform_3, window_bounds = array<i64: 4, 8, 8>}, {pipeline_mode = #tpu.pipeline_mode<synchronous>, transform_indices = @transform_4, window_bounds = array<i64: 10, 32>}, {pipeline_mode = #tpu.pipeline_mode<synchronous>, transform_indices = @transform_5, window_bounds = array<i64: 32, 96>}, {pipeline_mode = #tpu.pipeline_mode<synchronous>, transform_indices = @transform_6, window_bounds = array<i64: 1, 96>}, {pipeline_mode = #tpu.pipeline_mode<synchronous>, transform_indices = @transform_7, window_bounds = array<i64: 32, 32>}, {pipeline_mode = #tpu.pipeline_mode<synchronous>, transform_indices = @transform_8, window_bounds = array<i64: 32, 32>}, {pipeline_mode = #tpu.pipeline_mode<synchronous>, transform_indices = @transform_9, window_bounds = array<i64: 32, 64>}, {pipeline_mode = #tpu.pipeline_mode<synchronous>, transform_indices = @transform_10, window_bounds = array<i64: 1, 64>}, {pipeline_mode = #tpu.pipeline_mode<synchronous>, transform_indices = @transform_11, window_bounds = array<i64: 32, 32>}, {pipeline_mode = #tpu.pipeline_mode<synchronous>, transform_indices = @transform_12, window_bounds = array<i64: 32, 2048>}, {pipeline_mode = #tpu.pipeline_mode<synchronous>, transform_indices = @transform_13, window_bounds = array<i64: 1, 2048>}, {pipeline_mode = #tpu.pipeline_mode<synchronous>, transform_indices = @transform_14, window_bounds = array<i64: 2048, 32>}, {transform_indices = @transform_15, window_bounds = array<i64: 4, 8, 32>}]} {
    %c0 = arith.constant 0 : index
    %c0_0 = arith.constant 0 : index
    %c0_1 = arith.constant 0 : index
    %0 = vector.load %arg1[%c0, %c0_0, %c0_1] : memref<4x8x32xf32, #tpu.memory_space<vmem>>, vector<4x8x32xf32>
    %1 = vector.shape_cast %0 : vector<4x8x32xf32> to vector<32x32xf32>
    %c0_2 = arith.constant 0 : index
    %c0_3 = arith.constant 0 : index
    %c0_4 = arith.constant 0 : index
    %2 = vector.load %arg2[%c0_2, %c0_3, %c0_4] : memref<4x8x32xf32, #tpu.memory_space<vmem>>, vector<4x8x32xf32>
    %3 = vector.shape_cast %2 : vector<4x8x32xf32> to vector<32x32xf32>
    %c0_5 = arith.constant 0 : index
    %c0_6 = arith.constant 0 : index
    %c0_7 = arith.constant 0 : index
    %4 = vector.load %arg3[%c0_5, %c0_6, %c0_7] : memref<4x8x8xf32, #tpu.memory_space<vmem>>, vector<4x8x8xf32>
    %c0_8 = arith.constant 0 : index
    %c0_9 = arith.constant 0 : index
    %c0_10 = arith.constant 0 : index
    %5 = vector.load %arg4[%c0_8, %c0_9, %c0_10] : memref<4x8x8xf32, #tpu.memory_space<vmem>>, vector<4x8x8xf32>
    %c0_11 = arith.constant 0 : index
    %c0_12 = arith.constant 0 : index
    %6 = vector.load %arg5[%c0_11, %c0_12] : memref<10x32xf32, #tpu.memory_space<vmem>>, vector<10x32xf32>
    %7 = vector.extract_strided_slice %6 {offsets = [0, 0], sizes = [1, 32], strides = [1, 1]} : vector<10x32xf32> to vector<1x32xf32>
    %8 = vector.extract_strided_slice %6 {offsets = [1, 0], sizes = [1, 32], strides = [1, 1]} : vector<10x32xf32> to vector<1x32xf32>
    %cst = arith.constant dense<0.000000e+00> : vector<32xf32>
    %9 = vector.multi_reduction <add>, %1, %cst [1] : vector<32x32xf32> to vector<32xf32>
    %10 = vector.shape_cast %9 : vector<32xf32> to vector<32x1xf32>
    %cst_13 = arith.constant 3.200000e+01 : f32
    %11 = vector.broadcast %cst_13 : f32 to vector<32x1xf32>
    %12 = arith.divf %10, %11 : vector<32x1xf32>
    %13 = vector.broadcast %12 : vector<32x1xf32> to vector<32x32xf32>
    %14 = arith.subf %1, %13 : vector<32x32xf32>
    %15 = arith.mulf %14, %14 : vector<32x32xf32>
    %cst_14 = arith.constant dense<0.000000e+00> : vector<32xf32>
    %16 = vector.multi_reduction <add>, %15, %cst_14 [1] : vector<32x32xf32> to vector<32xf32>
    %17 = vector.shape_cast %16 : vector<32xf32> to vector<32x1xf32>
    %cst_15 = arith.constant 0.0322580636 : f32
    %18 = vector.broadcast %cst_15 : f32 to vector<32x1xf32>
    %19 = arith.mulf %17, %18 : vector<32x1xf32>
    %20 = math.sqrt %19 : vector<32x1xf32>
    %21 = vector.broadcast %7 : vector<1x32xf32> to vector<32x32xf32>
    %22 = arith.mulf %21, %14 : vector<32x32xf32>
    %cst_16 = arith.constant 9.99999997E-7 : f32
    %23 = vector.broadcast %cst_16 : f32 to vector<32x1xf32>
    %24 = arith.addf %20, %23 : vector<32x1xf32>
    %25 = tpu.reciprocal %24 {approx = true} : vector<32x1xf32> -> vector<32x1xf32>
    %26 = vector.broadcast %25 : vector<32x1xf32> to vector<32x32xf32>
    %27 = arith.mulf %22, %26 : vector<32x32xf32>
    %28 = vector.broadcast %8 : vector<1x32xf32> to vector<32x32xf32>
    %29 = arith.addf %27, %28 : vector<32x32xf32>
    %c0_17 = arith.constant 0 : index
    %c0_18 = arith.constant 0 : index
    %30 = vector.load %arg6[%c0_17, %c0_18] : memref<32x96xf32, #tpu.memory_space<vmem>>, vector<32x96xf32>
    %cst_19 = arith.constant dense<0.000000e+00> : vector<32x96xf32>
    %31 = tpu.matmul %29, %30, %cst_19 {dimension_numbers = #tpu.dot_dimension_numbers<[1], [0], [0], [1], [0, 0, 1, 1], [], []>} : vector<32x32xf32>, vector<32x96xf32>, vector<32x96xf32> -> vector<32x96xf32>
    %c0_20 = arith.constant 0 : index
    %c0_21 = arith.constant 0 : index
    %32 = vector.load %arg7[%c0_20, %c0_21] : memref<1x96xf32, #tpu.memory_space<vmem>>, vector<1x96xf32>
    %33 = vector.broadcast %32 : vector<1x96xf32> to vector<32x96xf32>
    %34 = arith.addf %31, %33 : vector<32x96xf32>
    %35 = vector.extract_strided_slice %34 {offsets = [0, 0], sizes = [32, 32], strides = [1, 1]} : vector<32x96xf32> to vector<32x32xf32>
    %36 = vector.extract_strided_slice %34 {offsets = [0, 32], sizes = [32, 32], strides = [1, 1]} : vector<32x96xf32> to vector<32x32xf32>
    %37 = vector.extract_strided_slice %34 {offsets = [0, 64], sizes = [32, 32], strides = [1, 1]} : vector<32x96xf32> to vector<32x32xf32>
    %c0_22 = arith.constant 0 : index
    %c0_23 = arith.constant 0 : index
    %38 = vector.load %arg8[%c0_22, %c0_23] : memref<32x32xf32, #tpu.memory_space<vmem>>, vector<32x32xf32>
    %39 = vector.extract_strided_slice %6 {offsets = [6, 0], sizes = [1, 32], strides = [1, 1]} : vector<10x32xf32> to vector<1x32xf32>
    %40 = vector.extract_strided_slice %35 {offsets = [0, 0], sizes = [8, 32], strides = [1, 1]} : vector<32x32xf32> to vector<8x32xf32>
    %41 = vector.extract_strided_slice %36 {offsets = [0, 0], sizes = [8, 32], strides = [1, 1]} : vector<32x32xf32> to vector<8x32xf32>
    %42 = vector.extract_strided_slice %37 {offsets = [0, 0], sizes = [8, 32], strides = [1, 1]} : vector<32x32xf32> to vector<8x32xf32>
    %43 = tpu.transpose %41, [1, 0] : vector<8x32xf32> -> vector<32x8xf32>
    %44 = vector.extract_strided_slice %4 {offsets = [0, 0, 0], sizes = [1, 8, 8], strides = [1, 1, 1]} : vector<4x8x8xf32> to vector<1x8x8xf32>
    %45 = vector.shape_cast %44 : vector<1x8x8xf32> to vector<8x8xf32>
    %46 = vector.extract_strided_slice %40 {offsets = [0, 0], sizes = [8, 8], strides = [1, 1]} : vector<8x32xf32> to vector<8x8xf32>
    %47 = vector.extract_strided_slice %43 {offsets = [0, 0], sizes = [8, 8], strides = [1, 1]} : vector<32x8xf32> to vector<8x8xf32>
    %cst_24 = arith.constant dense<0.000000e+00> : vector<8x8xf32>
    %48 = tpu.matmul %46, %47, %cst_24 {dimension_numbers = #tpu.dot_dimension_numbers<[1], [0], [0], [1], [0, 0, 1, 1], [], []>} : vector<8x8xf32>, vector<8x8xf32>, vector<8x8xf32> -> vector<8x8xf32>
    %49 = arith.addf %48, %45 : vector<8x8xf32>
    %50 = vector.extract_strided_slice %40 {offsets = [0, 8], sizes = [8, 8], strides = [1, 1]} : vector<8x32xf32> to vector<8x8xf32>
    %51 = vector.extract_strided_slice %43 {offsets = [8, 0], sizes = [8, 8], strides = [1, 1]} : vector<32x8xf32> to vector<8x8xf32>
    %cst_25 = arith.constant dense<0.000000e+00> : vector<8x8xf32>
    %52 = tpu.matmul %50, %51, %cst_25 {dimension_numbers = #tpu.dot_dimension_numbers<[1], [0], [0], [1], [0, 0, 1, 1], [], []>} : vector<8x8xf32>, vector<8x8xf32>, vector<8x8xf32> -> vector<8x8xf32>
    %53 = arith.addf %52, %45 : vector<8x8xf32>
    %54 = vector.extract_strided_slice %40 {offsets = [0, 16], sizes = [8, 8], strides = [1, 1]} : vector<8x32xf32> to vector<8x8xf32>
    %55 = vector.extract_strided_slice %43 {offsets = [16, 0], sizes = [8, 8], strides = [1, 1]} : vector<32x8xf32> to vector<8x8xf32>
    %cst_26 = arith.constant dense<0.000000e+00> : vector<8x8xf32>
    %56 = tpu.matmul %54, %55, %cst_26 {dimension_numbers = #tpu.dot_dimension_numbers<[1], [0], [0], [1], [0, 0, 1, 1], [], []>} : vector<8x8xf32>, vector<8x8xf32>, vector<8x8xf32> -> vector<8x8xf32>
    %57 = arith.addf %56, %45 : vector<8x8xf32>
    %58 = vector.extract_strided_slice %40 {offsets = [0, 24], sizes = [8, 8], strides = [1, 1]} : vector<8x32xf32> to vector<8x8xf32>
    %59 = vector.extract_strided_slice %43 {offsets = [24, 0], sizes = [8, 8], strides = [1, 1]} : vector<32x8xf32> to vector<8x8xf32>
    %cst_27 = arith.constant dense<0.000000e+00> : vector<8x8xf32>
    %60 = tpu.matmul %58, %59, %cst_27 {dimension_numbers = #tpu.dot_dimension_numbers<[1], [0], [0], [1], [0, 0, 1, 1], [], []>} : vector<8x8xf32>, vector<8x8xf32>, vector<8x8xf32> -> vector<8x8xf32>
    %61 = arith.addf %60, %45 : vector<8x8xf32>
    %62 = tpu.concatenate %49, %53, %57, %61 in 0 : vector<8x8xf32>, vector<8x8xf32>, vector<8x8xf32>, vector<8x8xf32> -> vector<32x8xf32>
    %cst_28 = arith.constant dense<0xFF800000> : vector<32xf32>
    %63 = vector.multi_reduction <maximumf>, %62, %cst_28 [1] : vector<32x8xf32> to vector<32xf32>
    %64 = vector.shape_cast %63 : vector<32xf32> to vector<32x1xf32>
    %65 = vector.broadcast %64 : vector<32x1xf32> to vector<32x8xf32>
    %66 = arith.subf %62, %65 : vector<32x8xf32>
    %67 = math.exp %66 : vector<32x8xf32>
    %cst_29 = arith.constant dense<0.000000e+00> : vector<32xf32>
    %68 = vector.multi_reduction <add>, %67, %cst_29 [1] : vector<32x8xf32> to vector<32xf32>
    %69 = vector.shape_cast %68 : vector<32xf32> to vector<32x1xf32>
    %70 = tpu.reciprocal %69 {approx = true} : vector<32x1xf32> -> vector<32x1xf32>
    %71 = vector.broadcast %70 : vector<32x1xf32> to vector<32x8xf32>
    %72 = arith.mulf %67, %71 : vector<32x8xf32>
    %73 = vector.extract_strided_slice %72 {offsets = [0, 0], sizes = [8, 8], strides = [1, 1]} : vector<32x8xf32> to vector<8x8xf32>
    %74 = vector.extract_strided_slice %42 {offsets = [0, 0], sizes = [8, 8], strides = [1, 1]} : vector<8x32xf32> to vector<8x8xf32>
    %cst_30 = arith.constant dense<0.000000e+00> : vector<8x8xf32>
    %75 = tpu.matmul %73, %74, %cst_30 {dimension_numbers = #tpu.dot_dimension_numbers<[1], [0], [0], [1], [0, 0, 1, 1], [], []>} : vector<8x8xf32>, vector<8x8xf32>, vector<8x8xf32> -> vector<8x8xf32>
    %76 = vector.extract_strided_slice %38 {offsets = [0, 0], sizes = [8, 32], strides = [1, 1]} : vector<32x32xf32> to vector<8x32xf32>
    %cst_31 = arith.constant dense<0.000000e+00> : vector<8x32xf32>
    %77 = tpu.matmul %75, %76, %cst_31 {dimension_numbers = #tpu.dot_dimension_numbers<[1], [0], [0], [1], [0, 0, 1, 1], [], []>} : vector<8x8xf32>, vector<8x32xf32>, vector<8x32xf32> -> vector<8x32xf32>
    %78 = vector.broadcast %39 : vector<1x32xf32> to vector<8x32xf32>
    %79 = arith.addf %78, %77 : vector<8x32xf32>
    %80 = vector.extract_strided_slice %72 {offsets = [8, 0], sizes = [8, 8], strides = [1, 1]} : vector<32x8xf32> to vector<8x8xf32>
    %81 = vector.extract_strided_slice %42 {offsets = [0, 8], sizes = [8, 8], strides = [1, 1]} : vector<8x32xf32> to vector<8x8xf32>
    %cst_32 = arith.constant dense<0.000000e+00> : vector<8x8xf32>
    %82 = tpu.matmul %80, %81, %cst_32 {dimension_numbers = #tpu.dot_dimension_numbers<[1], [0], [0], [1], [0, 0, 1, 1], [], []>} : vector<8x8xf32>, vector<8x8xf32>, vector<8x8xf32> -> vector<8x8xf32>
    %83 = vector.extract_strided_slice %38 {offsets = [8, 0], sizes = [8, 32], strides = [1, 1]} : vector<32x32xf32> to vector<8x32xf32>
    %cst_33 = arith.constant dense<0.000000e+00> : vector<8x32xf32>
    %84 = tpu.matmul %82, %83, %cst_33 {dimension_numbers = #tpu.dot_dimension_numbers<[1], [0], [0], [1], [0, 0, 1, 1], [], []>} : vector<8x8xf32>, vector<8x32xf32>, vector<8x32xf32> -> vector<8x32xf32>
    %85 = arith.addf %79, %84 : vector<8x32xf32>
    %86 = vector.extract_strided_slice %72 {offsets = [16, 0], sizes = [8, 8], strides = [1, 1]} : vector<32x8xf32> to vector<8x8xf32>
    %87 = vector.extract_strided_slice %42 {offsets = [0, 16], sizes = [8, 8], strides = [1, 1]} : vector<8x32xf32> to vector<8x8xf32>
    %cst_34 = arith.constant dense<0.000000e+00> : vector<8x8xf32>
    %88 = tpu.matmul %86, %87, %cst_34 {dimension_numbers = #tpu.dot_dimension_numbers<[1], [0], [0], [1], [0, 0, 1, 1], [], []>} : vector<8x8xf32>, vector<8x8xf32>, vector<8x8xf32> -> vector<8x8xf32>
    %89 = vector.extract_strided_slice %38 {offsets = [16, 0], sizes = [8, 32], strides = [1, 1]} : vector<32x32xf32> to vector<8x32xf32>
    %cst_35 = arith.constant dense<0.000000e+00> : vector<8x32xf32>
    %90 = tpu.matmul %88, %89, %cst_35 {dimension_numbers = #tpu.dot_dimension_numbers<[1], [0], [0], [1], [0, 0, 1, 1], [], []>} : vector<8x8xf32>, vector<8x32xf32>, vector<8x32xf32> -> vector<8x32xf32>
    %91 = arith.addf %85, %90 : vector<8x32xf32>
    %92 = vector.extract_strided_slice %72 {offsets = [24, 0], sizes = [8, 8], strides = [1, 1]} : vector<32x8xf32> to vector<8x8xf32>
    %93 = vector.extract_strided_slice %42 {offsets = [0, 24], sizes = [8, 8], strides = [1, 1]} : vector<8x32xf32> to vector<8x8xf32>
    %cst_36 = arith.constant dense<0.000000e+00> : vector<8x8xf32>
    %94 = tpu.matmul %92, %93, %cst_36 {dimension_numbers = #tpu.dot_dimension_numbers<[1], [0], [0], [1], [0, 0, 1, 1], [], []>} : vector<8x8xf32>, vector<8x8xf32>, vector<8x8xf32> -> vector<8x8xf32>
    %95 = vector.extract_strided_slice %38 {offsets = [24, 0], sizes = [8, 32], strides = [1, 1]} : vector<32x32xf32> to vector<8x32xf32>
    %cst_37 = arith.constant dense<0.000000e+00> : vector<8x32xf32>
    %96 = tpu.matmul %94, %95, %cst_37 {dimension_numbers = #tpu.dot_dimension_numbers<[1], [0], [0], [1], [0, 0, 1, 1], [], []>} : vector<8x8xf32>, vector<8x32xf32>, vector<8x32xf32> -> vector<8x32xf32>
    %97 = arith.addf %91, %96 : vector<8x32xf32>
    %98 = vector.extract_strided_slice %35 {offsets = [8, 0], sizes = [8, 32], strides = [1, 1]} : vector<32x32xf32> to vector<8x32xf32>
    %99 = vector.extract_strided_slice %36 {offsets = [8, 0], sizes = [8, 32], strides = [1, 1]} : vector<32x32xf32> to vector<8x32xf32>
    %100 = vector.extract_strided_slice %37 {offsets = [8, 0], sizes = [8, 32], strides = [1, 1]} : vector<32x32xf32> to vector<8x32xf32>
    %101 = tpu.transpose %99, [1, 0] : vector<8x32xf32> -> vector<32x8xf32>
    %102 = vector.extract_strided_slice %4 {offsets = [1, 0, 0], sizes = [1, 8, 8], strides = [1, 1, 1]} : vector<4x8x8xf32> to vector<1x8x8xf32>
    %103 = vector.shape_cast %102 : vector<1x8x8xf32> to vector<8x8xf32>
    %104 = vector.extract_strided_slice %98 {offsets = [0, 0], sizes = [8, 8], strides = [1, 1]} : vector<8x32xf32> to vector<8x8xf32>
    %105 = vector.extract_strided_slice %101 {offsets = [0, 0], sizes = [8, 8], strides = [1, 1]} : vector<32x8xf32> to vector<8x8xf32>
    %cst_38 = arith.constant dense<0.000000e+00> : vector<8x8xf32>
    %106 = tpu.matmul %104, %105, %cst_38 {dimension_numbers = #tpu.dot_dimension_numbers<[1], [0], [0], [1], [0, 0, 1, 1], [], []>} : vector<8x8xf32>, vector<8x8xf32>, vector<8x8xf32> -> vector<8x8xf32>
    %107 = arith.addf %106, %103 : vector<8x8xf32>
    %108 = vector.extract_strided_slice %98 {offsets = [0, 8], sizes = [8, 8], strides = [1, 1]} : vector<8x32xf32> to vector<8x8xf32>
    %109 = vector.extract_strided_slice %101 {offsets = [8, 0], sizes = [8, 8], strides = [1, 1]} : vector<32x8xf32> to vector<8x8xf32>
    %cst_39 = arith.constant dense<0.000000e+00> : vector<8x8xf32>
    %110 = tpu.matmul %108, %109, %cst_39 {dimension_numbers = #tpu.dot_dimension_numbers<[1], [0], [0], [1], [0, 0, 1, 1], [], []>} : vector<8x8xf32>, vector<8x8xf32>, vector<8x8xf32> -> vector<8x8xf32>
    %111 = arith.addf %110, %103 : vector<8x8xf32>
    %112 = vector.extract_strided_slice %98 {offsets = [0, 16], sizes = [8, 8], strides = [1, 1]} : vector<8x32xf32> to vector<8x8xf32>
    %113 = vector.extract_strided_slice %101 {offsets = [16, 0], sizes = [8, 8], strides = [1, 1]} : vector<32x8xf32> to vector<8x8xf32>
    %cst_40 = arith.constant dense<0.000000e+00> : vector<8x8xf32>
    %114 = tpu.matmul %112, %113, %cst_40 {dimension_numbers = #tpu.dot_dimension_numbers<[1], [0], [0], [1], [0, 0, 1, 1], [], []>} : vector<8x8xf32>, vector<8x8xf32>, vector<8x8xf32> -> vector<8x8xf32>
    %115 = arith.addf %114, %103 : vector<8x8xf32>
    %116 = vector.extract_strided_slice %98 {offsets = [0, 24], sizes = [8, 8], strides = [1, 1]} : vector<8x32xf32> to vector<8x8xf32>
    %117 = vector.extract_strided_slice %101 {offsets = [24, 0], sizes = [8, 8], strides = [1, 1]} : vector<32x8xf32> to vector<8x8xf32>
    %cst_41 = arith.constant dense<0.000000e+00> : vector<8x8xf32>
    %118 = tpu.matmul %116, %117, %cst_41 {dimension_numbers = #tpu.dot_dimension_numbers<[1], [0], [0], [1], [0, 0, 1, 1], [], []>} : vector<8x8xf32>, vector<8x8xf32>, vector<8x8xf32> -> vector<8x8xf32>
    %119 = arith.addf %118, %103 : vector<8x8xf32>
    %120 = tpu.concatenate %107, %111, %115, %119 in 0 : vector<8x8xf32>, vector<8x8xf32>, vector<8x8xf32>, vector<8x8xf32> -> vector<32x8xf32>
    %cst_42 = arith.constant dense<0xFF800000> : vector<32xf32>
    %121 = vector.multi_reduction <maximumf>, %120, %cst_42 [1] : vector<32x8xf32> to vector<32xf32>
    %122 = vector.shape_cast %121 : vector<32xf32> to vector<32x1xf32>
    %123 = vector.broadcast %122 : vector<32x1xf32> to vector<32x8xf32>
    %124 = arith.subf %120, %123 : vector<32x8xf32>
    %125 = math.exp %124 : vector<32x8xf32>
    %cst_43 = arith.constant dense<0.000000e+00> : vector<32xf32>
    %126 = vector.multi_reduction <add>, %125, %cst_43 [1] : vector<32x8xf32> to vector<32xf32>
    %127 = vector.shape_cast %126 : vector<32xf32> to vector<32x1xf32>
    %128 = tpu.reciprocal %127 {approx = true} : vector<32x1xf32> -> vector<32x1xf32>
    %129 = vector.broadcast %128 : vector<32x1xf32> to vector<32x8xf32>
    %130 = arith.mulf %125, %129 : vector<32x8xf32>
    %131 = vector.extract_strided_slice %130 {offsets = [0, 0], sizes = [8, 8], strides = [1, 1]} : vector<32x8xf32> to vector<8x8xf32>
    %132 = vector.extract_strided_slice %100 {offsets = [0, 0], sizes = [8, 8], strides = [1, 1]} : vector<8x32xf32> to vector<8x8xf32>
    %cst_44 = arith.constant dense<0.000000e+00> : vector<8x8xf32>
    %133 = tpu.matmul %131, %132, %cst_44 {dimension_numbers = #tpu.dot_dimension_numbers<[1], [0], [0], [1], [0, 0, 1, 1], [], []>} : vector<8x8xf32>, vector<8x8xf32>, vector<8x8xf32> -> vector<8x8xf32>
    %134 = vector.extract_strided_slice %38 {offsets = [0, 0], sizes = [8, 32], strides = [1, 1]} : vector<32x32xf32> to vector<8x32xf32>
    %cst_45 = arith.constant dense<0.000000e+00> : vector<8x32xf32>
    %135 = tpu.matmul %133, %134, %cst_45 {dimension_numbers = #tpu.dot_dimension_numbers<[1], [0], [0], [1], [0, 0, 1, 1], [], []>} : vector<8x8xf32>, vector<8x32xf32>, vector<8x32xf32> -> vector<8x32xf32>
    %136 = vector.broadcast %39 : vector<1x32xf32> to vector<8x32xf32>
    %137 = arith.addf %136, %135 : vector<8x32xf32>
    %138 = vector.extract_strided_slice %130 {offsets = [8, 0], sizes = [8, 8], strides = [1, 1]} : vector<32x8xf32> to vector<8x8xf32>
    %139 = vector.extract_strided_slice %100 {offsets = [0, 8], sizes = [8, 8], strides = [1, 1]} : vector<8x32xf32> to vector<8x8xf32>
    %cst_46 = arith.constant dense<0.000000e+00> : vector<8x8xf32>
    %140 = tpu.matmul %138, %139, %cst_46 {dimension_numbers = #tpu.dot_dimension_numbers<[1], [0], [0], [1], [0, 0, 1, 1], [], []>} : vector<8x8xf32>, vector<8x8xf32>, vector<8x8xf32> -> vector<8x8xf32>
    %141 = vector.extract_strided_slice %38 {offsets = [8, 0], sizes = [8, 32], strides = [1, 1]} : vector<32x32xf32> to vector<8x32xf32>
    %cst_47 = arith.constant dense<0.000000e+00> : vector<8x32xf32>
    %142 = tpu.matmul %140, %141, %cst_47 {dimension_numbers = #tpu.dot_dimension_numbers<[1], [0], [0], [1], [0, 0, 1, 1], [], []>} : vector<8x8xf32>, vector<8x32xf32>, vector<8x32xf32> -> vector<8x32xf32>
    %143 = arith.addf %137, %142 : vector<8x32xf32>
    %144 = vector.extract_strided_slice %130 {offsets = [16, 0], sizes = [8, 8], strides = [1, 1]} : vector<32x8xf32> to vector<8x8xf32>
    %145 = vector.extract_strided_slice %100 {offsets = [0, 16], sizes = [8, 8], strides = [1, 1]} : vector<8x32xf32> to vector<8x8xf32>
    %cst_48 = arith.constant dense<0.000000e+00> : vector<8x8xf32>
    %146 = tpu.matmul %144, %145, %cst_48 {dimension_numbers = #tpu.dot_dimension_numbers<[1], [0], [0], [1], [0, 0, 1, 1], [], []>} : vector<8x8xf32>, vector<8x8xf32>, vector<8x8xf32> -> vector<8x8xf32>
    %147 = vector.extract_strided_slice %38 {offsets = [16, 0], sizes = [8, 32], strides = [1, 1]} : vector<32x32xf32> to vector<8x32xf32>
    %cst_49 = arith.constant dense<0.000000e+00> : vector<8x32xf32>
    %148 = tpu.matmul %146, %147, %cst_49 {dimension_numbers = #tpu.dot_dimension_numbers<[1], [0], [0], [1], [0, 0, 1, 1], [], []>} : vector<8x8xf32>, vector<8x32xf32>, vector<8x32xf32> -> vector<8x32xf32>
    %149 = arith.addf %143, %148 : vector<8x32xf32>
    %150 = vector.extract_strided_slice %130 {offsets = [24, 0], sizes = [8, 8], strides = [1, 1]} : vector<32x8xf32> to vector<8x8xf32>
    %151 = vector.extract_strided_slice %100 {offsets = [0, 24], sizes = [8, 8], strides = [1, 1]} : vector<8x32xf32> to vector<8x8xf32>
    %cst_50 = arith.constant dense<0.000000e+00> : vector<8x8xf32>
    %152 = tpu.matmul %150, %151, %cst_50 {dimension_numbers = #tpu.dot_dimension_numbers<[1], [0], [0], [1], [0, 0, 1, 1], [], []>} : vector<8x8xf32>, vector<8x8xf32>, vector<8x8xf32> -> vector<8x8xf32>
    %153 = vector.extract_strided_slice %38 {offsets = [24, 0], sizes = [8, 32], strides = [1, 1]} : vector<32x32xf32> to vector<8x32xf32>
    %cst_51 = arith.constant dense<0.000000e+00> : vector<8x32xf32>
    %154 = tpu.matmul %152, %153, %cst_51 {dimension_numbers = #tpu.dot_dimension_numbers<[1], [0], [0], [1], [0, 0, 1, 1], [], []>} : vector<8x8xf32>, vector<8x32xf32>, vector<8x32xf32> -> vector<8x32xf32>
    %155 = arith.addf %149, %154 : vector<8x32xf32>
    %156 = vector.extract_strided_slice %35 {offsets = [16, 0], sizes = [8, 32], strides = [1, 1]} : vector<32x32xf32> to vector<8x32xf32>
    %157 = vector.extract_strided_slice %36 {offsets = [16, 0], sizes = [8, 32], strides = [1, 1]} : vector<32x32xf32> to vector<8x32xf32>
    %158 = vector.extract_strided_slice %37 {offsets = [16, 0], sizes = [8, 32], strides = [1, 1]} : vector<32x32xf32> to vector<8x32xf32>
    %159 = tpu.transpose %157, [1, 0] : vector<8x32xf32> -> vector<32x8xf32>
    %160 = vector.extract_strided_slice %4 {offsets = [2, 0, 0], sizes = [1, 8, 8], strides = [1, 1, 1]} : vector<4x8x8xf32> to vector<1x8x8xf32>
    %161 = vector.shape_cast %160 : vector<1x8x8xf32> to vector<8x8xf32>
    %162 = vector.extract_strided_slice %156 {offsets = [0, 0], sizes = [8, 8], strides = [1, 1]} : vector<8x32xf32> to vector<8x8xf32>
    %163 = vector.extract_strided_slice %159 {offsets = [0, 0], sizes = [8, 8], strides = [1, 1]} : vector<32x8xf32> to vector<8x8xf32>
    %cst_52 = arith.constant dense<0.000000e+00> : vector<8x8xf32>
    %164 = tpu.matmul %162, %163, %cst_52 {dimension_numbers = #tpu.dot_dimension_numbers<[1], [0], [0], [1], [0, 0, 1, 1], [], []>} : vector<8x8xf32>, vector<8x8xf32>, vector<8x8xf32> -> vector<8x8xf32>
    %165 = arith.addf %164, %161 : vector<8x8xf32>
    %166 = vector.extract_strided_slice %156 {offsets = [0, 8], sizes = [8, 8], strides = [1, 1]} : vector<8x32xf32> to vector<8x8xf32>
    %167 = vector.extract_strided_slice %159 {offsets = [8, 0], sizes = [8, 8], strides = [1, 1]} : vector<32x8xf32> to vector<8x8xf32>
    %cst_53 = arith.constant dense<0.000000e+00> : vector<8x8xf32>
    %168 = tpu.matmul %166, %167, %cst_53 {dimension_numbers = #tpu.dot_dimension_numbers<[1], [0], [0], [1], [0, 0, 1, 1], [], []>} : vector<8x8xf32>, vector<8x8xf32>, vector<8x8xf32> -> vector<8x8xf32>
    %169 = arith.addf %168, %161 : vector<8x8xf32>
    %170 = vector.extract_strided_slice %156 {offsets = [0, 16], sizes = [8, 8], strides = [1, 1]} : vector<8x32xf32> to vector<8x8xf32>
    %171 = vector.extract_strided_slice %159 {offsets = [16, 0], sizes = [8, 8], strides = [1, 1]} : vector<32x8xf32> to vector<8x8xf32>
    %cst_54 = arith.constant dense<0.000000e+00> : vector<8x8xf32>
    %172 = tpu.matmul %170, %171, %cst_54 {dimension_numbers = #tpu.dot_dimension_numbers<[1], [0], [0], [1], [0, 0, 1, 1], [], []>} : vector<8x8xf32>, vector<8x8xf32>, vector<8x8xf32> -> vector<8x8xf32>
    %173 = arith.addf %172, %161 : vector<8x8xf32>
    %174 = vector.extract_strided_slice %156 {offsets = [0, 24], sizes = [8, 8], strides = [1, 1]} : vector<8x32xf32> to vector<8x8xf32>
    %175 = vector.extract_strided_slice %159 {offsets = [24, 0], sizes = [8, 8], strides = [1, 1]} : vector<32x8xf32> to vector<8x8xf32>
    %cst_55 = arith.constant dense<0.000000e+00> : vector<8x8xf32>
    %176 = tpu.matmul %174, %175, %cst_55 {dimension_numbers = #tpu.dot_dimension_numbers<[1], [0], [0], [1], [0, 0, 1, 1], [], []>} : vector<8x8xf32>, vector<8x8xf32>, vector<8x8xf32> -> vector<8x8xf32>
    %177 = arith.addf %176, %161 : vector<8x8xf32>
    %178 = tpu.concatenate %165, %169, %173, %177 in 0 : vector<8x8xf32>, vector<8x8xf32>, vector<8x8xf32>, vector<8x8xf32> -> vector<32x8xf32>
    %cst_56 = arith.constant dense<0xFF800000> : vector<32xf32>
    %179 = vector.multi_reduction <maximumf>, %178, %cst_56 [1] : vector<32x8xf32> to vector<32xf32>
    %180 = vector.shape_cast %179 : vector<32xf32> to vector<32x1xf32>
    %181 = vector.broadcast %180 : vector<32x1xf32> to vector<32x8xf32>
    %182 = arith.subf %178, %181 : vector<32x8xf32>
    %183 = math.exp %182 : vector<32x8xf32>
    %cst_57 = arith.constant dense<0.000000e+00> : vector<32xf32>
    %184 = vector.multi_reduction <add>, %183, %cst_57 [1] : vector<32x8xf32> to vector<32xf32>
    %185 = vector.shape_cast %184 : vector<32xf32> to vector<32x1xf32>
    %186 = tpu.reciprocal %185 {approx = true} : vector<32x1xf32> -> vector<32x1xf32>
    %187 = vector.broadcast %186 : vector<32x1xf32> to vector<32x8xf32>
    %188 = arith.mulf %183, %187 : vector<32x8xf32>
    %189 = vector.extract_strided_slice %188 {offsets = [0, 0], sizes = [8, 8], strides = [1, 1]} : vector<32x8xf32> to vector<8x8xf32>
    %190 = vector.extract_strided_slice %158 {offsets = [0, 0], sizes = [8, 8], strides = [1, 1]} : vector<8x32xf32> to vector<8x8xf32>
    %cst_58 = arith.constant dense<0.000000e+00> : vector<8x8xf32>
    %191 = tpu.matmul %189, %190, %cst_58 {dimension_numbers = #tpu.dot_dimension_numbers<[1], [0], [0], [1], [0, 0, 1, 1], [], []>} : vector<8x8xf32>, vector<8x8xf32>, vector<8x8xf32> -> vector<8x8xf32>
    %192 = vector.extract_strided_slice %38 {offsets = [0, 0], sizes = [8, 32], strides = [1, 1]} : vector<32x32xf32> to vector<8x32xf32>
    %cst_59 = arith.constant dense<0.000000e+00> : vector<8x32xf32>
    %193 = tpu.matmul %191, %192, %cst_59 {dimension_numbers = #tpu.dot_dimension_numbers<[1], [0], [0], [1], [0, 0, 1, 1], [], []>} : vector<8x8xf32>, vector<8x32xf32>, vector<8x32xf32> -> vector<8x32xf32>
    %194 = vector.broadcast %39 : vector<1x32xf32> to vector<8x32xf32>
    %195 = arith.addf %194, %193 : vector<8x32xf32>
    %196 = vector.extract_strided_slice %188 {offsets = [8, 0], sizes = [8, 8], strides = [1, 1]} : vector<32x8xf32> to vector<8x8xf32>
    %197 = vector.extract_strided_slice %158 {offsets = [0, 8], sizes = [8, 8], strides = [1, 1]} : vector<8x32xf32> to vector<8x8xf32>
    %cst_60 = arith.constant dense<0.000000e+00> : vector<8x8xf32>
    %198 = tpu.matmul %196, %197, %cst_60 {dimension_numbers = #tpu.dot_dimension_numbers<[1], [0], [0], [1], [0, 0, 1, 1], [], []>} : vector<8x8xf32>, vector<8x8xf32>, vector<8x8xf32> -> vector<8x8xf32>
    %199 = vector.extract_strided_slice %38 {offsets = [8, 0], sizes = [8, 32], strides = [1, 1]} : vector<32x32xf32> to vector<8x32xf32>
    %cst_61 = arith.constant dense<0.000000e+00> : vector<8x32xf32>
    %200 = tpu.matmul %198, %199, %cst_61 {dimension_numbers = #tpu.dot_dimension_numbers<[1], [0], [0], [1], [0, 0, 1, 1], [], []>} : vector<8x8xf32>, vector<8x32xf32>, vector<8x32xf32> -> vector<8x32xf32>
    %201 = arith.addf %195, %200 : vector<8x32xf32>
    %202 = vector.extract_strided_slice %188 {offsets = [16, 0], sizes = [8, 8], strides = [1, 1]} : vector<32x8xf32> to vector<8x8xf32>
    %203 = vector.extract_strided_slice %158 {offsets = [0, 16], sizes = [8, 8], strides = [1, 1]} : vector<8x32xf32> to vector<8x8xf32>
    %cst_62 = arith.constant dense<0.000000e+00> : vector<8x8xf32>
    %204 = tpu.matmul %202, %203, %cst_62 {dimension_numbers = #tpu.dot_dimension_numbers<[1], [0], [0], [1], [0, 0, 1, 1], [], []>} : vector<8x8xf32>, vector<8x8xf32>, vector<8x8xf32> -> vector<8x8xf32>
    %205 = vector.extract_strided_slice %38 {offsets = [16, 0], sizes = [8, 32], strides = [1, 1]} : vector<32x32xf32> to vector<8x32xf32>
    %cst_63 = arith.constant dense<0.000000e+00> : vector<8x32xf32>
    %206 = tpu.matmul %204, %205, %cst_63 {dimension_numbers = #tpu.dot_dimension_numbers<[1], [0], [0], [1], [0, 0, 1, 1], [], []>} : vector<8x8xf32>, vector<8x32xf32>, vector<8x32xf32> -> vector<8x32xf32>
    %207 = arith.addf %201, %206 : vector<8x32xf32>
    %208 = vector.extract_strided_slice %188 {offsets = [24, 0], sizes = [8, 8], strides = [1, 1]} : vector<32x8xf32> to vector<8x8xf32>
    %209 = vector.extract_strided_slice %158 {offsets = [0, 24], sizes = [8, 8], strides = [1, 1]} : vector<8x32xf32> to vector<8x8xf32>
    %cst_64 = arith.constant dense<0.000000e+00> : vector<8x8xf32>
    %210 = tpu.matmul %208, %209, %cst_64 {dimension_numbers = #tpu.dot_dimension_numbers<[1], [0], [0], [1], [0, 0, 1, 1], [], []>} : vector<8x8xf32>, vector<8x8xf32>, vector<8x8xf32> -> vector<8x8xf32>
    %211 = vector.extract_strided_slice %38 {offsets = [24, 0], sizes = [8, 32], strides = [1, 1]} : vector<32x32xf32> to vector<8x32xf32>
    %cst_65 = arith.constant dense<0.000000e+00> : vector<8x32xf32>
    %212 = tpu.matmul %210, %211, %cst_65 {dimension_numbers = #tpu.dot_dimension_numbers<[1], [0], [0], [1], [0, 0, 1, 1], [], []>} : vector<8x8xf32>, vector<8x32xf32>, vector<8x32xf32> -> vector<8x32xf32>
    %213 = arith.addf %207, %212 : vector<8x32xf32>
    %214 = vector.extract_strided_slice %35 {offsets = [24, 0], sizes = [8, 32], strides = [1, 1]} : vector<32x32xf32> to vector<8x32xf32>
    %215 = vector.extract_strided_slice %36 {offsets = [24, 0], sizes = [8, 32], strides = [1, 1]} : vector<32x32xf32> to vector<8x32xf32>
    %216 = vector.extract_strided_slice %37 {offsets = [24, 0], sizes = [8, 32], strides = [1, 1]} : vector<32x32xf32> to vector<8x32xf32>
    %217 = tpu.transpose %215, [1, 0] : vector<8x32xf32> -> vector<32x8xf32>
    %218 = vector.extract_strided_slice %4 {offsets = [3, 0, 0], sizes = [1, 8, 8], strides = [1, 1, 1]} : vector<4x8x8xf32> to vector<1x8x8xf32>
    %219 = vector.shape_cast %218 : vector<1x8x8xf32> to vector<8x8xf32>
    %220 = vector.extract_strided_slice %214 {offsets = [0, 0], sizes = [8, 8], strides = [1, 1]} : vector<8x32xf32> to vector<8x8xf32>
    %221 = vector.extract_strided_slice %217 {offsets = [0, 0], sizes = [8, 8], strides = [1, 1]} : vector<32x8xf32> to vector<8x8xf32>
    %cst_66 = arith.constant dense<0.000000e+00> : vector<8x8xf32>
    %222 = tpu.matmul %220, %221, %cst_66 {dimension_numbers = #tpu.dot_dimension_numbers<[1], [0], [0], [1], [0, 0, 1, 1], [], []>} : vector<8x8xf32>, vector<8x8xf32>, vector<8x8xf32> -> vector<8x8xf32>
    %223 = arith.addf %222, %219 : vector<8x8xf32>
    %224 = vector.extract_strided_slice %214 {offsets = [0, 8], sizes = [8, 8], strides = [1, 1]} : vector<8x32xf32> to vector<8x8xf32>
    %225 = vector.extract_strided_slice %217 {offsets = [8, 0], sizes = [8, 8], strides = [1, 1]} : vector<32x8xf32> to vector<8x8xf32>
    %cst_67 = arith.constant dense<0.000000e+00> : vector<8x8xf32>
    %226 = tpu.matmul %224, %225, %cst_67 {dimension_numbers = #tpu.dot_dimension_numbers<[1], [0], [0], [1], [0, 0, 1, 1], [], []>} : vector<8x8xf32>, vector<8x8xf32>, vector<8x8xf32> -> vector<8x8xf32>
    %227 = arith.addf %226, %219 : vector<8x8xf32>
    %228 = vector.extract_strided_slice %214 {offsets = [0, 16], sizes = [8, 8], strides = [1, 1]} : vector<8x32xf32> to vector<8x8xf32>
    %229 = vector.extract_strided_slice %217 {offsets = [16, 0], sizes = [8, 8], strides = [1, 1]} : vector<32x8xf32> to vector<8x8xf32>
    %cst_68 = arith.constant dense<0.000000e+00> : vector<8x8xf32>
    %230 = tpu.matmul %228, %229, %cst_68 {dimension_numbers = #tpu.dot_dimension_numbers<[1], [0], [0], [1], [0, 0, 1, 1], [], []>} : vector<8x8xf32>, vector<8x8xf32>, vector<8x8xf32> -> vector<8x8xf32>
    %231 = arith.addf %230, %219 : vector<8x8xf32>
    %232 = vector.extract_strided_slice %214 {offsets = [0, 24], sizes = [8, 8], strides = [1, 1]} : vector<8x32xf32> to vector<8x8xf32>
    %233 = vector.extract_strided_slice %217 {offsets = [24, 0], sizes = [8, 8], strides = [1, 1]} : vector<32x8xf32> to vector<8x8xf32>
    %cst_69 = arith.constant dense<0.000000e+00> : vector<8x8xf32>
    %234 = tpu.matmul %232, %233, %cst_69 {dimension_numbers = #tpu.dot_dimension_numbers<[1], [0], [0], [1], [0, 0, 1, 1], [], []>} : vector<8x8xf32>, vector<8x8xf32>, vector<8x8xf32> -> vector<8x8xf32>
    %235 = arith.addf %234, %219 : vector<8x8xf32>
    %236 = tpu.concatenate %223, %227, %231, %235 in 0 : vector<8x8xf32>, vector<8x8xf32>, vector<8x8xf32>, vector<8x8xf32> -> vector<32x8xf32>
    %cst_70 = arith.constant dense<0xFF800000> : vector<32xf32>
    %237 = vector.multi_reduction <maximumf>, %236, %cst_70 [1] : vector<32x8xf32> to vector<32xf32>
    %238 = vector.shape_cast %237 : vector<32xf32> to vector<32x1xf32>
    %239 = vector.broadcast %238 : vector<32x1xf32> to vector<32x8xf32>
    %240 = arith.subf %236, %239 : vector<32x8xf32>
    %241 = math.exp %240 : vector<32x8xf32>
    %cst_71 = arith.constant dense<0.000000e+00> : vector<32xf32>
    %242 = vector.multi_reduction <add>, %241, %cst_71 [1] : vector<32x8xf32> to vector<32xf32>
    %243 = vector.shape_cast %242 : vector<32xf32> to vector<32x1xf32>
    %244 = tpu.reciprocal %243 {approx = true} : vector<32x1xf32> -> vector<32x1xf32>
    %245 = vector.broadcast %244 : vector<32x1xf32> to vector<32x8xf32>
    %246 = arith.mulf %241, %245 : vector<32x8xf32>
    %247 = vector.extract_strided_slice %246 {offsets = [0, 0], sizes = [8, 8], strides = [1, 1]} : vector<32x8xf32> to vector<8x8xf32>
    %248 = vector.extract_strided_slice %216 {offsets = [0, 0], sizes = [8, 8], strides = [1, 1]} : vector<8x32xf32> to vector<8x8xf32>
    %cst_72 = arith.constant dense<0.000000e+00> : vector<8x8xf32>
    %249 = tpu.matmul %247, %248, %cst_72 {dimension_numbers = #tpu.dot_dimension_numbers<[1], [0], [0], [1], [0, 0, 1, 1], [], []>} : vector<8x8xf32>, vector<8x8xf32>, vector<8x8xf32> -> vector<8x8xf32>
    %250 = vector.extract_strided_slice %38 {offsets = [0, 0], sizes = [8, 32], strides = [1, 1]} : vector<32x32xf32> to vector<8x32xf32>
    %cst_73 = arith.constant dense<0.000000e+00> : vector<8x32xf32>
    %251 = tpu.matmul %249, %250, %cst_73 {dimension_numbers = #tpu.dot_dimension_numbers<[1], [0], [0], [1], [0, 0, 1, 1], [], []>} : vector<8x8xf32>, vector<8x32xf32>, vector<8x32xf32> -> vector<8x32xf32>
    %252 = vector.broadcast %39 : vector<1x32xf32> to vector<8x32xf32>
    %253 = arith.addf %252, %251 : vector<8x32xf32>
    %254 = vector.extract_strided_slice %246 {offsets = [8, 0], sizes = [8, 8], strides = [1, 1]} : vector<32x8xf32> to vector<8x8xf32>
    %255 = vector.extract_strided_slice %216 {offsets = [0, 8], sizes = [8, 8], strides = [1, 1]} : vector<8x32xf32> to vector<8x8xf32>
    %cst_74 = arith.constant dense<0.000000e+00> : vector<8x8xf32>
    %256 = tpu.matmul %254, %255, %cst_74 {dimension_numbers = #tpu.dot_dimension_numbers<[1], [0], [0], [1], [0, 0, 1, 1], [], []>} : vector<8x8xf32>, vector<8x8xf32>, vector<8x8xf32> -> vector<8x8xf32>
    %257 = vector.extract_strided_slice %38 {offsets = [8, 0], sizes = [8, 32], strides = [1, 1]} : vector<32x32xf32> to vector<8x32xf32>
    %cst_75 = arith.constant dense<0.000000e+00> : vector<8x32xf32>
    %258 = tpu.matmul %256, %257, %cst_75 {dimension_numbers = #tpu.dot_dimension_numbers<[1], [0], [0], [1], [0, 0, 1, 1], [], []>} : vector<8x8xf32>, vector<8x32xf32>, vector<8x32xf32> -> vector<8x32xf32>
    %259 = arith.addf %253, %258 : vector<8x32xf32>
    %260 = vector.extract_strided_slice %246 {offsets = [16, 0], sizes = [8, 8], strides = [1, 1]} : vector<32x8xf32> to vector<8x8xf32>
    %261 = vector.extract_strided_slice %216 {offsets = [0, 16], sizes = [8, 8], strides = [1, 1]} : vector<8x32xf32> to vector<8x8xf32>
    %cst_76 = arith.constant dense<0.000000e+00> : vector<8x8xf32>
    %262 = tpu.matmul %260, %261, %cst_76 {dimension_numbers = #tpu.dot_dimension_numbers<[1], [0], [0], [1], [0, 0, 1, 1], [], []>} : vector<8x8xf32>, vector<8x8xf32>, vector<8x8xf32> -> vector<8x8xf32>
    %263 = vector.extract_strided_slice %38 {offsets = [16, 0], sizes = [8, 32], strides = [1, 1]} : vector<32x32xf32> to vector<8x32xf32>
    %cst_77 = arith.constant dense<0.000000e+00> : vector<8x32xf32>
    %264 = tpu.matmul %262, %263, %cst_77 {dimension_numbers = #tpu.dot_dimension_numbers<[1], [0], [0], [1], [0, 0, 1, 1], [], []>} : vector<8x8xf32>, vector<8x32xf32>, vector<8x32xf32> -> vector<8x32xf32>
    %265 = arith.addf %259, %264 : vector<8x32xf32>
    %266 = vector.extract_strided_slice %246 {offsets = [24, 0], sizes = [8, 8], strides = [1, 1]} : vector<32x8xf32> to vector<8x8xf32>
    %267 = vector.extract_strided_slice %216 {offsets = [0, 24], sizes = [8, 8], strides = [1, 1]} : vector<8x32xf32> to vector<8x8xf32>
    %cst_78 = arith.constant dense<0.000000e+00> : vector<8x8xf32>
    %268 = tpu.matmul %266, %267, %cst_78 {dimension_numbers = #tpu.dot_dimension_numbers<[1], [0], [0], [1], [0, 0, 1, 1], [], []>} : vector<8x8xf32>, vector<8x8xf32>, vector<8x8xf32> -> vector<8x8xf32>
    %269 = vector.extract_strided_slice %38 {offsets = [24, 0], sizes = [8, 32], strides = [1, 1]} : vector<32x32xf32> to vector<8x32xf32>
    %cst_79 = arith.constant dense<0.000000e+00> : vector<8x32xf32>
    %270 = tpu.matmul %268, %269, %cst_79 {dimension_numbers = #tpu.dot_dimension_numbers<[1], [0], [0], [1], [0, 0, 1, 1], [], []>} : vector<8x8xf32>, vector<8x32xf32>, vector<8x32xf32> -> vector<8x32xf32>
    %271 = arith.addf %265, %270 : vector<8x32xf32>
    %272 = tpu.concatenate %97, %155, %213, %271 in 0 : vector<8x32xf32>, vector<8x32xf32>, vector<8x32xf32>, vector<8x32xf32> -> vector<32x32xf32>
    %273 = arith.addf %1, %272 : vector<32x32xf32>
    %274 = vector.extract_strided_slice %6 {offsets = [2, 0], sizes = [1, 32], strides = [1, 1]} : vector<10x32xf32> to vector<1x32xf32>
    %275 = vector.extract_strided_slice %6 {offsets = [3, 0], sizes = [1, 32], strides = [1, 1]} : vector<10x32xf32> to vector<1x32xf32>
    %cst_80 = arith.constant dense<0.000000e+00> : vector<32xf32>
    %276 = vector.multi_reduction <add>, %273, %cst_80 [1] : vector<32x32xf32> to vector<32xf32>
    %277 = vector.shape_cast %276 : vector<32xf32> to vector<32x1xf32>
    %cst_81 = arith.constant 3.200000e+01 : f32
    %278 = vector.broadcast %cst_81 : f32 to vector<32x1xf32>
    %279 = arith.divf %277, %278 : vector<32x1xf32>
    %280 = vector.broadcast %279 : vector<32x1xf32> to vector<32x32xf32>
    %281 = arith.subf %273, %280 : vector<32x32xf32>
    %282 = arith.mulf %281, %281 : vector<32x32xf32>
    %cst_82 = arith.constant dense<0.000000e+00> : vector<32xf32>
    %283 = vector.multi_reduction <add>, %282, %cst_82 [1] : vector<32x32xf32> to vector<32xf32>
    %284 = vector.shape_cast %283 : vector<32xf32> to vector<32x1xf32>
    %cst_83 = arith.constant 0.0322580636 : f32
    %285 = vector.broadcast %cst_83 : f32 to vector<32x1xf32>
    %286 = arith.mulf %284, %285 : vector<32x1xf32>
    %287 = math.sqrt %286 : vector<32x1xf32>
    %288 = vector.broadcast %274 : vector<1x32xf32> to vector<32x32xf32>
    %289 = arith.mulf %288, %281 : vector<32x32xf32>
    %cst_84 = arith.constant 9.99999997E-7 : f32
    %290 = vector.broadcast %cst_84 : f32 to vector<32x1xf32>
    %291 = arith.addf %287, %290 : vector<32x1xf32>
    %292 = tpu.reciprocal %291 {approx = true} : vector<32x1xf32> -> vector<32x1xf32>
    %293 = vector.broadcast %292 : vector<32x1xf32> to vector<32x32xf32>
    %294 = arith.mulf %289, %293 : vector<32x32xf32>
    %295 = vector.broadcast %275 : vector<1x32xf32> to vector<32x32xf32>
    %296 = arith.addf %294, %295 : vector<32x32xf32>
    %c0_85 = arith.constant 0 : index
    %c0_86 = arith.constant 0 : index
    %297 = vector.load %arg9[%c0_85, %c0_86] : memref<32x32xf32, #tpu.memory_space<vmem>>, vector<32x32xf32>
    %cst_87 = arith.constant dense<0.000000e+00> : vector<32x32xf32>
    %298 = tpu.matmul %296, %297, %cst_87 {dimension_numbers = #tpu.dot_dimension_numbers<[1], [0], [0], [1], [0, 0, 1, 1], [], []>} : vector<32x32xf32>, vector<32x32xf32>, vector<32x32xf32> -> vector<32x32xf32>
    %299 = vector.extract_strided_slice %6 {offsets = [7, 0], sizes = [1, 32], strides = [1, 1]} : vector<10x32xf32> to vector<1x32xf32>
    %300 = vector.broadcast %299 : vector<1x32xf32> to vector<32x32xf32>
    %301 = arith.addf %298, %300 : vector<32x32xf32>
    %c0_88 = arith.constant 0 : index
    %c0_89 = arith.constant 0 : index
    %302 = vector.load %arg10[%c0_88, %c0_89] : memref<32x64xf32, #tpu.memory_space<vmem>>, vector<32x64xf32>
    %cst_90 = arith.constant dense<0.000000e+00> : vector<32x64xf32>
    %303 = tpu.matmul %3, %302, %cst_90 {dimension_numbers = #tpu.dot_dimension_numbers<[1], [0], [0], [1], [0, 0, 1, 1], [], []>} : vector<32x32xf32>, vector<32x64xf32>, vector<32x64xf32> -> vector<32x64xf32>
    %c0_91 = arith.constant 0 : index
    %c0_92 = arith.constant 0 : index
    %304 = vector.load %arg11[%c0_91, %c0_92] : memref<1x64xf32, #tpu.memory_space<vmem>>, vector<1x64xf32>
    %305 = vector.broadcast %304 : vector<1x64xf32> to vector<32x64xf32>
    %306 = arith.addf %303, %305 : vector<32x64xf32>
    %307 = vector.extract_strided_slice %306 {offsets = [0, 0], sizes = [32, 32], strides = [1, 1]} : vector<32x64xf32> to vector<32x32xf32>
    %308 = vector.extract_strided_slice %306 {offsets = [0, 32], sizes = [32, 32], strides = [1, 1]} : vector<32x64xf32> to vector<32x32xf32>
    %c0_93 = arith.constant 0 : index
    %c0_94 = arith.constant 0 : index
    %309 = vector.load %arg12[%c0_93, %c0_94] : memref<32x32xf32, #tpu.memory_space<vmem>>, vector<32x32xf32>
    %310 = vector.extract_strided_slice %6 {offsets = [8, 0], sizes = [1, 32], strides = [1, 1]} : vector<10x32xf32> to vector<1x32xf32>
    %311 = vector.extract_strided_slice %301 {offsets = [0, 0], sizes = [8, 32], strides = [1, 1]} : vector<32x32xf32> to vector<8x32xf32>
    %312 = vector.extract_strided_slice %307 {offsets = [0, 0], sizes = [8, 32], strides = [1, 1]} : vector<32x32xf32> to vector<8x32xf32>
    %313 = vector.extract_strided_slice %308 {offsets = [0, 0], sizes = [8, 32], strides = [1, 1]} : vector<32x32xf32> to vector<8x32xf32>
    %314 = tpu.transpose %312, [1, 0] : vector<8x32xf32> -> vector<32x8xf32>
    %315 = vector.extract_strided_slice %5 {offsets = [0, 0, 0], sizes = [1, 8, 8], strides = [1, 1, 1]} : vector<4x8x8xf32> to vector<1x8x8xf32>
    %316 = vector.shape_cast %315 : vector<1x8x8xf32> to vector<8x8xf32>
    %317 = vector.extract_strided_slice %311 {offsets = [0, 0], sizes = [8, 8], strides = [1, 1]} : vector<8x32xf32> to vector<8x8xf32>
    %318 = vector.extract_strided_slice %314 {offsets = [0, 0], sizes = [8, 8], strides = [1, 1]} : vector<32x8xf32> to vector<8x8xf32>
    %cst_95 = arith.constant dense<0.000000e+00> : vector<8x8xf32>
    %319 = tpu.matmul %317, %318, %cst_95 {dimension_numbers = #tpu.dot_dimension_numbers<[1], [0], [0], [1], [0, 0, 1, 1], [], []>} : vector<8x8xf32>, vector<8x8xf32>, vector<8x8xf32> -> vector<8x8xf32>
    %320 = arith.addf %319, %316 : vector<8x8xf32>
    %321 = vector.extract_strided_slice %311 {offsets = [0, 8], sizes = [8, 8], strides = [1, 1]} : vector<8x32xf32> to vector<8x8xf32>
    %322 = vector.extract_strided_slice %314 {offsets = [8, 0], sizes = [8, 8], strides = [1, 1]} : vector<32x8xf32> to vector<8x8xf32>
    %cst_96 = arith.constant dense<0.000000e+00> : vector<8x8xf32>
    %323 = tpu.matmul %321, %322, %cst_96 {dimension_numbers = #tpu.dot_dimension_numbers<[1], [0], [0], [1], [0, 0, 1, 1], [], []>} : vector<8x8xf32>, vector<8x8xf32>, vector<8x8xf32> -> vector<8x8xf32>
    %324 = arith.addf %323, %316 : vector<8x8xf32>
    %325 = vector.extract_strided_slice %311 {offsets = [0, 16], sizes = [8, 8], strides = [1, 1]} : vector<8x32xf32> to vector<8x8xf32>
    %326 = vector.extract_strided_slice %314 {offsets = [16, 0], sizes = [8, 8], strides = [1, 1]} : vector<32x8xf32> to vector<8x8xf32>
    %cst_97 = arith.constant dense<0.000000e+00> : vector<8x8xf32>
    %327 = tpu.matmul %325, %326, %cst_97 {dimension_numbers = #tpu.dot_dimension_numbers<[1], [0], [0], [1], [0, 0, 1, 1], [], []>} : vector<8x8xf32>, vector<8x8xf32>, vector<8x8xf32> -> vector<8x8xf32>
    %328 = arith.addf %327, %316 : vector<8x8xf32>
    %329 = vector.extract_strided_slice %311 {offsets = [0, 24], sizes = [8, 8], strides = [1, 1]} : vector<8x32xf32> to vector<8x8xf32>
    %330 = vector.extract_strided_slice %314 {offsets = [24, 0], sizes = [8, 8], strides = [1, 1]} : vector<32x8xf32> to vector<8x8xf32>
    %cst_98 = arith.constant dense<0.000000e+00> : vector<8x8xf32>
    %331 = tpu.matmul %329, %330, %cst_98 {dimension_numbers = #tpu.dot_dimension_numbers<[1], [0], [0], [1], [0, 0, 1, 1], [], []>} : vector<8x8xf32>, vector<8x8xf32>, vector<8x8xf32> -> vector<8x8xf32>
    %332 = arith.addf %331, %316 : vector<8x8xf32>
    %333 = tpu.concatenate %320, %324, %328, %332 in 0 : vector<8x8xf32>, vector<8x8xf32>, vector<8x8xf32>, vector<8x8xf32> -> vector<32x8xf32>
    %cst_99 = arith.constant dense<0xFF800000> : vector<32xf32>
    %334 = vector.multi_reduction <maximumf>, %333, %cst_99 [1] : vector<32x8xf32> to vector<32xf32>
    %335 = vector.shape_cast %334 : vector<32xf32> to vector<32x1xf32>
    %336 = vector.broadcast %335 : vector<32x1xf32> to vector<32x8xf32>
    %337 = arith.subf %333, %336 : vector<32x8xf32>
    %338 = math.exp %337 : vector<32x8xf32>
    %cst_100 = arith.constant dense<0.000000e+00> : vector<32xf32>
    %339 = vector.multi_reduction <add>, %338, %cst_100 [1] : vector<32x8xf32> to vector<32xf32>
    %340 = vector.shape_cast %339 : vector<32xf32> to vector<32x1xf32>
    %341 = tpu.reciprocal %340 {approx = true} : vector<32x1xf32> -> vector<32x1xf32>
    %342 = vector.broadcast %341 : vector<32x1xf32> to vector<32x8xf32>
    %343 = arith.mulf %338, %342 : vector<32x8xf32>
    %344 = vector.extract_strided_slice %343 {offsets = [0, 0], sizes = [8, 8], strides = [1, 1]} : vector<32x8xf32> to vector<8x8xf32>
    %345 = vector.extract_strided_slice %313 {offsets = [0, 0], sizes = [8, 8], strides = [1, 1]} : vector<8x32xf32> to vector<8x8xf32>
    %cst_101 = arith.constant dense<0.000000e+00> : vector<8x8xf32>
    %346 = tpu.matmul %344, %345, %cst_101 {dimension_numbers = #tpu.dot_dimension_numbers<[1], [0], [0], [1], [0, 0, 1, 1], [], []>} : vector<8x8xf32>, vector<8x8xf32>, vector<8x8xf32> -> vector<8x8xf32>
    %347 = vector.extract_strided_slice %309 {offsets = [0, 0], sizes = [8, 32], strides = [1, 1]} : vector<32x32xf32> to vector<8x32xf32>
    %cst_102 = arith.constant dense<0.000000e+00> : vector<8x32xf32>
    %348 = tpu.matmul %346, %347, %cst_102 {dimension_numbers = #tpu.dot_dimension_numbers<[1], [0], [0], [1], [0, 0, 1, 1], [], []>} : vector<8x8xf32>, vector<8x32xf32>, vector<8x32xf32> -> vector<8x32xf32>
    %349 = vector.broadcast %310 : vector<1x32xf32> to vector<8x32xf32>
    %350 = arith.addf %349, %348 : vector<8x32xf32>
    %351 = vector.extract_strided_slice %343 {offsets = [8, 0], sizes = [8, 8], strides = [1, 1]} : vector<32x8xf32> to vector<8x8xf32>
    %352 = vector.extract_strided_slice %313 {offsets = [0, 8], sizes = [8, 8], strides = [1, 1]} : vector<8x32xf32> to vector<8x8xf32>
    %cst_103 = arith.constant dense<0.000000e+00> : vector<8x8xf32>
    %353 = tpu.matmul %351, %352, %cst_103 {dimension_numbers = #tpu.dot_dimension_numbers<[1], [0], [0], [1], [0, 0, 1, 1], [], []>} : vector<8x8xf32>, vector<8x8xf32>, vector<8x8xf32> -> vector<8x8xf32>
    %354 = vector.extract_strided_slice %309 {offsets = [8, 0], sizes = [8, 32], strides = [1, 1]} : vector<32x32xf32> to vector<8x32xf32>
    %cst_104 = arith.constant dense<0.000000e+00> : vector<8x32xf32>
    %355 = tpu.matmul %353, %354, %cst_104 {dimension_numbers = #tpu.dot_dimension_numbers<[1], [0], [0], [1], [0, 0, 1, 1], [], []>} : vector<8x8xf32>, vector<8x32xf32>, vector<8x32xf32> -> vector<8x32xf32>
    %356 = arith.addf %350, %355 : vector<8x32xf32>
    %357 = vector.extract_strided_slice %343 {offsets = [16, 0], sizes = [8, 8], strides = [1, 1]} : vector<32x8xf32> to vector<8x8xf32>
    %358 = vector.extract_strided_slice %313 {offsets = [0, 16], sizes = [8, 8], strides = [1, 1]} : vector<8x32xf32> to vector<8x8xf32>
    %cst_105 = arith.constant dense<0.000000e+00> : vector<8x8xf32>
    %359 = tpu.matmul %357, %358, %cst_105 {dimension_numbers = #tpu.dot_dimension_numbers<[1], [0], [0], [1], [0, 0, 1, 1], [], []>} : vector<8x8xf32>, vector<8x8xf32>, vector<8x8xf32> -> vector<8x8xf32>
    %360 = vector.extract_strided_slice %309 {offsets = [16, 0], sizes = [8, 32], strides = [1, 1]} : vector<32x32xf32> to vector<8x32xf32>
    %cst_106 = arith.constant dense<0.000000e+00> : vector<8x32xf32>
    %361 = tpu.matmul %359, %360, %cst_106 {dimension_numbers = #tpu.dot_dimension_numbers<[1], [0], [0], [1], [0, 0, 1, 1], [], []>} : vector<8x8xf32>, vector<8x32xf32>, vector<8x32xf32> -> vector<8x32xf32>
    %362 = arith.addf %356, %361 : vector<8x32xf32>
    %363 = vector.extract_strided_slice %343 {offsets = [24, 0], sizes = [8, 8], strides = [1, 1]} : vector<32x8xf32> to vector<8x8xf32>
    %364 = vector.extract_strided_slice %313 {offsets = [0, 24], sizes = [8, 8], strides = [1, 1]} : vector<8x32xf32> to vector<8x8xf32>
    %cst_107 = arith.constant dense<0.000000e+00> : vector<8x8xf32>
    %365 = tpu.matmul %363, %364, %cst_107 {dimension_numbers = #tpu.dot_dimension_numbers<[1], [0], [0], [1], [0, 0, 1, 1], [], []>} : vector<8x8xf32>, vector<8x8xf32>, vector<8x8xf32> -> vector<8x8xf32>
    %366 = vector.extract_strided_slice %309 {offsets = [24, 0], sizes = [8, 32], strides = [1, 1]} : vector<32x32xf32> to vector<8x32xf32>
    %cst_108 = arith.constant dense<0.000000e+00> : vector<8x32xf32>
    %367 = tpu.matmul %365, %366, %cst_108 {dimension_numbers = #tpu.dot_dimension_numbers<[1], [0], [0], [1], [0, 0, 1, 1], [], []>} : vector<8x8xf32>, vector<8x32xf32>, vector<8x32xf32> -> vector<8x32xf32>
    %368 = arith.addf %362, %367 : vector<8x32xf32>
    %369 = vector.extract_strided_slice %301 {offsets = [8, 0], sizes = [8, 32], strides = [1, 1]} : vector<32x32xf32> to vector<8x32xf32>
    %370 = vector.extract_strided_slice %307 {offsets = [8, 0], sizes = [8, 32], strides = [1, 1]} : vector<32x32xf32> to vector<8x32xf32>
    %371 = vector.extract_strided_slice %308 {offsets = [8, 0], sizes = [8, 32], strides = [1, 1]} : vector<32x32xf32> to vector<8x32xf32>
    %372 = tpu.transpose %370, [1, 0] : vector<8x32xf32> -> vector<32x8xf32>
    %373 = vector.extract_strided_slice %5 {offsets = [1, 0, 0], sizes = [1, 8, 8], strides = [1, 1, 1]} : vector<4x8x8xf32> to vector<1x8x8xf32>
    %374 = vector.shape_cast %373 : vector<1x8x8xf32> to vector<8x8xf32>
    %375 = vector.extract_strided_slice %369 {offsets = [0, 0], sizes = [8, 8], strides = [1, 1]} : vector<8x32xf32> to vector<8x8xf32>
    %376 = vector.extract_strided_slice %372 {offsets = [0, 0], sizes = [8, 8], strides = [1, 1]} : vector<32x8xf32> to vector<8x8xf32>
    %cst_109 = arith.constant dense<0.000000e+00> : vector<8x8xf32>
    %377 = tpu.matmul %375, %376, %cst_109 {dimension_numbers = #tpu.dot_dimension_numbers<[1], [0], [0], [1], [0, 0, 1, 1], [], []>} : vector<8x8xf32>, vector<8x8xf32>, vector<8x8xf32> -> vector<8x8xf32>
    %378 = arith.addf %377, %374 : vector<8x8xf32>
    %379 = vector.extract_strided_slice %369 {offsets = [0, 8], sizes = [8, 8], strides = [1, 1]} : vector<8x32xf32> to vector<8x8xf32>
    %380 = vector.extract_strided_slice %372 {offsets = [8, 0], sizes = [8, 8], strides = [1, 1]} : vector<32x8xf32> to vector<8x8xf32>
    %cst_110 = arith.constant dense<0.000000e+00> : vector<8x8xf32>
    %381 = tpu.matmul %379, %380, %cst_110 {dimension_numbers = #tpu.dot_dimension_numbers<[1], [0], [0], [1], [0, 0, 1, 1], [], []>} : vector<8x8xf32>, vector<8x8xf32>, vector<8x8xf32> -> vector<8x8xf32>
    %382 = arith.addf %381, %374 : vector<8x8xf32>
    %383 = vector.extract_strided_slice %369 {offsets = [0, 16], sizes = [8, 8], strides = [1, 1]} : vector<8x32xf32> to vector<8x8xf32>
    %384 = vector.extract_strided_slice %372 {offsets = [16, 0], sizes = [8, 8], strides = [1, 1]} : vector<32x8xf32> to vector<8x8xf32>
    %cst_111 = arith.constant dense<0.000000e+00> : vector<8x8xf32>
    %385 = tpu.matmul %383, %384, %cst_111 {dimension_numbers = #tpu.dot_dimension_numbers<[1], [0], [0], [1], [0, 0, 1, 1], [], []>} : vector<8x8xf32>, vector<8x8xf32>, vector<8x8xf32> -> vector<8x8xf32>
    %386 = arith.addf %385, %374 : vector<8x8xf32>
    %387 = vector.extract_strided_slice %369 {offsets = [0, 24], sizes = [8, 8], strides = [1, 1]} : vector<8x32xf32> to vector<8x8xf32>
    %388 = vector.extract_strided_slice %372 {offsets = [24, 0], sizes = [8, 8], strides = [1, 1]} : vector<32x8xf32> to vector<8x8xf32>
    %cst_112 = arith.constant dense<0.000000e+00> : vector<8x8xf32>
    %389 = tpu.matmul %387, %388, %cst_112 {dimension_numbers = #tpu.dot_dimension_numbers<[1], [0], [0], [1], [0, 0, 1, 1], [], []>} : vector<8x8xf32>, vector<8x8xf32>, vector<8x8xf32> -> vector<8x8xf32>
    %390 = arith.addf %389, %374 : vector<8x8xf32>
    %391 = tpu.concatenate %378, %382, %386, %390 in 0 : vector<8x8xf32>, vector<8x8xf32>, vector<8x8xf32>, vector<8x8xf32> -> vector<32x8xf32>
    %cst_113 = arith.constant dense<0xFF800000> : vector<32xf32>
    %392 = vector.multi_reduction <maximumf>, %391, %cst_113 [1] : vector<32x8xf32> to vector<32xf32>
    %393 = vector.shape_cast %392 : vector<32xf32> to vector<32x1xf32>
    %394 = vector.broadcast %393 : vector<32x1xf32> to vector<32x8xf32>
    %395 = arith.subf %391, %394 : vector<32x8xf32>
    %396 = math.exp %395 : vector<32x8xf32>
    %cst_114 = arith.constant dense<0.000000e+00> : vector<32xf32>
    %397 = vector.multi_reduction <add>, %396, %cst_114 [1] : vector<32x8xf32> to vector<32xf32>
    %398 = vector.shape_cast %397 : vector<32xf32> to vector<32x1xf32>
    %399 = tpu.reciprocal %398 {approx = true} : vector<32x1xf32> -> vector<32x1xf32>
    %400 = vector.broadcast %399 : vector<32x1xf32> to vector<32x8xf32>
    %401 = arith.mulf %396, %400 : vector<32x8xf32>
    %402 = vector.extract_strided_slice %401 {offsets = [0, 0], sizes = [8, 8], strides = [1, 1]} : vector<32x8xf32> to vector<8x8xf32>
    %403 = vector.extract_strided_slice %371 {offsets = [0, 0], sizes = [8, 8], strides = [1, 1]} : vector<8x32xf32> to vector<8x8xf32>
    %cst_115 = arith.constant dense<0.000000e+00> : vector<8x8xf32>
    %404 = tpu.matmul %402, %403, %cst_115 {dimension_numbers = #tpu.dot_dimension_numbers<[1], [0], [0], [1], [0, 0, 1, 1], [], []>} : vector<8x8xf32>, vector<8x8xf32>, vector<8x8xf32> -> vector<8x8xf32>
    %405 = vector.extract_strided_slice %309 {offsets = [0, 0], sizes = [8, 32], strides = [1, 1]} : vector<32x32xf32> to vector<8x32xf32>
    %cst_116 = arith.constant dense<0.000000e+00> : vector<8x32xf32>
    %406 = tpu.matmul %404, %405, %cst_116 {dimension_numbers = #tpu.dot_dimension_numbers<[1], [0], [0], [1], [0, 0, 1, 1], [], []>} : vector<8x8xf32>, vector<8x32xf32>, vector<8x32xf32> -> vector<8x32xf32>
    %407 = vector.broadcast %310 : vector<1x32xf32> to vector<8x32xf32>
    %408 = arith.addf %407, %406 : vector<8x32xf32>
    %409 = vector.extract_strided_slice %401 {offsets = [8, 0], sizes = [8, 8], strides = [1, 1]} : vector<32x8xf32> to vector<8x8xf32>
    %410 = vector.extract_strided_slice %371 {offsets = [0, 8], sizes = [8, 8], strides = [1, 1]} : vector<8x32xf32> to vector<8x8xf32>
    %cst_117 = arith.constant dense<0.000000e+00> : vector<8x8xf32>
    %411 = tpu.matmul %409, %410, %cst_117 {dimension_numbers = #tpu.dot_dimension_numbers<[1], [0], [0], [1], [0, 0, 1, 1], [], []>} : vector<8x8xf32>, vector<8x8xf32>, vector<8x8xf32> -> vector<8x8xf32>
    %412 = vector.extract_strided_slice %309 {offsets = [8, 0], sizes = [8, 32], strides = [1, 1]} : vector<32x32xf32> to vector<8x32xf32>
    %cst_118 = arith.constant dense<0.000000e+00> : vector<8x32xf32>
    %413 = tpu.matmul %411, %412, %cst_118 {dimension_numbers = #tpu.dot_dimension_numbers<[1], [0], [0], [1], [0, 0, 1, 1], [], []>} : vector<8x8xf32>, vector<8x32xf32>, vector<8x32xf32> -> vector<8x32xf32>
    %414 = arith.addf %408, %413 : vector<8x32xf32>
    %415 = vector.extract_strided_slice %401 {offsets = [16, 0], sizes = [8, 8], strides = [1, 1]} : vector<32x8xf32> to vector<8x8xf32>
    %416 = vector.extract_strided_slice %371 {offsets = [0, 16], sizes = [8, 8], strides = [1, 1]} : vector<8x32xf32> to vector<8x8xf32>
    %cst_119 = arith.constant dense<0.000000e+00> : vector<8x8xf32>
    %417 = tpu.matmul %415, %416, %cst_119 {dimension_numbers = #tpu.dot_dimension_numbers<[1], [0], [0], [1], [0, 0, 1, 1], [], []>} : vector<8x8xf32>, vector<8x8xf32>, vector<8x8xf32> -> vector<8x8xf32>
    %418 = vector.extract_strided_slice %309 {offsets = [16, 0], sizes = [8, 32], strides = [1, 1]} : vector<32x32xf32> to vector<8x32xf32>
    %cst_120 = arith.constant dense<0.000000e+00> : vector<8x32xf32>
    %419 = tpu.matmul %417, %418, %cst_120 {dimension_numbers = #tpu.dot_dimension_numbers<[1], [0], [0], [1], [0, 0, 1, 1], [], []>} : vector<8x8xf32>, vector<8x32xf32>, vector<8x32xf32> -> vector<8x32xf32>
    %420 = arith.addf %414, %419 : vector<8x32xf32>
    %421 = vector.extract_strided_slice %401 {offsets = [24, 0], sizes = [8, 8], strides = [1, 1]} : vector<32x8xf32> to vector<8x8xf32>
    %422 = vector.extract_strided_slice %371 {offsets = [0, 24], sizes = [8, 8], strides = [1, 1]} : vector<8x32xf32> to vector<8x8xf32>
    %cst_121 = arith.constant dense<0.000000e+00> : vector<8x8xf32>
    %423 = tpu.matmul %421, %422, %cst_121 {dimension_numbers = #tpu.dot_dimension_numbers<[1], [0], [0], [1], [0, 0, 1, 1], [], []>} : vector<8x8xf32>, vector<8x8xf32>, vector<8x8xf32> -> vector<8x8xf32>
    %424 = vector.extract_strided_slice %309 {offsets = [24, 0], sizes = [8, 32], strides = [1, 1]} : vector<32x32xf32> to vector<8x32xf32>
    %cst_122 = arith.constant dense<0.000000e+00> : vector<8x32xf32>
    %425 = tpu.matmul %423, %424, %cst_122 {dimension_numbers = #tpu.dot_dimension_numbers<[1], [0], [0], [1], [0, 0, 1, 1], [], []>} : vector<8x8xf32>, vector<8x32xf32>, vector<8x32xf32> -> vector<8x32xf32>
    %426 = arith.addf %420, %425 : vector<8x32xf32>
    %427 = vector.extract_strided_slice %301 {offsets = [16, 0], sizes = [8, 32], strides = [1, 1]} : vector<32x32xf32> to vector<8x32xf32>
    %428 = vector.extract_strided_slice %307 {offsets = [16, 0], sizes = [8, 32], strides = [1, 1]} : vector<32x32xf32> to vector<8x32xf32>
    %429 = vector.extract_strided_slice %308 {offsets = [16, 0], sizes = [8, 32], strides = [1, 1]} : vector<32x32xf32> to vector<8x32xf32>
    %430 = tpu.transpose %428, [1, 0] : vector<8x32xf32> -> vector<32x8xf32>
    %431 = vector.extract_strided_slice %5 {offsets = [2, 0, 0], sizes = [1, 8, 8], strides = [1, 1, 1]} : vector<4x8x8xf32> to vector<1x8x8xf32>
    %432 = vector.shape_cast %431 : vector<1x8x8xf32> to vector<8x8xf32>
    %433 = vector.extract_strided_slice %427 {offsets = [0, 0], sizes = [8, 8], strides = [1, 1]} : vector<8x32xf32> to vector<8x8xf32>
    %434 = vector.extract_strided_slice %430 {offsets = [0, 0], sizes = [8, 8], strides = [1, 1]} : vector<32x8xf32> to vector<8x8xf32>
    %cst_123 = arith.constant dense<0.000000e+00> : vector<8x8xf32>
    %435 = tpu.matmul %433, %434, %cst_123 {dimension_numbers = #tpu.dot_dimension_numbers<[1], [0], [0], [1], [0, 0, 1, 1], [], []>} : vector<8x8xf32>, vector<8x8xf32>, vector<8x8xf32> -> vector<8x8xf32>
    %436 = arith.addf %435, %432 : vector<8x8xf32>
    %437 = vector.extract_strided_slice %427 {offsets = [0, 8], sizes = [8, 8], strides = [1, 1]} : vector<8x32xf32> to vector<8x8xf32>
    %438 = vector.extract_strided_slice %430 {offsets = [8, 0], sizes = [8, 8], strides = [1, 1]} : vector<32x8xf32> to vector<8x8xf32>
    %cst_124 = arith.constant dense<0.000000e+00> : vector<8x8xf32>
    %439 = tpu.matmul %437, %438, %cst_124 {dimension_numbers = #tpu.dot_dimension_numbers<[1], [0], [0], [1], [0, 0, 1, 1], [], []>} : vector<8x8xf32>, vector<8x8xf32>, vector<8x8xf32> -> vector<8x8xf32>
    %440 = arith.addf %439, %432 : vector<8x8xf32>
    %441 = vector.extract_strided_slice %427 {offsets = [0, 16], sizes = [8, 8], strides = [1, 1]} : vector<8x32xf32> to vector<8x8xf32>
    %442 = vector.extract_strided_slice %430 {offsets = [16, 0], sizes = [8, 8], strides = [1, 1]} : vector<32x8xf32> to vector<8x8xf32>
    %cst_125 = arith.constant dense<0.000000e+00> : vector<8x8xf32>
    %443 = tpu.matmul %441, %442, %cst_125 {dimension_numbers = #tpu.dot_dimension_numbers<[1], [0], [0], [1], [0, 0, 1, 1], [], []>} : vector<8x8xf32>, vector<8x8xf32>, vector<8x8xf32> -> vector<8x8xf32>
    %444 = arith.addf %443, %432 : vector<8x8xf32>
    %445 = vector.extract_strided_slice %427 {offsets = [0, 24], sizes = [8, 8], strides = [1, 1]} : vector<8x32xf32> to vector<8x8xf32>
    %446 = vector.extract_strided_slice %430 {offsets = [24, 0], sizes = [8, 8], strides = [1, 1]} : vector<32x8xf32> to vector<8x8xf32>
    %cst_126 = arith.constant dense<0.000000e+00> : vector<8x8xf32>
    %447 = tpu.matmul %445, %446, %cst_126 {dimension_numbers = #tpu.dot_dimension_numbers<[1], [0], [0], [1], [0, 0, 1, 1], [], []>} : vector<8x8xf32>, vector<8x8xf32>, vector<8x8xf32> -> vector<8x8xf32>
    %448 = arith.addf %447, %432 : vector<8x8xf32>
    %449 = tpu.concatenate %436, %440, %444, %448 in 0 : vector<8x8xf32>, vector<8x8xf32>, vector<8x8xf32>, vector<8x8xf32> -> vector<32x8xf32>
    %cst_127 = arith.constant dense<0xFF800000> : vector<32xf32>
    %450 = vector.multi_reduction <maximumf>, %449, %cst_127 [1] : vector<32x8xf32> to vector<32xf32>
    %451 = vector.shape_cast %450 : vector<32xf32> to vector<32x1xf32>
    %452 = vector.broadcast %451 : vector<32x1xf32> to vector<32x8xf32>
    %453 = arith.subf %449, %452 : vector<32x8xf32>
    %454 = math.exp %453 : vector<32x8xf32>
    %cst_128 = arith.constant dense<0.000000e+00> : vector<32xf32>
    %455 = vector.multi_reduction <add>, %454, %cst_128 [1] : vector<32x8xf32> to vector<32xf32>
    %456 = vector.shape_cast %455 : vector<32xf32> to vector<32x1xf32>
    %457 = tpu.reciprocal %456 {approx = true} : vector<32x1xf32> -> vector<32x1xf32>
    %458 = vector.broadcast %457 : vector<32x1xf32> to vector<32x8xf32>
    %459 = arith.mulf %454, %458 : vector<32x8xf32>
    %460 = vector.extract_strided_slice %459 {offsets = [0, 0], sizes = [8, 8], strides = [1, 1]} : vector<32x8xf32> to vector<8x8xf32>
    %461 = vector.extract_strided_slice %429 {offsets = [0, 0], sizes = [8, 8], strides = [1, 1]} : vector<8x32xf32> to vector<8x8xf32>
    %cst_129 = arith.constant dense<0.000000e+00> : vector<8x8xf32>
    %462 = tpu.matmul %460, %461, %cst_129 {dimension_numbers = #tpu.dot_dimension_numbers<[1], [0], [0], [1], [0, 0, 1, 1], [], []>} : vector<8x8xf32>, vector<8x8xf32>, vector<8x8xf32> -> vector<8x8xf32>
    %463 = vector.extract_strided_slice %309 {offsets = [0, 0], sizes = [8, 32], strides = [1, 1]} : vector<32x32xf32> to vector<8x32xf32>
    %cst_130 = arith.constant dense<0.000000e+00> : vector<8x32xf32>
    %464 = tpu.matmul %462, %463, %cst_130 {dimension_numbers = #tpu.dot_dimension_numbers<[1], [0], [0], [1], [0, 0, 1, 1], [], []>} : vector<8x8xf32>, vector<8x32xf32>, vector<8x32xf32> -> vector<8x32xf32>
    %465 = vector.broadcast %310 : vector<1x32xf32> to vector<8x32xf32>
    %466 = arith.addf %465, %464 : vector<8x32xf32>
    %467 = vector.extract_strided_slice %459 {offsets = [8, 0], sizes = [8, 8], strides = [1, 1]} : vector<32x8xf32> to vector<8x8xf32>
    %468 = vector.extract_strided_slice %429 {offsets = [0, 8], sizes = [8, 8], strides = [1, 1]} : vector<8x32xf32> to vector<8x8xf32>
    %cst_131 = arith.constant dense<0.000000e+00> : vector<8x8xf32>
    %469 = tpu.matmul %467, %468, %cst_131 {dimension_numbers = #tpu.dot_dimension_numbers<[1], [0], [0], [1], [0, 0, 1, 1], [], []>} : vector<8x8xf32>, vector<8x8xf32>, vector<8x8xf32> -> vector<8x8xf32>
    %470 = vector.extract_strided_slice %309 {offsets = [8, 0], sizes = [8, 32], strides = [1, 1]} : vector<32x32xf32> to vector<8x32xf32>
    %cst_132 = arith.constant dense<0.000000e+00> : vector<8x32xf32>
    %471 = tpu.matmul %469, %470, %cst_132 {dimension_numbers = #tpu.dot_dimension_numbers<[1], [0], [0], [1], [0, 0, 1, 1], [], []>} : vector<8x8xf32>, vector<8x32xf32>, vector<8x32xf32> -> vector<8x32xf32>
    %472 = arith.addf %466, %471 : vector<8x32xf32>
    %473 = vector.extract_strided_slice %459 {offsets = [16, 0], sizes = [8, 8], strides = [1, 1]} : vector<32x8xf32> to vector<8x8xf32>
    %474 = vector.extract_strided_slice %429 {offsets = [0, 16], sizes = [8, 8], strides = [1, 1]} : vector<8x32xf32> to vector<8x8xf32>
    %cst_133 = arith.constant dense<0.000000e+00> : vector<8x8xf32>
    %475 = tpu.matmul %473, %474, %cst_133 {dimension_numbers = #tpu.dot_dimension_numbers<[1], [0], [0], [1], [0, 0, 1, 1], [], []>} : vector<8x8xf32>, vector<8x8xf32>, vector<8x8xf32> -> vector<8x8xf32>
    %476 = vector.extract_strided_slice %309 {offsets = [16, 0], sizes = [8, 32], strides = [1, 1]} : vector<32x32xf32> to vector<8x32xf32>
    %cst_134 = arith.constant dense<0.000000e+00> : vector<8x32xf32>
    %477 = tpu.matmul %475, %476, %cst_134 {dimension_numbers = #tpu.dot_dimension_numbers<[1], [0], [0], [1], [0, 0, 1, 1], [], []>} : vector<8x8xf32>, vector<8x32xf32>, vector<8x32xf32> -> vector<8x32xf32>
    %478 = arith.addf %472, %477 : vector<8x32xf32>
    %479 = vector.extract_strided_slice %459 {offsets = [24, 0], sizes = [8, 8], strides = [1, 1]} : vector<32x8xf32> to vector<8x8xf32>
    %480 = vector.extract_strided_slice %429 {offsets = [0, 24], sizes = [8, 8], strides = [1, 1]} : vector<8x32xf32> to vector<8x8xf32>
    %cst_135 = arith.constant dense<0.000000e+00> : vector<8x8xf32>
    %481 = tpu.matmul %479, %480, %cst_135 {dimension_numbers = #tpu.dot_dimension_numbers<[1], [0], [0], [1], [0, 0, 1, 1], [], []>} : vector<8x8xf32>, vector<8x8xf32>, vector<8x8xf32> -> vector<8x8xf32>
    %482 = vector.extract_strided_slice %309 {offsets = [24, 0], sizes = [8, 32], strides = [1, 1]} : vector<32x32xf32> to vector<8x32xf32>
    %cst_136 = arith.constant dense<0.000000e+00> : vector<8x32xf32>
    %483 = tpu.matmul %481, %482, %cst_136 {dimension_numbers = #tpu.dot_dimension_numbers<[1], [0], [0], [1], [0, 0, 1, 1], [], []>} : vector<8x8xf32>, vector<8x32xf32>, vector<8x32xf32> -> vector<8x32xf32>
    %484 = arith.addf %478, %483 : vector<8x32xf32>
    %485 = vector.extract_strided_slice %301 {offsets = [24, 0], sizes = [8, 32], strides = [1, 1]} : vector<32x32xf32> to vector<8x32xf32>
    %486 = vector.extract_strided_slice %307 {offsets = [24, 0], sizes = [8, 32], strides = [1, 1]} : vector<32x32xf32> to vector<8x32xf32>
    %487 = vector.extract_strided_slice %308 {offsets = [24, 0], sizes = [8, 32], strides = [1, 1]} : vector<32x32xf32> to vector<8x32xf32>
    %488 = tpu.transpose %486, [1, 0] : vector<8x32xf32> -> vector<32x8xf32>
    %489 = vector.extract_strided_slice %5 {offsets = [3, 0, 0], sizes = [1, 8, 8], strides = [1, 1, 1]} : vector<4x8x8xf32> to vector<1x8x8xf32>
    %490 = vector.shape_cast %489 : vector<1x8x8xf32> to vector<8x8xf32>
    %491 = vector.extract_strided_slice %485 {offsets = [0, 0], sizes = [8, 8], strides = [1, 1]} : vector<8x32xf32> to vector<8x8xf32>
    %492 = vector.extract_strided_slice %488 {offsets = [0, 0], sizes = [8, 8], strides = [1, 1]} : vector<32x8xf32> to vector<8x8xf32>
    %cst_137 = arith.constant dense<0.000000e+00> : vector<8x8xf32>
    %493 = tpu.matmul %491, %492, %cst_137 {dimension_numbers = #tpu.dot_dimension_numbers<[1], [0], [0], [1], [0, 0, 1, 1], [], []>} : vector<8x8xf32>, vector<8x8xf32>, vector<8x8xf32> -> vector<8x8xf32>
    %494 = arith.addf %493, %490 : vector<8x8xf32>
    %495 = vector.extract_strided_slice %485 {offsets = [0, 8], sizes = [8, 8], strides = [1, 1]} : vector<8x32xf32> to vector<8x8xf32>
    %496 = vector.extract_strided_slice %488 {offsets = [8, 0], sizes = [8, 8], strides = [1, 1]} : vector<32x8xf32> to vector<8x8xf32>
    %cst_138 = arith.constant dense<0.000000e+00> : vector<8x8xf32>
    %497 = tpu.matmul %495, %496, %cst_138 {dimension_numbers = #tpu.dot_dimension_numbers<[1], [0], [0], [1], [0, 0, 1, 1], [], []>} : vector<8x8xf32>, vector<8x8xf32>, vector<8x8xf32> -> vector<8x8xf32>
    %498 = arith.addf %497, %490 : vector<8x8xf32>
    %499 = vector.extract_strided_slice %485 {offsets = [0, 16], sizes = [8, 8], strides = [1, 1]} : vector<8x32xf32> to vector<8x8xf32>
    %500 = vector.extract_strided_slice %488 {offsets = [16, 0], sizes = [8, 8], strides = [1, 1]} : vector<32x8xf32> to vector<8x8xf32>
    %cst_139 = arith.constant dense<0.000000e+00> : vector<8x8xf32>
    %501 = tpu.matmul %499, %500, %cst_139 {dimension_numbers = #tpu.dot_dimension_numbers<[1], [0], [0], [1], [0, 0, 1, 1], [], []>} : vector<8x8xf32>, vector<8x8xf32>, vector<8x8xf32> -> vector<8x8xf32>
    %502 = arith.addf %501, %490 : vector<8x8xf32>
    %503 = vector.extract_strided_slice %485 {offsets = [0, 24], sizes = [8, 8], strides = [1, 1]} : vector<8x32xf32> to vector<8x8xf32>
    %504 = vector.extract_strided_slice %488 {offsets = [24, 0], sizes = [8, 8], strides = [1, 1]} : vector<32x8xf32> to vector<8x8xf32>
    %cst_140 = arith.constant dense<0.000000e+00> : vector<8x8xf32>
    %505 = tpu.matmul %503, %504, %cst_140 {dimension_numbers = #tpu.dot_dimension_numbers<[1], [0], [0], [1], [0, 0, 1, 1], [], []>} : vector<8x8xf32>, vector<8x8xf32>, vector<8x8xf32> -> vector<8x8xf32>
    %506 = arith.addf %505, %490 : vector<8x8xf32>
    %507 = tpu.concatenate %494, %498, %502, %506 in 0 : vector<8x8xf32>, vector<8x8xf32>, vector<8x8xf32>, vector<8x8xf32> -> vector<32x8xf32>
    %cst_141 = arith.constant dense<0xFF800000> : vector<32xf32>
    %508 = vector.multi_reduction <maximumf>, %507, %cst_141 [1] : vector<32x8xf32> to vector<32xf32>
    %509 = vector.shape_cast %508 : vector<32xf32> to vector<32x1xf32>
    %510 = vector.broadcast %509 : vector<32x1xf32> to vector<32x8xf32>
    %511 = arith.subf %507, %510 : vector<32x8xf32>
    %512 = math.exp %511 : vector<32x8xf32>
    %cst_142 = arith.constant dense<0.000000e+00> : vector<32xf32>
    %513 = vector.multi_reduction <add>, %512, %cst_142 [1] : vector<32x8xf32> to vector<32xf32>
    %514 = vector.shape_cast %513 : vector<32xf32> to vector<32x1xf32>
    %515 = tpu.reciprocal %514 {approx = true} : vector<32x1xf32> -> vector<32x1xf32>
    %516 = vector.broadcast %515 : vector<32x1xf32> to vector<32x8xf32>
    %517 = arith.mulf %512, %516 : vector<32x8xf32>
    %518 = vector.extract_strided_slice %517 {offsets = [0, 0], sizes = [8, 8], strides = [1, 1]} : vector<32x8xf32> to vector<8x8xf32>
    %519 = vector.extract_strided_slice %487 {offsets = [0, 0], sizes = [8, 8], strides = [1, 1]} : vector<8x32xf32> to vector<8x8xf32>
    %cst_143 = arith.constant dense<0.000000e+00> : vector<8x8xf32>
    %520 = tpu.matmul %518, %519, %cst_143 {dimension_numbers = #tpu.dot_dimension_numbers<[1], [0], [0], [1], [0, 0, 1, 1], [], []>} : vector<8x8xf32>, vector<8x8xf32>, vector<8x8xf32> -> vector<8x8xf32>
    %521 = vector.extract_strided_slice %309 {offsets = [0, 0], sizes = [8, 32], strides = [1, 1]} : vector<32x32xf32> to vector<8x32xf32>
    %cst_144 = arith.constant dense<0.000000e+00> : vector<8x32xf32>
    %522 = tpu.matmul %520, %521, %cst_144 {dimension_numbers = #tpu.dot_dimension_numbers<[1], [0], [0], [1], [0, 0, 1, 1], [], []>} : vector<8x8xf32>, vector<8x32xf32>, vector<8x32xf32> -> vector<8x32xf32>
    %523 = vector.broadcast %310 : vector<1x32xf32> to vector<8x32xf32>
    %524 = arith.addf %523, %522 : vector<8x32xf32>
    %525 = vector.extract_strided_slice %517 {offsets = [8, 0], sizes = [8, 8], strides = [1, 1]} : vector<32x8xf32> to vector<8x8xf32>
    %526 = vector.extract_strided_slice %487 {offsets = [0, 8], sizes = [8, 8], strides = [1, 1]} : vector<8x32xf32> to vector<8x8xf32>
    %cst_145 = arith.constant dense<0.000000e+00> : vector<8x8xf32>
    %527 = tpu.matmul %525, %526, %cst_145 {dimension_numbers = #tpu.dot_dimension_numbers<[1], [0], [0], [1], [0, 0, 1, 1], [], []>} : vector<8x8xf32>, vector<8x8xf32>, vector<8x8xf32> -> vector<8x8xf32>
    %528 = vector.extract_strided_slice %309 {offsets = [8, 0], sizes = [8, 32], strides = [1, 1]} : vector<32x32xf32> to vector<8x32xf32>
    %cst_146 = arith.constant dense<0.000000e+00> : vector<8x32xf32>
    %529 = tpu.matmul %527, %528, %cst_146 {dimension_numbers = #tpu.dot_dimension_numbers<[1], [0], [0], [1], [0, 0, 1, 1], [], []>} : vector<8x8xf32>, vector<8x32xf32>, vector<8x32xf32> -> vector<8x32xf32>
    %530 = arith.addf %524, %529 : vector<8x32xf32>
    %531 = vector.extract_strided_slice %517 {offsets = [16, 0], sizes = [8, 8], strides = [1, 1]} : vector<32x8xf32> to vector<8x8xf32>
    %532 = vector.extract_strided_slice %487 {offsets = [0, 16], sizes = [8, 8], strides = [1, 1]} : vector<8x32xf32> to vector<8x8xf32>
    %cst_147 = arith.constant dense<0.000000e+00> : vector<8x8xf32>
    %533 = tpu.matmul %531, %532, %cst_147 {dimension_numbers = #tpu.dot_dimension_numbers<[1], [0], [0], [1], [0, 0, 1, 1], [], []>} : vector<8x8xf32>, vector<8x8xf32>, vector<8x8xf32> -> vector<8x8xf32>
    %534 = vector.extract_strided_slice %309 {offsets = [16, 0], sizes = [8, 32], strides = [1, 1]} : vector<32x32xf32> to vector<8x32xf32>
    %cst_148 = arith.constant dense<0.000000e+00> : vector<8x32xf32>
    %535 = tpu.matmul %533, %534, %cst_148 {dimension_numbers = #tpu.dot_dimension_numbers<[1], [0], [0], [1], [0, 0, 1, 1], [], []>} : vector<8x8xf32>, vector<8x32xf32>, vector<8x32xf32> -> vector<8x32xf32>
    %536 = arith.addf %530, %535 : vector<8x32xf32>
    %537 = vector.extract_strided_slice %517 {offsets = [24, 0], sizes = [8, 8], strides = [1, 1]} : vector<32x8xf32> to vector<8x8xf32>
    %538 = vector.extract_strided_slice %487 {offsets = [0, 24], sizes = [8, 8], strides = [1, 1]} : vector<8x32xf32> to vector<8x8xf32>
    %cst_149 = arith.constant dense<0.000000e+00> : vector<8x8xf32>
    %539 = tpu.matmul %537, %538, %cst_149 {dimension_numbers = #tpu.dot_dimension_numbers<[1], [0], [0], [1], [0, 0, 1, 1], [], []>} : vector<8x8xf32>, vector<8x8xf32>, vector<8x8xf32> -> vector<8x8xf32>
    %540 = vector.extract_strided_slice %309 {offsets = [24, 0], sizes = [8, 32], strides = [1, 1]} : vector<32x32xf32> to vector<8x32xf32>
    %cst_150 = arith.constant dense<0.000000e+00> : vector<8x32xf32>
    %541 = tpu.matmul %539, %540, %cst_150 {dimension_numbers = #tpu.dot_dimension_numbers<[1], [0], [0], [1], [0, 0, 1, 1], [], []>} : vector<8x8xf32>, vector<8x32xf32>, vector<8x32xf32> -> vector<8x32xf32>
    %542 = arith.addf %536, %541 : vector<8x32xf32>
    %543 = tpu.concatenate %368, %426, %484, %542 in 0 : vector<8x32xf32>, vector<8x32xf32>, vector<8x32xf32>, vector<8x32xf32> -> vector<32x32xf32>
    %544 = arith.addf %273, %543 : vector<32x32xf32>
    %545 = vector.extract_strided_slice %6 {offsets = [4, 0], sizes = [1, 32], strides = [1, 1]} : vector<10x32xf32> to vector<1x32xf32>
    %546 = vector.extract_strided_slice %6 {offsets = [5, 0], sizes = [1, 32], strides = [1, 1]} : vector<10x32xf32> to vector<1x32xf32>
    %cst_151 = arith.constant dense<0.000000e+00> : vector<32xf32>
    %547 = vector.multi_reduction <add>, %544, %cst_151 [1] : vector<32x32xf32> to vector<32xf32>
    %548 = vector.shape_cast %547 : vector<32xf32> to vector<32x1xf32>
    %cst_152 = arith.constant 3.200000e+01 : f32
    %549 = vector.broadcast %cst_152 : f32 to vector<32x1xf32>
    %550 = arith.divf %548, %549 : vector<32x1xf32>
    %551 = vector.broadcast %550 : vector<32x1xf32> to vector<32x32xf32>
    %552 = arith.subf %544, %551 : vector<32x32xf32>
    %553 = arith.mulf %552, %552 : vector<32x32xf32>
    %cst_153 = arith.constant dense<0.000000e+00> : vector<32xf32>
    %554 = vector.multi_reduction <add>, %553, %cst_153 [1] : vector<32x32xf32> to vector<32xf32>
    %555 = vector.shape_cast %554 : vector<32xf32> to vector<32x1xf32>
    %cst_154 = arith.constant 0.0322580636 : f32
    %556 = vector.broadcast %cst_154 : f32 to vector<32x1xf32>
    %557 = arith.mulf %555, %556 : vector<32x1xf32>
    %558 = math.sqrt %557 : vector<32x1xf32>
    %559 = vector.broadcast %545 : vector<1x32xf32> to vector<32x32xf32>
    %560 = arith.mulf %559, %552 : vector<32x32xf32>
    %cst_155 = arith.constant 9.99999997E-7 : f32
    %561 = vector.broadcast %cst_155 : f32 to vector<32x1xf32>
    %562 = arith.addf %558, %561 : vector<32x1xf32>
    %563 = tpu.reciprocal %562 {approx = true} : vector<32x1xf32> -> vector<32x1xf32>
    %564 = vector.broadcast %563 : vector<32x1xf32> to vector<32x32xf32>
    %565 = arith.mulf %560, %564 : vector<32x32xf32>
    %566 = vector.broadcast %546 : vector<1x32xf32> to vector<32x32xf32>
    %567 = arith.addf %565, %566 : vector<32x32xf32>
    %568 = arith.truncf %567 : vector<32x32xf32> to vector<32x32xbf16>
    %c0_156 = arith.constant 0 : index
    %c0_157 = arith.constant 0 : index
    %569 = vector.load %arg13[%c0_156, %c0_157] : memref<32x2048xbf16, #tpu.memory_space<vmem>>, vector<32x2048xbf16>
    %cst_158 = arith.constant dense<0.000000e+00> : vector<32x2048xf32>
    %570 = tpu.matmul %568, %569, %cst_158 {dimension_numbers = #tpu.dot_dimension_numbers<[1], [0], [0], [1], [0, 0, 1, 1], [], []>} : vector<32x32xbf16>, vector<32x2048xbf16>, vector<32x2048xf32> -> vector<32x2048xf32>
    %c0_159 = arith.constant 0 : index
    %c0_160 = arith.constant 0 : index
    %571 = vector.load %arg14[%c0_159, %c0_160] : memref<1x2048xf32, #tpu.memory_space<vmem>>, vector<1x2048xf32>
    %572 = vector.broadcast %571 : vector<1x2048xf32> to vector<32x2048xf32>
    %573 = arith.addf %570, %572 : vector<32x2048xf32>
    %cst_161 = arith.constant 0.000000e+00 : f32
    %574 = vector.broadcast %cst_161 : f32 to vector<32x2048xf32>
    %575 = arith.maximumf %573, %574 : vector<32x2048xf32>
    %576 = arith.truncf %575 : vector<32x2048xf32> to vector<32x2048xbf16>
    %c0_162 = arith.constant 0 : index
    %c0_163 = arith.constant 0 : index
    %577 = vector.load %arg15[%c0_162, %c0_163] : memref<2048x32xbf16, #tpu.memory_space<vmem>>, vector<2048x32xbf16>
    %cst_164 = arith.constant dense<0.000000e+00> : vector<32x32xf32>
    %578 = tpu.matmul %576, %577, %cst_164 {dimension_numbers = #tpu.dot_dimension_numbers<[1], [0], [0], [1], [0, 0, 1, 1], [], []>} : vector<32x2048xbf16>, vector<2048x32xbf16>, vector<32x32xf32> -> vector<32x32xf32>
    %579 = arith.addf %544, %578 : vector<32x32xf32>
    %580 = vector.extract_strided_slice %6 {offsets = [9, 0], sizes = [1, 32], strides = [1, 1]} : vector<10x32xf32> to vector<1x32xf32>
    %581 = vector.broadcast %580 : vector<1x32xf32> to vector<32x32xf32>
    %582 = arith.addf %579, %581 : vector<32x32xf32>
    %583 = vector.shape_cast %582 : vector<32x32xf32> to vector<4x8x32xf32>
    %c0_165 = arith.constant 0 : index
    %c0_166 = arith.constant 0 : index
    %c0_167 = arith.constant 0 : index
    %584 = vector.load %arg16[%c0_165, %c0_166, %c0_167] : memref<4x8x32xf32, #tpu.memory_space<vmem>>, vector<4x8x32xf32>
    tpu.vector_store %arg16[%c0_165, %c0_166, %c0_167], %583 {strides = array<i32>} : memref<4x8x32xf32, #tpu.memory_space<vmem>>, vector<4x8x32xf32>,
    return
  }
  func.func @transform_0(%arg0: i32) -> (i32, i32, i32) {
    %c0_i32 = arith.constant 0 : i32
    %c0_i32_0 = arith.constant 0 : i32
    %c0_i32_1 = arith.constant 0 : i32
    return %arg0, %c0_i32, %c0_i32_0 : i32, i32, i32
  }
  func.func @transform_1(%arg0: i32) -> (i32, i32, i32) {
    %c0_i32 = arith.constant 0 : i32
    %c0_i32_0 = arith.constant 0 : i32
    %c0_i32_1 = arith.constant 0 : i32
    return %arg0, %c0_i32, %c0_i32_0 : i32, i32, i32
  }
  func.func @transform_2(%arg0: i32) -> (i32, i32, i32) {
    %c0_i32 = arith.constant 0 : i32
    %c0_i32_0 = arith.constant 0 : i32
    %c0_i32_1 = arith.constant 0 : i32
    return %arg0, %c0_i32, %c0_i32_0 : i32, i32, i32
  }
  func.func @transform_3(%arg0: i32) -> (i32, i32, i32) {
    %c0_i32 = arith.constant 0 : i32
    %c0_i32_0 = arith.constant 0 : i32
    %c0_i32_1 = arith.constant 0 : i32
    return %arg0, %c0_i32, %c0_i32_0 : i32, i32, i32
  }
  func.func @transform_4(%arg0: i32) -> (i32, i32) {
    %c0_i32 = arith.constant 0 : i32
    %c0_i32_0 = arith.constant 0 : i32
    %c0_i32_1 = arith.constant 0 : i32
    return %c0_i32, %c0_i32_0 : i32, i32
  }
  func.func @transform_5(%arg0: i32) -> (i32, i32) {
    %c0_i32 = arith.constant 0 : i32
    %c0_i32_0 = arith.constant 0 : i32
    %c0_i32_1 = arith.constant 0 : i32
    return %c0_i32, %c0_i32_0 : i32, i32
  }
  func.func @transform_6(%arg0: i32) -> (i32, i32) {
    %c0_i32 = arith.constant 0 : i32
    %c0_i32_0 = arith.constant 0 : i32
    %c0_i32_1 = arith.constant 0 : i32
    return %c0_i32, %c0_i32_0 : i32, i32
  }
  func.func @transform_7(%arg0: i32) -> (i32, i32) {
    %c0_i32 = arith.constant 0 : i32
    %c0_i32_0 = arith.constant 0 : i32
    %c0_i32_1 = arith.constant 0 : i32
    return %c0_i32, %c0_i32_0 : i32, i32
  }
  func.func @transform_8(%arg0: i32) -> (i32, i32) {
    %c0_i32 = arith.constant 0 : i32
    %c0_i32_0 = arith.constant 0 : i32
    %c0_i32_1 = arith.constant 0 : i32
    return %c0_i32, %c0_i32_0 : i32, i32
  }
  func.func @transform_9(%arg0: i32) -> (i32, i32) {
    %c0_i32 = arith.constant 0 : i32
    %c0_i32_0 = arith.constant 0 : i32
    %c0_i32_1 = arith.constant 0 : i32
    return %c0_i32, %c0_i32_0 : i32, i32
  }
  func.func @transform_10(%arg0: i32) -> (i32, i32) {
    %c0_i32 = arith.constant 0 : i32
    %c0_i32_0 = arith.constant 0 : i32
    %c0_i32_1 = arith.constant 0 : i32
    return %c0_i32, %c0_i32_0 : i32, i32
  }
  func.func @transform_11(%arg0: i32) -> (i32, i32) {
    %c0_i32 = arith.constant 0 : i32
    %c0_i32_0 = arith.constant 0 : i32
    %c0_i32_1 = arith.constant 0 : i32
    return %c0_i32, %c0_i32_0 : i32, i32
  }
  func.func @transform_12(%arg0: i32) -> (i32, i32) {
    %c0_i32 = arith.constant 0 : i32
    %c0_i32_0 = arith.constant 0 : i32
    %c0_i32_1 = arith.constant 0 : i32
    return %c0_i32, %c0_i32_0 : i32, i32
  }
  func.func @transform_13(%arg0: i32) -> (i32, i32) {
    %c0_i32 = arith.constant 0 : i32
    %c0_i32_0 = arith.constant 0 : i32
    %c0_i32_1 = arith.constant 0 : i32
    return %c0_i32, %c0_i32_0 : i32, i32
  }
  func.func @transform_14(%arg0: i32) -> (i32, i32) {
    %c0_i32 = arith.constant 0 : i32
    %c0_i32_0 = arith.constant 0 : i32
    %c0_i32_1 = arith.constant 0 : i32
    return %c0_i32, %c0_i32_0 : i32, i32
  }
  func.func @transform_15(%arg0: i32) -> (i32, i32, i32) {
    %c0_i32 = arith.constant 0 : i32
    %c0_i32_0 = arith.constant 0 : i32
    %c0_i32_1 = arith.constant 0 : i32
    return %arg0, %c0_i32, %c0_i32_0 : i32, i32, i32
  }
}

</mosaic_0001>

<bundles_post_ra>
// kernel: tpu_custom_call.1
= control target key start
LH: loop header
LB: loop body
LE: loop exit
PB: predicated region body
PF: predicated region fallthrough
CT: control target
= control target key end

     0   :  { %s14977_s0 = inlined_call_operand.vmem [shape: f32[8,8,32], index: 0, kind: input, shape index: {}]   ;;  %s14978_s1 = inlined_call_operand.vmem [shape: f32[8,8,32], index: 1, kind: input, shape index: {}]   ;;  %s14979_s2 = inlined_call_operand.vmem [shape: f32[8,8,8], index: 2, kind: input, shape index: {}]   ;;  %s14980_s3 = inlined_call_operand.vmem [shape: f32[8,8,8], index: 3, kind: input, shape index: {}]   ;;  %s14981_s4 = inlined_call_operand.vmem [shape: f32[10,32], index: 4, kind: input, shape index: {}]   ;;  %s14982_s5 = inlined_call_operand.vmem [shape: f32[32,96], index: 5, kind: input, shape index: {}]   ;;  %s14983_s6 = inlined_call_operand.vmem [shape: f32[1,96], index: 6, kind: input, shape index: {}]   ;;  %s14984_s7 = inlined_call_operand.vmem [shape: f32[32,32], index: 7, kind: input, shape index: {}]   ;;  %s14985_s8 = inlined_call_operand.vmem [shape: f32[32,32], index: 8, kind: input, shape index: {}]   ;;  %s14986_s9 = inlined_call_operand.vmem [shape: f32[32,64], index: 9, kind: input, shape index: {}]   ;;  %s14987_s10 = inlined_call_operand.vmem [shape: f32[1,64], index: 10, kind: input, shape index: {}]   ;;  %s14988_s11 = inlined_call_operand.vmem [shape: f32[32,32], index: 11, kind: input, shape index: {}]   ;;  %s14989_s12 = inlined_call_operand.vmem [shape: bf16[32,2048], index: 12, kind: input, shape index: {}]   ;;  %s14990_s13 = inlined_call_operand.vmem [shape: f32[1,2048], index: 13, kind: input, shape index: {}]   ;;  %s14991_s14 = inlined_call_operand.vmem [shape: bf16[2048,32], index: 14, kind: input, shape index: {}]   ;;  %s14992_s15 = inlined_call_operand.hbm [shape: f32[8,8,32], index: 15, kind: output, shape index: {}]  }
   0x1   :  { %15024 = sst [smem:[#allocation12_spill]] %s14977_s0 }
   0x2   :  { %15025 = sst [smem:[#allocation13_spill]] %s14979_s2 }
   0x3   :  { %15026 = sst [smem:[#allocation14_spill]] %s14982_s5 }
   0x4   :  { %15027 = sst [smem:[#allocation15_spill]] %s14983_s6 }
   0x5   :  { %15028 = sst [smem:[#allocation16_spill]] %s14984_s7 }
   0x6   :  { %15029 = sst [smem:[#allocation17_spill]] %s14985_s8 }
   0x7   :  { %15030 = sst [smem:[#allocation18_spill]] %s14992_s15 }
   0x8   :  { %20 = vsyncpa [#allocation3], 0 }
   0x9   :  { %22 = vsyncpa [#allocation3 + $0x1], 0  ;;  %s13053_s18 = smov 0   ;;  %s13055_s19 = smov 0  }
   0xa   :  { %s13057_s20 = smov 0   ;;  %s13059_s21 = smov 0  }
   0xb LB: > { %15031 = sst [smem:[#allocation5_spill]] %s12942_s18  ;;  %s13074_s22 = sadd.s32 4294967295, %s12954_s21   ;;  %s12954_s21 = sphi %s13059_s21, %s15063_s21   ;;  %s12950_s20 = sphi %s13057_s20, %s15065_s20   ;;  %s12946_s19 = sphi %s13055_s19, %s15067_s19   ;;  %s12942_s18 = sphi %s13053_s18, %s15066_s18  }
   0xc   : > { %15032 = sst [smem:[#allocation6_spill]] %s12950_s20  ;;  %s11201_s23 = sadd.s32 4294967294, %s12954_s21  }
   0xd   : > { %15033 = sst [smem:[#allocation7_spill]] %s12954_s21  ;;  %s13078_s24 = sadd.s32 1, %s12954_s21  }
   0xe   : > { %15034 = sst [smem:[#allocation8_spill]] %s13078_s24  ;;  %s370_s25 = sadd.s32 1, %s12950_s20 }
   0xf   : > { %s367_s26 = ssub.s32 %s12954_s21, %s13078_s24  ;;  %p380_p0 = scmp.ne.s32.totalorder %s12950_s20, %s12946_s19 }
  0x10   : > { %p368_p1 = scmp.eq.s32.totalorder %s367_s26, 0  ;;  %p381_p2 = scmp.eq.s32.totalorder %s13074_s22, 1 }
  0x11   : > { %p386_p3 = scmp.ne.s32.totalorder %s12946_s19, %s12942_s18  ;;  %p387_p4 = scmp.eq.s32.totalorder %s11201_s23, 1 }
  0x12   : > { %s13089_s27 = scalar_select %p368_p1, %s12950_s20, %s370_s25  }
  0x13   : > { %p13091_p5 = por %p381_p2, %p380_p0  ;;  %p13095_p6 = por %p387_p4, %p386_p3 }
  0x14   : > { %15035 = sst [smem:[#allocation9_spill]] %s13089_s27  ;;  %p11204_p7 = scmp.ge.s32.totalorder %s12954_s21, 1 }
  0x15   : > { %s15036_s28 = scalar_select %p13091_p5, 1, 0 }
  0x16   : > { %s15038_s29 = scalar_select %p13095_p6, 1, 0 }
  0x17   : > { %15037 = sst [smem:[#allocation10_spill]] %s15036_s28  ;;  %p474_p8 = scmp.lt.s32.totalorder %s12954_s21, 3 }
  0x18   : > { %15039 = sst [smem:[#allocation11_spill]] %s15038_s29 }
  0x19   : > { %p475_p9 = pnand %p11204_p7, %p474_p8 }
  0x1a   : > { %s11206_s30 = sshll.u32 (!%p475_p9), %s13074_s22, 2  ;;  %vm581_vm0 = vcmask (!%p475_p9), 261120   ;;  %s15040_s0 = sld [smem:[#allocation12_spill]] (!%p475_p9)  ;;  %v651_v37 = vlaneseq (!%p475_p9)  ;;  %v13158_v52 = vld [vmem:[%s14981_s4] sm:$0xff] (!%p475_p9)  ;;  %vm12957_vm9 = vmmov (!%p475_p9), 0   ;;  %vm794_vm10 = vcmask (!%p475_p9), 64512  }
  0x1b   : > { %478 = sbr.rel (%p475_p9) target bundleno = 8413 (0x20dd), region = 80  ;;  %p538_p10 = scmp.lt.s32.totalorder (!%p475_p9), %s11206_s30, 7 }
  0x1c   : > { %s15041_s5 = sld [smem:[#allocation14_spill]] (!%p475_p9)  ;;  %v13150_v44 = vshrl.u32 (!%p475_p9), %v651_v37, 7  ;;  %s15042_s6 = sld [smem:[#allocation15_spill]] (!%p475_p9) }
  0x1d   : > { %s15004_s26 = smov (!%p475_p9), 88   ;;  %s15012_s17 = smov (!%p475_p9), 120  }
  0x1e   : > { %v13153_v50 = vsub.s32 (!%p475_p9), 0, %v13150_v44  ;;  %v13163_v55 = vsub.s32 (!%p475_p9), 1, %v13150_v44  ;;  %s14998_s23 = smov (!%p475_p9), 112   ;;  %s14996_s20 = smov (!%p475_p9), 104  }
  0x1f   : > { %s15008_s24 = smov (!%p475_p9), 72   ;;  %s15043_s2 = sld [smem:[#allocation13_spill]] (!%p475_p9) }
  0x20   : > { %v654_v54 = vrot.slane (!%p475_p9), %v13158_v52, %v13153_v50  ;;  %v674_v57 = vrot.slane (!%p475_p9), %v13158_v52, %v13163_v55  ;;  %s15002_s27 = smov (!%p475_p9), 48   ;;  %s15046_s7 = sld [smem:[#allocation16_spill]] (!%p475_p9) }
  0x21   : > { %s15055_s29 = smov (!%p475_p9), 56   ;;  %s15056_s8 = sld [smem:[#allocation17_spill]] (!%p475_p9) }
  0x22   : > { %s15069_s30 = smov (!%p538_p10, %s11206_s30), 7  ;;  %v679_v18 = vld [vmem:[%s15041_s5] sm:$0xff]  ;;  %v680_v19 = vld [vmem:[%s15041_s5 + $0x8] sm:$0xff]  ;;  %v681_v20 = vld [vmem:[%s15041_s5 + $0x10] sm:$0xff]  ;;  %s15058_s21 = sld [smem:[#allocation18_spill]] }
  0x23   : > { %s13102_s16 = sshll.u32 %s15069_s30, 3  ;;  %v12500_v21 = vpack.c.bf16 %v680_v19, %v679_v18  ;;  %v682_v22 = vld [vmem:[%s15041_s5 + $0x18] sm:$0xff]  ;;  %s15014_s30 = smov 96  }
  0x24   : > { %s13108_s25 = scalar_lea.vmem %s15040_s0, %s13102_s16  ;;  %v12504_v23 = vpack.c.bf16 %v682_v22, %v681_v20  ;;  %s15006_s0 = smov 80  }
  0x25   : > { %v563_v0 = vld [vmem:[%s13108_s25] sm:$0xff]  ;;  %v564_v1 = vld [vmem:[%s13108_s25 + $0x8] sm:$0xff]  ;;  %v565_v4 = vld [vmem:[%s13108_s25 + $0x10] sm:$0xff]  ;;  %12501 = vmatprep.subr.bf16.mxu0 %v12500_v21  ;;  %s15053_s5 = smov 80  }
  0x26   : > { %v582_v2 = vsel %vm581_vm0, %v563_v0, 0.0  ;;  %v585_v3 = vsel %vm581_vm0, %v564_v1, 0.0  ;;  %v588_v5 = vsel %vm581_vm0, %v565_v4, 0.0  ;;  %v566_v15 = vld [vmem:[%s13108_s25 + $0x18] sm:$0xff]  ;;  %12503 = vmatpush3.bf16.msra.mxu0 %v12500_v21 }
  0x27   : > { %583 = vadd.xlane.f32.xlu0 %v582_v2  ;;  %v591_v17 = vsel %vm581_vm0, %v566_v15, 0.0  ;;  %12505 = vmatprep.subr.bf16.mxu0 %v12504_v23 }
  0x2a   : > { %12507 = vmatpush3.bf16.msra.mxu0 %v12504_v23 }
  0x2b   : > { %586 = vadd.xlane.f32.xlu0 %v585_v3 }
  0x2f   : > { %589 = vadd.xlane.f32.xlu0 %v588_v5 }
  0xb4   : > { %v584_v6 = vpop.xlane.xlu0 %583 }
  0xb5   : > { %v595_v7 = vmul.f32 0.03125, %v584_v6 }
  0xb7   : > { %v13116_v8 = vsub.f32 %v563_v0, %v595_v7 }
  0xb8   : > { %v587_v9 = vpop.xlane.xlu0 %586 }
  0xb9   : > { %v596_v10 = vmul.f32 0.03125, %v587_v9  ;;  %v603_v11 = vmul.f32 %v13116_v8, %v13116_v8  ;;  %v655_v56 = vmul.f32 %v654_v54, %v13116_v8 }
  0xbb   : > { %v13120_v12 = vsub.f32 %v564_v1, %v596_v10  ;;  %v607_v13 = vsel %vm581_vm0, %v603_v11, 0.0 }
  0xbc   : > { %608 = vadd.xlane.f32.xlu1 %v607_v13  ;;  %v590_v24 = vpop.xlane.xlu0 %589  ;;  %v12956_v13 = vmov 0.0  }
  0xbd   : > { %v604_v14 = vmul.f32 %v13120_v12, %v13120_v12  ;;  %v597_v25 = vmul.f32 0.03125, %v590_v24  ;;  %v656_v60 = vmul.f32 %v654_v54, %v13120_v12  ;;  %11992 = vmatprep.subr.mxu1 %v12956_v13  ;;  %12007 = vmatprep.subr.mxu0 %v12956_v13 }
  0xbe   : > { %11994 = vmatprep.mubr.msk.f32.mxu1 %vm12957_vm9, %v12956_v13 }
  0xbf   : > { %v610_v16 = vsel %vm581_vm0, %v604_v14, 0.0  ;;  %v13140_v26 = vsub.f32 %v565_v4, %v597_v25 }
  0xc0   : > { %611 = vadd.xlane.f32.xlu1 %v610_v16 }
  0xc1   : > { %v605_v27 = vmul.f32 %v13140_v26, %v13140_v26  ;;  %v657_v9 = vmul.f32 %v654_v54, %v13140_v26  ;;  %v13184_v26 = vld [vmem:[%s15042_s6] ss:$0 sm:$0xff]  ;;  %s15054_s6 = smov 72  }
  0xc3   : > { %v613_v28 = vsel %vm581_vm0, %v605_v27, 0.0 }
  0xc4   : > { %592 = vadd.xlane.f32.xlu1 %v591_v17  ;;  %614 = vadd.xlane.f32.xlu0 %v613_v28 }
 0x149   : > { %v609_v29 = vpop.xlane.xlu1 %608 }
 0x14a   : > { %v619_v30 = vmul.f32 0.032258064, %v609_v29 }
 0x14c   : > { %12707 = vrsqrt.f32 %v619_v30  ;;  %vm625_vm1 = vcmp.eq.f32.partialorder %v619_v30, inf  ;;  %v628_v40 = vand.u32 2147483648, %v619_v30  ;;  %vm627_vm2 = vcmp.eq.f32.partialorder %v619_v30, 0.0 }
 0x14d   : > { %v612_v31 = vpop.xlane.xlu1 %611 }
 0x14e   : > { %v620_v32 = vmul.f32 0.032258064, %v612_v31 }
 0x150   : > { %12709 = vrsqrt.f32 %v620_v32  ;;  %vm632_vm3 = vcmp.eq.f32.partialorder %v620_v32, inf  ;;  %v635_v48 = vand.u32 2147483648, %v620_v32  ;;  %vm634_vm4 = vcmp.eq.f32.partialorder %v620_v32, 0.0 }
 0x151   : > { %v593_v33 = vpop.xlane.xlu1 %592  ;;  %v615_v1 = vpop.xlane.xlu0 %614 }
 0x152   : > { %v598_v34 = vmul.f32 0.03125, %v593_v33  ;;  %v621_v2 = vmul.f32 0.032258064, %v615_v1 }
 0x154   : > { %v13145_v35 = vsub.f32 %v566_v15, %v598_v34  ;;  %vm639_vm5 = vcmp.eq.f32.partialorder %v621_v2, inf  ;;  %v642_v4 = vand.u32 2147483648, %v621_v2  ;;  %vm641_vm6 = vcmp.eq.f32.partialorder %v621_v2, 0.0 }
 0x156   : > { %v12708_v36 = vpop.eup %12707  ;;  %v606_v38 = vmul.f32 %v13145_v35, %v13145_v35  ;;  %v658_v22 = vmul.f32 %v654_v54, %v13145_v35 }
 0x157   : > { %v624_v39 = vmul.f32 %v12708_v36, %v619_v30 }
 0x158   : > { %v616_v41 = vsel %vm581_vm0, %v606_v38, 0.0 }
 0x159   : > { %v626_v42 = vsel %vm625_vm1, %v619_v30, %v624_v39  ;;  %617 = vadd.xlane.f32.xlu1 %v616_v41 }
 0x15a   : > { %v12710_v43 = vpop.eup %12709  ;;  %v629_v45 = vsel %vm627_vm2, %v628_v40, %v626_v42 }
 0x15b   : > { %v631_v46 = vmul.f32 %v12710_v43, %v620_v32  ;;  %v659_v47 = vadd.f32 1e-06, %v629_v45 }
 0x15d   : > { %v633_v49 = vsel %vm632_vm3, %v620_v32, %v631_v46  ;;  %12711 = vrcp.f32 %v659_v47 }
 0x15e   : > { %v636_v51 = vsel %vm634_vm4, %v635_v48, %v633_v49 }
 0x15f   : > { %v660_v53 = vadd.f32 1e-06, %v636_v51 }
 0x161   : > { %12713 = vrcp.f32 %v660_v53 }
 0x162   : > { %12715 = vrsqrt.f32 %v621_v2 }
 0x167   : > { %v12712_v58 = vpop.eup %12711 }
 0x168   : > { %v667_v59 = vmul.f32 %v12712_v58, %v655_v56 }
 0x16a   : > { %v675_v61 = vadd.f32 %v674_v57, %v667_v59 }
 0x16b   : > { %v12714_v62 = vpop.eup %12713 }
 0x16c   : > { %11986 = vmatprep.mubr.msk.f32.mxu0 %vm581_vm0, %v675_v61  ;;  %v668_v63 = vmul.f32 %v12714_v62, %v656_v60  ;;  %v12716_v3 = vpop.eup %12715 }
 0x16d   : > { %v638_v5 = vmul.f32 %v12716_v3, %v621_v2 }
 0x16e   : > { %v676_v0 = vadd.f32 %v674_v57, %v668_v63 }
 0x16f   : > { %v640_v6 = vsel %vm639_vm5, %v621_v2, %v638_v5 }
 0x170   : > { %11987 = vmatmul.mubr.msk.f32.vlgmr.msra.gmra.mrb[0].mxu0 %vm581_vm0, %v676_v0  ;;  %v643_v7 = vsel %vm641_vm6, %v642_v4, %v640_v6 }
 0x171   : > { %v661_v8 = vadd.f32 1e-06, %v643_v7 }
 0x173   : > { %12717 = vrcp.f32 %v661_v8 }
 0x17d   : > { %v12718_v10 = vpop.eup %12717 }
 0x17e   : > { %v669_v11 = vmul.f32 %v12718_v10, %v657_v9 }
 0x180   : > { %v677_v12 = vadd.f32 %v674_v57, %v669_v11 }
 0x182   : > { %11989 = vmatprep.mubr.msk.f32.mxu0 %vm581_vm0, %v677_v12 }
 0x1e6   : > { %v618_v14 = vpop.xlane.xlu1 %617 }
 0x1e7   : > { %v622_v15 = vmul.f32 0.032258064, %v618_v14 }
 0x1e9   : > { %12719 = vrsqrt.f32 %v622_v15  ;;  %vm646_vm7 = vcmp.eq.f32.partialorder %v622_v15, inf  ;;  %v649_v17 = vand.u32 2147483648, %v622_v15  ;;  %vm648_vm8 = vcmp.eq.f32.partialorder %v622_v15, 0.0 }
 0x1f3   : > { %v12720_v16 = vpop.eup %12719 }
 0x1f4   : > { %v645_v18 = vmul.f32 %v12720_v16, %v622_v15 }
 0x1f6   : > { %v647_v19 = vsel %vm646_vm7, %v622_v15, %v645_v18 }
 0x1f7   : > { %v650_v20 = vsel %vm648_vm8, %v649_v17, %v647_v19 }
 0x1f8   : > { %v662_v21 = vadd.f32 1e-06, %v650_v20 }
 0x1fa   : > { %12721 = vrcp.f32 %v662_v21 }
 0x204   : > { %v12722_v23 = vpop.eup %12721 }
 0x205   : > { %v670_v24 = vmul.f32 %v12722_v23, %v658_v22 }
 0x207   : > { %v678_v25 = vadd.f32 %v674_v57, %v670_v24 }
 0x209   : > { %11990 = vmatmul.mubr.msk.f32.gmra.mrb[2].mxu0 %vm581_vm0, %v678_v25 }
 0x20a   : > { %12009 = vmatprep.mubr.msk.f32.mxu0 %vm12957_vm9, %v12956_v13 }
 0x243   : > { %v13186_v27 = vpop.f32.mrb[0].mxu0 }
 0x244   : > { %v768_v28 = vpop.f32.mrb[1].mxu0  ;;  %v13253_v16 = vadd.f32 %v13186_v27, %v13184_v26 }
 0x245   : > { %v13189_v29 = vadd.f32 %v13184_v26, %v768_v28 }
 0x247   : > { %871 = vrot.lane.b32.xlu1 %v13189_v29, %s15004_s26  ;;  %792 = vrot.lane.b32.xlu0 %v13189_v29, %s15014_s30 }
 0x24b   : > { %869 = vrot.lane.b32.xlu1 %v13189_v29, %s15012_s17  ;;  %947 = vrot.lane.b32.xlu0 %v13189_v29, %s14998_s23  ;;  %s13234_s23 = scalar_lea.vmem %s15043_s2, %s13102_s16  ;;  %s15052_s2 = smov 88  }
 0x24c   : > { %v571_v39 = vld [vmem:[%s13234_s23] sm:$0xff] }
 0x24f   : > { %949 = vrot.lane.b32.xlu1 %v13189_v29, %s15006_s0  ;;  %1025 = vrot.lane.b32.xlu0 %v13189_v29, %s14996_s20  ;;  %s15000_s20 = smov 64  }
 0x253   : > { %1027 = vrot.lane.b32.xlu1 %v13189_v29, %s15008_s24 }
 0x2b9   : > { %v872_v30 = vpop.permute.xlu1 %871  ;;  %v793_v31 = vpop.permute.xlu0 %792 }
 0x2ba   : > { %11993 = vmatpush3.xpose.msk.msra.mxu1 %vm794_vm10, %v793_v31 }
 0x2bb   : > { %11997 = vmatprep.subr.mxu1 %v12956_v13 }
 0x2bd   : > { %v870_v32 = vpop.permute.xlu1 %869  ;;  %11995 = vmatmul.mubr.msk.f32.vlgmr.msra.gmra.mrb[0].mxu1 %vm794_vm10, %v13189_v29  ;;  %v948_v34 = vpop.permute.xlu0 %947 }
 0x2be   : > { %11998 = vmatpush3.xpose.msk.msra.mxu1 %vm794_vm10, %v872_v30  ;;  %11999 = vmatprep.mubr.msk.f32.mxu1 %vm12957_vm9, %v12956_v13 }
 0x2bf   : > { %12002 = vmatprep.subr.mxu1 %v12956_v13 }
 0x2c1   : > { %v950_v33 = vpop.permute.xlu1 %949  ;;  %12000 = vmatmul.mubr.msk.f32.vlgmr.msra.gmra.mrb[2].mxu1 %vm794_vm10, %v870_v32  ;;  %v1026_v36 = vpop.permute.xlu0 %1025 }
 0x2c2   : > { %12003 = vmatpush3.xpose.msk.msra.mxu1 %vm794_vm10, %v950_v33  ;;  %12004 = vmatprep.mubr.msk.f32.mxu1 %vm12957_vm9, %v12956_v13 }
 0x2c3   : > { %12012 = vmatprep.subr.mxu1 %v12956_v13 }
 0x2c5   : > { %v1028_v35 = vpop.permute.xlu1 %1027  ;;  %12005 = vmatmul.mubr.msk.f32.vlgmr.msra.gmra.mrb[4].mxu1 %vm794_vm10, %v948_v34 }
 0x2c6   : > { %12008 = vmatpush3.xpose.msk.msra.mxu0 %vm794_vm10, %v1028_v35  ;;  %12014 = vmatprep.mubr.msk.f32.mxu1 %vm12957_vm9, %v12956_v13 }
 0x2c7   : > { %12017 = vmatprep.subr.mxu0 %v12956_v13 }
 0x2c9   : > { %12010 = vmatmul.mubr.msk.f32.vlgmr.msra.gmra.mrb[4].mxu0 %vm794_vm10, %v1026_v36 }
 0x2ca   : > { %12019 = vmatprep.mubr.msk.f32.mxu0 %vm12957_vm9, %v12956_v13 }
 0x2dc   : > { %v13226_v37 = vpop.f32.mrb[2].mxu0 }
 0x2dd   : > { %v13228_v38 = vpop.f32.mrb[3].mxu0 }
 0x390   : > { %v865_v40 = vpop.f32.mrb[0].mxu1 }
 0x391   : > { %v866_v41 = vadd.f32 %v865_v40, %v571_v39  ;;  %v11996_v42 = vpop.f32.mrb[1].mxu1 }
 0x392   : > { %v13301_v42 = vld [vmem:[%s15046_s7] sm:$0xff] }
 0x393   : > { %v1103_v43 = vsel %vm794_vm10, %v866_v41, -inf  ;;  %12018 = vmatpush3.msra.mxu0 %v13301_v42 }
 0x394   : > { %1104 = vmax.xlane.f32.xlu1 %v1103_v43  ;;  %v943_v45 = vpop.f32.mrb[2].mxu1  ;;  %12027 = vmatprep.subr.mxu0 %v12956_v13  ;;  %v13308_v43 = vld [vmem:[%s15046_s7 + $0x8] sm:$0xff] }
 0x395   : > { %v944_v46 = vadd.f32 %v943_v45, %v571_v39  ;;  %v12001_v47 = vpop.f32.mrb[3].mxu1 }
 0x396   : > { %v13318_v47 = vld [vmem:[%s15046_s7 + $0x10] sm:$0xff] }
 0x397   : > { %v1106_v48 = vsel %vm794_vm10, %v944_v46, -inf }
 0x398   : > { %1107 = vmax.xlane.f32.xlu0 %v1106_v48  ;;  %v1021_v49 = vpop.f32.mrb[4].mxu1 }
 0x399   : > { %v1022_v51 = vadd.f32 %v1021_v49, %v571_v39  ;;  %v12006_v53 = vpop.f32.mrb[5].mxu1 }
 0x39b   : > { %v1109_v54 = vsel %vm794_vm10, %v1022_v51, -inf }
 0x39c   : > { %1110 = vmax.xlane.f32.xlu0 %v1109_v54  ;;  %v1099_v56 = vpop.f32.mrb[4].mxu0 }
 0x39d   : > { %v1100_v57 = vadd.f32 %v1099_v56, %v571_v39  ;;  %v12011_v58 = vpop.f32.mrb[5].mxu0 }
 0x39e   : > { %v572_v58 = vld [vmem:[%s13234_s23 + $0x8] sm:$0xff] }
 0x39f   : > { %v1112_v59 = vsel %vm794_vm10, %v1100_v57, -inf }
 0x3a0   : > { %1113 = vmax.xlane.f32.xlu0 %v1112_v59 }
 0x3a5   : > { %1147 = vrot.lane.b32.xlu1 %v13189_v29, %s15000_s20  ;;  %s15016_s20 = smov 56  }
 0x421   : > { %v1105_v60 = vpop.xlane.xlu1 %1104 }
 0x422   : > { %v1115_v61 = vsub.f32 %v866_v41, %v1105_v60 }
 0x424   : > { %v1119_v62 = vmul.f32 1.442695, %v1115_v61 }
 0x425   : > { %v1148_v63 = vpop.permute.xlu1 %1147  ;;  %v1108_v0 = vpop.xlane.xlu0 %1107 }
 0x426   : > { %12723 = vpow2.f32 %v1119_v62  ;;  %12013 = vmatpush3.msra.mxu1 %v1148_v63  ;;  %v1116_v2 = vsub.f32 %v944_v46, %v1108_v0 }
 0x427   : > { %12022 = vmatprep.subr.mxu1 %v12956_v13 }
 0x428   : > { %v1121_v6 = vmul.f32 1.442695, %v1116_v2 }
 0x429   : > { %v1111_v1 = vpop.xlane.xlu0 %1110 }
 0x42a   : > { %v1117_v14 = vsub.f32 %v1022_v51, %v1111_v1  ;;  %v13328_v51 = vld [vmem:[%s15046_s7 + $0x18] sm:$0xff] }
 0x42c   : > { %v1123_v15 = vmul.f32 1.442695, %v1117_v14 }
 0x42d   : > { %v1114_v3 = vpop.xlane.xlu0 %1113 }
 0x42e   : > { %v1118_v4 = vsub.f32 %v1100_v57, %v1114_v3 }
 0x430   : > { %v12724_v5 = vpop.eup %12723  ;;  %v1125_v7 = vmul.f32 1.442695, %v1118_v4 }
 0x431   : > { %v1127_v8 = vsel %vm794_vm10, %v12724_v5, 0.0 }
 0x432   : > { %12725 = vpow2.f32 %v1125_v7  ;;  %1128 = vadd.xlane.f32.xlu1 %v1127_v8  ;;  %v13354_v7 = vsub.s32 6, %v13150_v44 }
 0x433   : > { %12727 = vpow2.f32 %v1121_v6 }
 0x434   : > { %12729 = vpow2.f32 %v1123_v15  ;;  %v13358_v8 = vrot.slane %v13158_v52, %v13354_v7 }
 0x43c   : > { %v12726_v9 = vpop.eup %12725 }
 0x43d   : > { %v1136_v10 = vsel %vm794_vm10, %v12726_v9, 0.0  ;;  %v12728_v11 = vpop.eup %12727 }
 0x43e   : > { %1137 = vadd.xlane.f32.xlu0 %v1136_v10  ;;  %v1130_v12 = vsel %vm794_vm10, %v12728_v11, 0.0  ;;  %v12730_v17 = vpop.eup %12729 }
 0x43f   : > { %v1133_v18 = vsel %vm794_vm10, %v12730_v17, 0.0 }
 0x442   : > { %1131 = vadd.xlane.f32.xlu0 %v1130_v12 }
 0x443   : > { %1451 = vrot.lane.b32.xlu1 %v13189_v29, %s15002_s27  ;;  %s15010_s27 = smov 40  }
 0x458   : > { %1301 = vrot.lane.b32.xlu0 %v13189_v29, %s15016_s20 }
 0x45c   : > { %1830 = vrot.lane.b32.xlu0 %v13253_v16, %s15004_s26  ;;  %s15044_s26 = smov 112  }
 0x460   : > { %1908 = vrot.lane.b32.xlu0 %v13253_v16, %s15006_s0  ;;  %s15045_s0 = smov 104  }
 0x464   : > { %1986 = vrot.lane.b32.xlu0 %v13253_v16, %s15008_s24  ;;  %s15047_s24 = smov 48  }
 0x467   : > { %1134 = vadd.xlane.f32.xlu1 %v1133_v18 }
 0x478   : > { %1601 = vrot.lane.b32.xlu1 %v13189_v29, %s15010_s27  ;;  %s15048_s27 = smov 64  }
 0x47c   : > { %1752 = vrot.lane.b32.xlu1 %v13253_v16, %s15014_s30  ;;  %s15049_s30 = smov 96  }
 0x480   : > { %1828 = vrot.lane.b32.xlu1 %v13253_v16, %s15012_s17  ;;  %s15050_s17 = smov 120  }
 0x484   : > { %1906 = vrot.lane.b32.xlu1 %v13253_v16, %s15044_s26 }
 0x488   : > { %1984 = vrot.lane.b32.xlu1 %v13253_v16, %s15045_s0 }
 0x4bf   : > { %v1129_v19 = vpop.xlane.xlu1 %1128 }
 0x4c0   : > { %12731 = vrcp.f32 %v1129_v19 }
 0x4c3   : > { %v1452_v28 = vpop.permute.xlu1 %1451 }
 0x4ca   : > { %v12732_v20 = vpop.eup %12731 }
 0x4cb   : > { %v1138_v21 = vpop.xlane.xlu0 %1137  ;;  %v1143_v22 = vmul.f32 %v12732_v20, %v12724_v5 }
 0x4cd   : > { %12015 = vmatmul.mubr.msk.f32.vlgmr.msra.gmra.mrb[6].mxu1 %vm794_vm10, %v1143_v22 }
 0x4ce   : > { %12024 = vmatprep.mubr.msk.f32.mxu1 %vm12957_vm9, %v12956_v13 }
 0x4cf   : > { %v1132_v23 = vpop.xlane.xlu0 %1131 }
 0x4d0   : > { %12733 = vrcp.f32 %v1132_v23 }
 0x4d3   : > { %v1302_v24 = vpop.permute.xlu0 %1301 }
 0x4d4   : > { %12023 = vmatpush3.msra.mxu1 %v1302_v24 }
 0x4d5   : > { %12032 = vmatprep.subr.mxu1 %v12956_v13 }
 0x4d7   : > { %v1831_v36 = vpop.permute.xlu0 %1830 }
 0x4da   : > { %v12734_v25 = vpop.eup %12733 }
 0x4db   : > { %v1144_v27 = vmul.f32 %v12734_v25, %v12728_v11  ;;  %v1909_v40 = vpop.permute.xlu0 %1908 }
 0x4dd   : > { %12025 = vmatmul.mubr.msk.f32.vlgmr.msra.gmra.mrb[8].mxu1 %vm794_vm10, %v1144_v27 }
 0x4de   : > { %12033 = vmatpush3.msra.mxu1 %v1452_v28  ;;  %12034 = vmatprep.mubr.msk.f32.mxu1 %vm12957_vm9, %v12956_v13 }
 0x4df   : > { %12042 = vmatprep.subr.mxu1 %v12956_v13  ;;  %v1987_v60 = vpop.permute.xlu0 %1986 }
 0x4f4   : > { %v1135_v29 = vpop.xlane.xlu1 %1134 }
 0x4f5   : > { %12735 = vrcp.f32 %v1135_v29 }
 0x4f6   : > { %12737 = vrcp.f32 %v1138_v21 }
 0x4f8   : > { %v1602_v30 = vpop.permute.xlu1 %1601 }
 0x4fc   : > { %v1753_v34 = vpop.permute.xlu1 %1752 }
 0x4ff   : > { %v12736_v31 = vpop.eup %12735 }
 0x500   : > { %v1145_v32 = vmul.f32 %v12736_v31, %v12730_v17  ;;  %v12738_v33 = vpop.eup %12737  ;;  %v1829_v39 = vpop.permute.xlu1 %1828 }
 0x501   : > { %v1146_v35 = vmul.f32 %v12738_v33, %v12726_v9 }
 0x502   : > { %12035 = vmatmul.mubr.msk.f32.vlgmr.msra.gmra.mrb[10].mxu1 %vm794_vm10, %v1145_v32 }
 0x503   : > { %12043 = vmatpush3.msra.mxu1 %v1602_v30  ;;  %12044 = vmatprep.mubr.msk.f32.mxu1 %vm12957_vm9, %v12956_v13 }
 0x504   : > { %12052 = vmatprep.subr.mxu1 %v12956_v13  ;;  %v1907_v41 = vpop.permute.xlu1 %1906 }
 0x506   : > { %12045 = vmatmul.mubr.msk.f32.vlgmr.msra.gmra.mrb[12].mxu1 %vm794_vm10, %v1146_v35 }
 0x507   : > { %12054 = vmatprep.mubr.msk.f32.mxu1 %vm12957_vm9, %v12956_v13 }
 0x508   : > { %v1985_v0 = vpop.permute.xlu1 %1984 }
 0x50a   : > { %12053 = vmatpush3.xpose.msk.msra.mxu1 %vm794_vm10, %v1753_v34 }
 0x50b   : > { %12062 = vmatprep.subr.mxu1 %v12956_v13 }
 0x50d   : > { %12055 = vmatmul.mubr.msk.f32.vlgmr.msra.gmra.mrb[14].mxu1 %vm794_vm10, %v13253_v16 }
 0x50e   : > { %12063 = vmatpush3.xpose.msk.msra.mxu1 %vm794_vm10, %v1909_v40  ;;  %12064 = vmatprep.mubr.msk.f32.mxu1 %vm12957_vm9, %v12956_v13 }
 0x50f   : > { %12072 = vmatprep.subr.mxu1 %v12956_v13 }
 0x511   : > { %12065 = vmatmul.mubr.msk.f32.vlgmr.msra.gmra.mrb[16].mxu1 %vm794_vm10, %v1907_v41  ;;  %v13375_v41 = vadd.f32 %v13184_v26, %v13228_v38 }
 0x512   : > { %12074 = vmatprep.mubr.msk.f32.mxu1 %vm12957_vm9, %v12956_v13 }
 0x5a0   : > { %v1219_v45 = vpop.f32.mrb[6].mxu1 }
 0x5a1   : > { %v12016_v46 = vpop.f32.mrb[7].mxu1  ;;  %12020 = vmatmul.mubr.msk.f32.vlgmr.msra.gmra.mrb[6].mxu0 %vm794_vm10, %v1219_v45 }
 0x5a2   : > { %12028 = vmatpush3.msra.mxu0 %v13308_v43  ;;  %12029 = vmatprep.mubr.msk.f32.mxu0 %vm12957_vm9, %v12956_v13 }
 0x5a3   : > { %12037 = vmatprep.subr.mxu0 %v12956_v13 }
 0x5b0   : > { %v1373_v48 = vpop.f32.mrb[8].mxu1 }
 0x5b1   : > { %v12026_v49 = vpop.f32.mrb[9].mxu1  ;;  %12030 = vmatmul.mubr.msk.f32.vlgmr.msra.gmra.mrb[8].mxu0 %vm794_vm10, %v1373_v48 }
 0x5b2   : > { %12038 = vmatpush3.msra.mxu0 %v13318_v47  ;;  %12039 = vmatprep.mubr.msk.f32.mxu0 %vm12957_vm9, %v12956_v13 }
 0x5b3   : > { %12047 = vmatprep.subr.mxu0 %v12956_v13 }
 0x5d5   : > { %v1523_v53 = vpop.f32.mrb[10].mxu1 }
 0x5d6   : > { %v12036_v54 = vpop.f32.mrb[11].mxu1  ;;  %12040 = vmatmul.mubr.msk.f32.vlgmr.msra.gmra.mrb[10].mxu0 %vm794_vm10, %v1523_v53 }
 0x5d7   : > { %12048 = vmatpush3.msra.mxu0 %v13328_v51  ;;  %12049 = vmatprep.mubr.msk.f32.mxu0 %vm12957_vm9, %v12956_v13 }
 0x5d8   : > { %12057 = vmatprep.subr.mxu0 %v12956_v13 }
 0x5d9   : > { %v1673_v56 = vpop.f32.mrb[12].mxu1 }
 0x5da   : > { %v12046_v57 = vpop.f32.mrb[13].mxu1  ;;  %12050 = vmatmul.mubr.msk.f32.vlgmr.msra.gmra.mrb[12].mxu0 %vm794_vm10, %v1673_v56 }
 0x5db   : > { %12059 = vmatprep.mubr.msk.f32.mxu0 %vm12957_vm9, %v12956_v13 }
 0x5de   : > { %12058 = vmatpush3.xpose.msk.msra.mxu0 %vm794_vm10, %v1831_v36 }
 0x5df   : > { %12067 = vmatprep.subr.mxu0 %v12956_v13 }
 0x5e0   : > { %v1824_v59 = vpop.f32.mrb[14].mxu1 }
 0x5e1   : > { %v1825_v61 = vadd.f32 %v1824_v59, %v572_v58  ;;  %v12056_v62 = vpop.f32.mrb[15].mxu1  ;;  %12060 = vmatmul.mubr.msk.f32.vlgmr.msra.gmra.mrb[14].mxu0 %vm794_vm10, %v1829_v39 }
 0x5e2   : > { %12068 = vmatpush3.xpose.msk.msra.mxu0 %vm794_vm10, %v1987_v60  ;;  %12069 = vmatprep.mubr.msk.f32.mxu0 %vm12957_vm9, %v12956_v13 }
 0x5e3   : > { %v2062_v63 = vsel %vm794_vm10, %v1825_v61, -inf  ;;  %12077 = vmatprep.subr.mxu0 %v12956_v13 }
 0x5e4   : > { %2063 = vmax.xlane.f32.xlu0 %v2062_v63  ;;  %v1980_v1 = vpop.f32.mrb[16].mxu1 }
 0x5e5   : > { %v1981_v2 = vadd.f32 %v1980_v1, %v572_v58  ;;  %v12066_v3 = vpop.f32.mrb[17].mxu1  ;;  %12070 = vmatmul.mubr.msk.f32.vlgmr.msra.gmra.mrb[16].mxu0 %vm794_vm10, %v1985_v0 }
 0x5e6   : > { %12078 = vmatpush3.msra.mxu0 %v13301_v42  ;;  %12079 = vmatprep.mubr.msk.f32.mxu0 %vm12957_vm9, %v12956_v13 }
 0x5e7   : > { %v2068_v4 = vsel %vm794_vm10, %v1981_v2, -inf  ;;  %12087 = vmatprep.subr.mxu0 %v12956_v13 }
 0x5e8   : > { %2069 = vmax.xlane.f32.xlu0 %v2068_v4 }
 0x671   : > { %v2064_v14 = vpop.xlane.xlu0 %2063 }
 0x672   : > { %v2074_v17 = vsub.f32 %v1825_v61, %v2064_v14 }
 0x674   : > { %v1292_v5 = vpop.f32.mrb[6].mxu0  ;;  %v2078_v22 = vmul.f32 1.442695, %v2074_v17 }
 0x675   : > { %v12021_v6 = vpop.f32.mrb[7].mxu0  ;;  %v1300_v9 = vadd.f32 %v13358_v8, %v1292_v5  ;;  %v2070_v20 = vpop.xlane.xlu0 %2069 }
 0x676   : > { %v2076_v23 = vsub.f32 %v1981_v2, %v2070_v20  ;;  %12739 = vpow2.f32 %v2078_v22 }
 0x678   : > { %v2082_v52 = vmul.f32 1.442695, %v2076_v23 }
 0x67a   : > { %12741 = vpow2.f32 %v2082_v52 }
 0x680   : > { %v12740_v35 = vpop.eup %12739 }
 0x681   : > { %v2086_v36 = vsel %vm794_vm10, %v12740_v35, 0.0 }
 0x684   : > { %v1446_v10 = vpop.f32.mrb[8].mxu0  ;;  %v12742_v39 = vpop.eup %12741 }
 0x685   : > { %v1450_v11 = vadd.f32 %v1446_v10, %v1300_v9  ;;  %v12031_v12 = vpop.f32.mrb[9].mxu0  ;;  %v2092_v40 = vsel %vm794_vm10, %v12742_v39, 0.0 }
 0x6a9   : > { %v1596_v15 = vpop.f32.mrb[10].mxu0 }
 0x6aa   : > { %v1600_v18 = vadd.f32 %v1596_v15, %v1450_v11  ;;  %v12041_v19 = vpop.f32.mrb[11].mxu0 }
 0x6ad   : > { %v1746_v21 = vpop.f32.mrb[12].mxu0 }
 0x6ae   : > { %v13361_v24 = vadd.f32 %v1746_v21, %v1600_v18  ;;  %v12051_v25 = vpop.f32.mrb[13].mxu0 }
 0x6b4   : > { %v1902_v27 = vpop.f32.mrb[14].mxu0 }
 0x6b5   : > { %v1903_v28 = vadd.f32 %v1902_v27, %v572_v58  ;;  %v12061_v29 = vpop.f32.mrb[15].mxu0 }
 0x6b7   : > { %v2065_v30 = vsel %vm794_vm10, %v1903_v28, -inf }
 0x6b8   : > { %2066 = vmax.xlane.f32.xlu1 %v2065_v30  ;;  %v2058_v31 = vpop.f32.mrb[16].mxu0 }
 0x6b9   : > { %v2059_v32 = vadd.f32 %v2058_v31, %v572_v58  ;;  %v12071_v33 = vpop.f32.mrb[17].mxu0 }
 0x6bb   : > { %v2071_v34 = vsel %vm794_vm10, %v2059_v32, -inf }
 0x6bc   : > { %2072 = vmax.xlane.f32.xlu0 %v2071_v34 }
 0x6c0   : > { %2087 = vadd.xlane.f32.xlu0 %v2086_v36 }
 0x6c4   : > { %2093 = vadd.xlane.f32.xlu0 %v2092_v40 }
 0x6c9   : > { %2256 = vrot.lane.b32.xlu1 %v13253_v16, %s15016_s20  ;;  %s15051_s20 = smov 40  }
 0x6cd   : > { %2406 = vrot.lane.b32.xlu1 %v13253_v16, %s15047_s24 }
 0x6da   : > { %2106 = vrot.lane.b32.xlu0 %v13253_v16, %s15048_s27 }
 0x6de   : > { %2707 = vrot.lane.b32.xlu0 %v13375_v41, %s15049_s30 }
 0x6e2   : > { %2783 = vrot.lane.b32.xlu0 %v13375_v41, %s15050_s17 }
 0x6e6   : > { %2861 = vrot.lane.b32.xlu0 %v13375_v41, %s15044_s26 }
 0x6ea   : > { %2939 = vrot.lane.b32.xlu0 %v13375_v41, %s15045_s0 }
 0x745   : > { %v2067_v45 = vpop.xlane.xlu1 %2066 }
 0x746   : > { %v2075_v46 = vsub.f32 %v1903_v28, %v2067_v45  ;;  %v573_v28 = vld [vmem:[%s13234_s23 + $0x10] sm:$0xff] }
 0x748   : > { %v2080_v48 = vmul.f32 1.442695, %v2075_v46 }
 0x749   : > { %v2073_v49 = vpop.xlane.xlu0 %2072  ;;  %v2257_v0 = vpop.permute.xlu1 %2256 }
 0x74a   : > { %12743 = vpow2.f32 %v2080_v48  ;;  %v2077_v53 = vsub.f32 %v2059_v32, %v2073_v49 }
 0x74c   : > { %v2084_v38 = vmul.f32 1.442695, %v2077_v53 }
 0x74d   : > { %v2088_v54 = vpop.xlane.xlu0 %2087  ;;  %v2407_v1 = vpop.permute.xlu1 %2406 }
 0x74e   : > { %12745 = vpow2.f32 %v2084_v38 }
 0x74f   : > { %12747 = vrcp.f32 %v2088_v54 }
 0x751   : > { %v2094_v56 = vpop.xlane.xlu0 %2093 }
 0x754   : > { %v12744_v57 = vpop.eup %12743 }
 0x755   : > { %v2107_v58 = vpop.permute.xlu0 %2106  ;;  %v2089_v59 = vsel %vm794_vm10, %v12744_v57, 0.0 }
 0x756   : > { %2090 = vadd.xlane.f32.xlu1 %v2089_v59  ;;  %12073 = vmatpush3.msra.mxu1 %v2107_v58 }
 0x757   : > { %12082 = vmatprep.subr.mxu1 %v12956_v13 }
 0x758   : > { %v12746_v60 = vpop.eup %12745 }
 0x759   : > { %v12748_v61 = vpop.eup %12747  ;;  %v2095_v62 = vsel %vm794_vm10, %v12746_v60, 0.0  ;;  %v2708_v11 = vpop.permute.xlu0 %2707 }
 0x75a   : > { %2096 = vadd.xlane.f32.xlu1 %v2095_v62  ;;  %v2102_v63 = vmul.f32 %v12748_v61, %v12740_v35 }
 0x75c   : > { %12075 = vmatmul.mubr.msk.f32.vlgmr.msra.gmra.mrb[18].mxu1 %vm794_vm10, %v2102_v63 }
 0x75d   : > { %12083 = vmatpush3.msra.mxu1 %v2257_v0  ;;  %12084 = vmatprep.mubr.msk.f32.mxu1 %vm12957_vm9, %v12956_v13  ;;  %v2784_v15 = vpop.permute.xlu0 %2783 }
 0x75e   : > { %12092 = vmatprep.subr.mxu1 %v12956_v13 }
 0x761   : > { %v2862_v18 = vpop.permute.xlu0 %2861 }
 0x765   : > { %v2940_v34 = vpop.permute.xlu0 %2939 }
 0x76b   : > { %2556 = vrot.lane.b32.xlu1 %v13253_v16, %s15051_s20 }
 0x76f   : > { %2785 = vrot.lane.b32.xlu1 %v13375_v41, %s15052_s2 }
 0x773   : > { %2863 = vrot.lane.b32.xlu1 %v13375_v41, %s15053_s5 }
 0x777   : > { %2941 = vrot.lane.b32.xlu1 %v13375_v41, %s15054_s6 }
 0x7e3   : > { %v2091_v2 = vpop.xlane.xlu1 %2090 }
 0x7e4   : > { %12749 = vrcp.f32 %v2091_v2 }
 0x7e5   : > { %12751 = vrcp.f32 %v2094_v56 }
 0x7e7   : > { %v2097_v3 = vpop.xlane.xlu1 %2096 }
 0x7e8   : > { %12753 = vrcp.f32 %v2097_v3 }
 0x7eb   : > { %v2557_v10 = vpop.permute.xlu1 %2556 }
 0x7ee   : > { %v12750_v4 = vpop.eup %12749 }
 0x7ef   : > { %v2103_v5 = vmul.f32 %v12750_v4, %v12744_v57  ;;  %v12752_v6 = vpop.eup %12751  ;;  %v2786_v14 = vpop.permute.xlu1 %2785 }
 0x7f0   : > { %v2104_v16 = vmul.f32 %v12752_v6, %v12742_v39 }
 0x7f1   : > { %12085 = vmatmul.mubr.msk.f32.vlgmr.msra.gmra.mrb[20].mxu1 %vm794_vm10, %v2103_v5 }
 0x7f2   : > { %12093 = vmatpush3.msra.mxu1 %v2407_v1  ;;  %12094 = vmatprep.mubr.msk.f32.mxu1 %vm12957_vm9, %v12956_v13  ;;  %v12754_v9 = vpop.eup %12753 }
 0x7f3   : > { %12102 = vmatprep.subr.mxu1 %v12956_v13  ;;  %v2105_v12 = vmul.f32 %v12754_v9, %v12746_v60  ;;  %v2864_v17 = vpop.permute.xlu1 %2863 }
 0x7f5   : > { %12095 = vmatmul.mubr.msk.f32.vlgmr.msra.gmra.mrb[22].mxu1 %vm794_vm10, %v2104_v16 }
 0x7f6   : > { %12103 = vmatpush3.msra.mxu1 %v2557_v10  ;;  %12104 = vmatprep.mubr.msk.f32.mxu1 %vm12957_vm9, %v12956_v13 }
 0x7f7   : > { %12112 = vmatprep.subr.mxu1 %v12956_v13  ;;  %v2942_v30 = vpop.permute.xlu1 %2941 }
 0x7f9   : > { %12105 = vmatmul.mubr.msk.f32.vlgmr.msra.gmra.mrb[24].mxu1 %vm794_vm10, %v2105_v12 }
 0x7fa   : > { %12114 = vmatprep.mubr.msk.f32.mxu1 %vm12957_vm9, %v12956_v13 }
 0x7fd   : > { %12113 = vmatpush3.xpose.msk.msra.mxu1 %vm794_vm10, %v2708_v11 }
 0x7fe   : > { %12122 = vmatprep.subr.mxu1 %v12956_v13 }
 0x800   : > { %12115 = vmatmul.mubr.msk.f32.vlgmr.msra.gmra.mrb[26].mxu1 %vm794_vm10, %v13375_v41 }
 0x801   : > { %12123 = vmatpush3.xpose.msk.msra.mxu1 %vm794_vm10, %v2864_v17  ;;  %12124 = vmatprep.mubr.msk.f32.mxu1 %vm12957_vm9, %v12956_v13 }
 0x802   : > { %12132 = vmatprep.subr.mxu1 %v12956_v13 }
 0x804   : > { %12125 = vmatmul.mubr.msk.f32.vlgmr.msra.gmra.mrb[28].mxu1 %vm794_vm10, %v2862_v18 }
 0x805   : > { %12134 = vmatprep.mubr.msk.f32.mxu1 %vm12957_vm9, %v12956_v13 }
 0x82f   : > { %v2178_v19 = vpop.f32.mrb[18].mxu1 }
 0x830   : > { %v12076_v20 = vpop.f32.mrb[19].mxu1  ;;  %12080 = vmatmul.mubr.msk.f32.vlgmr.msra.gmra.mrb[18].mxu0 %vm794_vm10, %v2178_v19 }
 0x831   : > { %12088 = vmatpush3.msra.mxu0 %v13308_v43  ;;  %12089 = vmatprep.mubr.msk.f32.mxu0 %vm12957_vm9, %v12956_v13 }
 0x832   : > { %12097 = vmatprep.subr.mxu0 %v12956_v13 }
 0x8c4   : > { %v2328_v21 = vpop.f32.mrb[20].mxu1 }
 0x8c5   : > { %v12086_v22 = vpop.f32.mrb[21].mxu1  ;;  %12090 = vmatmul.mubr.msk.f32.vlgmr.msra.gmra.mrb[20].mxu0 %vm794_vm10, %v2328_v21 }
 0x8c6   : > { %12098 = vmatpush3.msra.mxu0 %v13318_v47  ;;  %12099 = vmatprep.mubr.msk.f32.mxu0 %vm12957_vm9, %v12956_v13 }
 0x8c7   : > { %12107 = vmatprep.subr.mxu0 %v12956_v13 }
 0x8c8   : > { %v2478_v23 = vpop.f32.mrb[22].mxu1 }
 0x8c9   : > { %v12096_v25 = vpop.f32.mrb[23].mxu1  ;;  %12100 = vmatmul.mubr.msk.f32.vlgmr.msra.gmra.mrb[22].mxu0 %vm794_vm10, %v2478_v23 }
 0x8ca   : > { %12108 = vmatpush3.msra.mxu0 %v13328_v51  ;;  %12109 = vmatprep.mubr.msk.f32.mxu0 %vm12957_vm9, %v12956_v13 }
 0x8cb   : > { %12117 = vmatprep.subr.mxu0 %v12956_v13 }
 0x8cc   : > { %v2628_v52 = vpop.f32.mrb[24].mxu1 }
 0x8cd   : > { %v12106_v27 = vpop.f32.mrb[25].mxu1  ;;  %12110 = vmatmul.mubr.msk.f32.vlgmr.msra.gmra.mrb[24].mxu0 %vm794_vm10, %v2628_v52 }
 0x8ce   : > { %12119 = vmatprep.mubr.msk.f32.mxu0 %vm12957_vm9, %v12956_v13 }
 0x8d1   : > { %12118 = vmatpush3.xpose.msk.msra.mxu0 %vm794_vm10, %v2786_v14 }
 0x8d2   : > { %12127 = vmatprep.subr.mxu0 %v12956_v13 }
 0x8d3   : > { %v2779_v29 = vpop.f32.mrb[26].mxu1 }
 0x8d4   : > { %v2780_v31 = vadd.f32 %v2779_v29, %v573_v28  ;;  %v12116_v32 = vpop.f32.mrb[27].mxu1  ;;  %12120 = vmatmul.mubr.msk.f32.vlgmr.msra.gmra.mrb[26].mxu0 %vm794_vm10, %v2784_v15  ;;  %v13477_v29 = vadd.f32 %v13226_v37, %v13184_v26 }
 0x8d5   : > { %12128 = vmatpush3.xpose.msk.msra.mxu0 %vm794_vm10, %v2942_v30  ;;  %12129 = vmatprep.mubr.msk.f32.mxu0 %vm12957_vm9, %v12956_v13 }
 0x8d6   : > { %v3017_v33 = vsel %vm794_vm10, %v2780_v31, -inf  ;;  %12137 = vmatprep.subr.mxu0 %v12956_v13 }
 0x8d7   : > { %3018 = vmax.xlane.f32.xlu1 %v3017_v33  ;;  %v2935_v35 = vpop.f32.mrb[28].mxu1 }
 0x8d8   : > { %v12126_v36 = vpop.f32.mrb[29].mxu1  ;;  %12130 = vmatmul.mubr.msk.f32.vlgmr.msra.gmra.mrb[28].mxu0 %vm794_vm10, %v2940_v34  ;;  %v2936_v3 = vadd.f32 %v2935_v35, %v573_v28 }
 0x8d9   : > { %12138 = vmatpush3.msra.mxu0 %v13301_v42  ;;  %12139 = vmatprep.mubr.msk.f32.mxu0 %vm12957_vm9, %v12956_v13 }
 0x8da   : > { %12147 = vmatprep.subr.mxu0 %v12956_v13  ;;  %v3023_v9 = vsel %vm794_vm10, %v2936_v3, -inf }
 0x903   : > { %v2251_v39 = vpop.f32.mrb[18].mxu0 }
 0x904   : > { %v12081_v40 = vpop.f32.mrb[19].mxu0  ;;  %v2255_v38 = vadd.f32 %v2251_v39, %v13358_v8 }
 0x964   : > { %v3019_v45 = vpop.xlane.xlu1 %3018 }
 0x965   : > { %v3029_v46 = vsub.f32 %v2780_v31, %v3019_v45 }
 0x967   : > { %v3033_v48 = vmul.f32 1.442695, %v3029_v46 }
 0x969   : > { %12755 = vpow2.f32 %v3033_v48 }
 0x973   : > { %v13454_v49 = vpop.eup %12755 }
 0x974   : > { %v3041_v53 = vsel %vm794_vm10, %v13454_v49, 0.0 }
 0x975   : > { %3042 = vadd.xlane.f32.xlu1 %v3041_v53 }
 0x998   : > { %v2401_v54 = vpop.f32.mrb[20].mxu0 }
 0x999   : > { %v2405_v56 = vadd.f32 %v2401_v54, %v2255_v38  ;;  %v12091_v57 = vpop.f32.mrb[21].mxu0 }
 0x99c   : > { %v2551_v58 = vpop.f32.mrb[22].mxu0 }
 0x99d   : > { %v2555_v59 = vadd.f32 %v2551_v58, %v2405_v56  ;;  %v12101_v60 = vpop.f32.mrb[23].mxu0 }
 0x9a0   : > { %v2701_v61 = vpop.f32.mrb[24].mxu0 }
 0x9a1   : > { %v13459_v62 = vadd.f32 %v2701_v61, %v2555_v59  ;;  %v12111_v63 = vpop.f32.mrb[25].mxu0 }
 0x9a7   : > { %v2857_v0 = vpop.f32.mrb[26].mxu0 }
 0x9a8   : > { %v2858_v1 = vadd.f32 %v2857_v0, %v573_v28  ;;  %v12121_v2 = vpop.f32.mrb[27].mxu0 }
 0x9aa   : > { %v3020_v4 = vsel %vm794_vm10, %v2858_v1, -inf }
 0x9ab   : > { %3021 = vmax.xlane.f32.xlu0 %v3020_v4  ;;  %v3013_v5 = vpop.f32.mrb[28].mxu0 }
 0x9ac   : > { %v12131_v6 = vpop.f32.mrb[29].mxu0  ;;  %v3014_v16 = vadd.f32 %v3013_v5, %v573_v28 }
 0x9ae   : > { %v3026_v10 = vsel %vm794_vm10, %v3014_v16, -inf }
 0x9af   : > { %3024 = vmax.xlane.f32.xlu0 %v3023_v9 }
 0x9b3   : > { %3027 = vmax.xlane.f32.xlu0 %v3026_v10 }
 0xa02   : > { %v3043_v26 = vpop.xlane.xlu1 %3042 }
 0xa38   : > { %v3022_v11 = vpop.xlane.xlu0 %3021 }
 0xa39   : > { %v3030_v12 = vsub.f32 %v2858_v1, %v3022_v11 }
 0xa3b   : > { %v3035_v14 = vmul.f32 1.442695, %v3030_v12 }
 0xa3c   : > { %v3025_v15 = vpop.xlane.xlu0 %3024 }
 0xa3d   : > { %12757 = vpow2.f32 %v3035_v14  ;;  %v3031_v17 = vsub.f32 %v2936_v3, %v3025_v15 }
 0xa3f   : > { %v3037_v18 = vmul.f32 1.442695, %v3031_v17 }
 0xa40   : > { %v3028_v19 = vpop.xlane.xlu0 %3027 }
 0xa41   : > { %12759 = vpow2.f32 %v3037_v18  ;;  %v3032_v20 = vsub.f32 %v3014_v16, %v3028_v19 }
 0xa43   : > { %v3039_v21 = vmul.f32 1.442695, %v3032_v20 }
 0xa45   : > { %12761 = vpow2.f32 %v3039_v21 }
 0xa46   : > { %12763 = vrcp.f32 %v3043_v26 }
 0xa47   : > { %v12758_v22 = vpop.eup %12757 }
 0xa48   : > { %v3044_v23 = vsel %vm794_vm10, %v12758_v22, 0.0 }
 0xa49   : > { %3045 = vadd.xlane.f32.xlu0 %v3044_v23 }
 0xa4b   : > { %v12760_v25 = vpop.eup %12759 }
 0xa4c   : > { %v3047_v52 = vsel %vm794_vm10, %v12760_v25, 0.0 }
 0xa4d   : > { %3048 = vadd.xlane.f32.xlu1 %v3047_v52 }
 0xa4f   : > { %v12762_v27 = vpop.eup %12761 }
 0xa50   : > { %v3050_v28 = vsel %vm794_vm10, %v12762_v27, 0.0  ;;  %v12764_v30 = vpop.eup %12763 }
 0xa51   : > { %3051 = vadd.xlane.f32.xlu0 %v3050_v28  ;;  %v3057_v33 = vmul.f32 %v12764_v30, %v13454_v49 }
 0xa5e   : > { %3061 = vrot.lane.b32.xlu1 %v13375_v41, %s15048_s27 }
 0xa62   : > { %3361 = vrot.lane.b32.xlu1 %v13375_v41, %s15047_s24 }
 0xa66   : > { %3511 = vrot.lane.b32.xlu1 %v13375_v41, %s15051_s20 }
 0xa67   : > { %3211 = vrot.lane.b32.xlu0 %v13375_v41, %s15055_s29 }
 0xa6a   : > { %3662 = vrot.lane.b32.xlu1 %v13477_v29, %s15049_s30 }
 0xa6b   : > { %3740 = vrot.lane.b32.xlu0 %v13477_v29, %s15052_s2 }
 0xa6e   : > { %3738 = vrot.lane.b32.xlu1 %v13477_v29, %s15050_s17 }
 0xa6f   : > { %3818 = vrot.lane.b32.xlu0 %v13477_v29, %s15053_s5 }
 0xa72   : > { %3816 = vrot.lane.b32.xlu1 %v13477_v29, %s15044_s26 }
 0xa73   : > { %3896 = vrot.lane.b32.xlu0 %v13477_v29, %s15054_s6 }
 0xa76   : > { %3894 = vrot.lane.b32.xlu1 %v13477_v29, %s15045_s0 }
 0xad6   : > { %v3046_v37 = vpop.xlane.xlu0 %3045 }
 0xad7   : > { %12765 = vrcp.f32 %v3046_v37 }
 0xada   : > { %v3049_v41 = vpop.xlane.xlu1 %3048 }
 0xadb   : > { %12767 = vrcp.f32 %v3049_v41 }
 0xade   : > { %v3062_v31 = vpop.permute.xlu1 %3061  ;;  %v3052_v32 = vpop.xlane.xlu0 %3051 }
 0xadf   : > { %12769 = vrcp.f32 %v3052_v32  ;;  %12133 = vmatpush3.msra.mxu1 %v3062_v31 }
 0xae0   : > { %12135 = vmatmul.mubr.msk.f32.vlgmr.msra.gmra.mrb[30].mxu1 %vm794_vm10, %v3057_v33  ;;  %12142 = vmatprep.subr.mxu1 %v12956_v13 }
 0xae1   : > { %v12766_v34 = vpop.eup %12765  ;;  %12144 = vmatprep.mubr.msk.f32.mxu1 %vm12957_vm9, %v12956_v13 }
 0xae2   : > { %v3362_v35 = vpop.permute.xlu1 %3361  ;;  %v3212_v36 = vpop.permute.xlu0 %3211  ;;  %v3058_v39 = vmul.f32 %v12766_v34, %v12758_v22 }
 0xae3   : > { %12143 = vmatpush3.msra.mxu1 %v3212_v36 }
 0xae4   : > { %12145 = vmatmul.mubr.msk.f32.vlgmr.msra.gmra.mrb[32].mxu1 %vm794_vm10, %v3058_v39  ;;  %12152 = vmatprep.subr.mxu1 %v12956_v13 }
 0xae5   : > { %v12768_v40 = vpop.eup %12767  ;;  %12153 = vmatpush3.msra.mxu1 %v3362_v35  ;;  %12154 = vmatprep.mubr.msk.f32.mxu1 %vm12957_vm9, %v12956_v13 }
 0xae6   : > { %v3512_v45 = vpop.permute.xlu1 %3511  ;;  %12162 = vmatprep.subr.mxu1 %v12956_v13  ;;  %v3059_v46 = vmul.f32 %v12768_v40, %v12760_v25  ;;  %v3741_v38 = vpop.permute.xlu0 %3740 }
 0xae8   : > { %12155 = vmatmul.mubr.msk.f32.vlgmr.msra.gmra.mrb[34].mxu1 %vm794_vm10, %v3059_v46 }
 0xae9   : > { %v12770_v48 = vpop.eup %12769  ;;  %12163 = vmatpush3.msra.mxu1 %v3512_v45  ;;  %12164 = vmatprep.mubr.msk.f32.mxu1 %vm12957_vm9, %v12956_v13 }
 0xaea   : > { %v3663_v49 = vpop.permute.xlu1 %3662  ;;  %v3060_v53 = vmul.f32 %v12770_v48, %v12762_v27  ;;  %12172 = vmatprep.subr.mxu1 %v12956_v13  ;;  %v3819_v56 = vpop.permute.xlu0 %3818 }
 0xaec   : > { %12165 = vmatmul.mubr.msk.f32.vlgmr.msra.gmra.mrb[36].mxu1 %vm794_vm10, %v3060_v53  ;;  %v12883_v53 = vld [vmem:[%s13108_s25] sm:$0xff] }
 0xaed   : > { %12174 = vmatprep.mubr.msk.f32.mxu1 %vm12957_vm9, %v12956_v13 }
 0xaee   : > { %v3739_v54 = vpop.permute.xlu1 %3738  ;;  %v3897_v4 = vpop.permute.xlu0 %3896 }
 0xaf0   : > { %12173 = vmatpush3.xpose.msk.msra.mxu1 %vm794_vm10, %v3663_v49 }
 0xaf1   : > { %12182 = vmatprep.subr.mxu1 %v12956_v13 }
 0xaf2   : > { %v3817_v57 = vpop.permute.xlu1 %3816 }
 0xaf3   : > { %12175 = vmatmul.mubr.msk.f32.vlgmr.msra.gmra.mrb[38].mxu1 %vm794_vm10, %v13477_v29 }
 0xaf4   : > { %12183 = vmatpush3.xpose.msk.msra.mxu1 %vm794_vm10, %v3819_v56  ;;  %12184 = vmatprep.mubr.msk.f32.mxu1 %vm12957_vm9, %v12956_v13 }
 0xaf5   : > { %12192 = vmatprep.subr.mxu1 %v12956_v13 }
 0xaf6   : > { %v3895_v16 = vpop.permute.xlu1 %3894 }
 0xaf7   : > { %12185 = vmatmul.mubr.msk.f32.vlgmr.msra.gmra.mrb[40].mxu1 %vm794_vm10, %v3817_v57 }
 0xaf8   : > { %12194 = vmatprep.mubr.msk.f32.mxu1 %vm12957_vm9, %v12956_v13 }
 0xbb3   : > { %v3133_v58 = vpop.f32.mrb[30].mxu1 }
 0xbb4   : > { %v12136_v59 = vpop.f32.mrb[31].mxu1  ;;  %12140 = vmatmul.mubr.msk.f32.vlgmr.msra.gmra.mrb[30].mxu0 %vm794_vm10, %v3133_v58 }
 0xbb5   : > { %12148 = vmatpush3.msra.mxu0 %v13308_v43  ;;  %12149 = vmatprep.mubr.msk.f32.mxu0 %vm12957_vm9, %v12956_v13 }
 0xbb6   : > { %12157 = vmatprep.subr.mxu0 %v12956_v13 }
 0xbb7   : > { %v3283_v60 = vpop.f32.mrb[32].mxu1 }
 0xbb8   : > { %v12146_v61 = vpop.f32.mrb[33].mxu1  ;;  %12150 = vmatmul.mubr.msk.f32.vlgmr.msra.gmra.mrb[32].mxu0 %vm794_vm10, %v3283_v60 }
 0xbb9   : > { %12158 = vmatpush3.msra.mxu0 %v13318_v47  ;;  %12159 = vmatprep.mubr.msk.f32.mxu0 %vm12957_vm9, %v12956_v13  ;;  %v574_v47 = vld [vmem:[%s13234_s23 + $0x18] sm:$0xff] }
 0xbba   : > { %12167 = vmatprep.subr.mxu0 %v12956_v13 }
 0xbbb   : > { %v3433_v63 = vpop.f32.mrb[34].mxu1 }
 0xbbc   : > { %v12156_v0 = vpop.f32.mrb[35].mxu1  ;;  %12160 = vmatmul.mubr.msk.f32.vlgmr.msra.gmra.mrb[34].mxu0 %vm794_vm10, %v3433_v63 }
 0xbbd   : > { %12168 = vmatpush3.msra.mxu0 %v13328_v51  ;;  %12169 = vmatprep.mubr.msk.f32.mxu0 %vm12957_vm9, %v12956_v13 }
 0xbbe   : > { %12177 = vmatprep.subr.mxu0 %v12956_v13 }
 0xbbf   : > { %v3583_v1 = vpop.f32.mrb[36].mxu1 }
 0xbc0   : > { %v12166_v2 = vpop.f32.mrb[37].mxu1  ;;  %12170 = vmatmul.mubr.msk.f32.vlgmr.msra.gmra.mrb[36].mxu0 %vm794_vm10, %v3583_v1 }
 0xbc1   : > { %12179 = vmatprep.mubr.msk.f32.mxu0 %vm12957_vm9, %v12956_v13 }
 0xbc4   : > { %12178 = vmatpush3.xpose.msk.msra.mxu0 %vm794_vm10, %v3741_v38  ;;  %v13569_v38 = vadd.f32 %v12883_v53, %v13361_v24 }
 0xbc5   : > { %12187 = vmatprep.subr.mxu0 %v12956_v13 }
 0xbc6   : > { %v3734_v3 = vpop.f32.mrb[38].mxu1 }
 0xbc7   : > { %v3735_v51 = vadd.f32 %v3734_v3, %v574_v47  ;;  %v12176_v5 = vpop.f32.mrb[39].mxu1  ;;  %12180 = vmatmul.mubr.msk.f32.vlgmr.msra.gmra.mrb[38].mxu0 %vm794_vm10, %v3739_v54  ;;  %v4620_v54 = vsel %vm581_vm0, %v13569_v38, 0.0 }
 0xbc8   : > { %12188 = vmatpush3.xpose.msk.msra.mxu0 %vm794_vm10, %v3897_v4  ;;  %12189 = vmatprep.mubr.msk.f32.mxu0 %vm12957_vm9, %v12956_v13 }
 0xbc9   : > { %v3972_v6 = vsel %vm794_vm10, %v3735_v51, -inf  ;;  %12197 = vmatprep.subr.mxu0 %v12956_v13 }
 0xbca   : > { %3973 = vmax.xlane.f32.xlu0 %v3972_v6  ;;  %v3890_v9 = vpop.f32.mrb[40].mxu1 }
 0xbcb   : > { %v3891_v10 = vadd.f32 %v3890_v9, %v574_v47  ;;  %v12186_v11 = vpop.f32.mrb[41].mxu1  ;;  %12190 = vmatmul.mubr.msk.f32.vlgmr.msra.gmra.mrb[40].mxu0 %vm794_vm10, %v3895_v16 }
 0xbcc   : > { %12198 = vmatpush3.msra.mxu0 %v13301_v42  ;;  %12199 = vmatprep.mubr.msk.f32.mxu0 %vm12957_vm9, %v12956_v13 }
 0xbcd   : > { %v3978_v12 = vsel %vm794_vm10, %v3891_v10, -inf  ;;  %12207 = vmatprep.subr.mxu0 %v12956_v13 }
 0xbce   : > { %3979 = vmax.xlane.f32.xlu0 %v3978_v12 }
 0xc57   : > { %v3974_v18 = vpop.xlane.xlu0 %3973 }
 0xc58   : > { %v3984_v23 = vsub.f32 %v3735_v51, %v3974_v18 }
 0xc5a   : > { %v3988_v28 = vmul.f32 1.442695, %v3984_v23 }
 0xc5b   : > { %v3980_v52 = vpop.xlane.xlu0 %3979 }
 0xc5c   : > { %v3986_v26 = vsub.f32 %v3891_v10, %v3980_v52  ;;  %12771 = vpow2.f32 %v3988_v28  ;;  %v12884_v10 = vld [vmem:[%s13108_s25 + $0x8] sm:$0xff] }
 0xc5d   : > { %v13585_v11 = vadd.f32 %v12884_v10, %v13459_v62 }
 0xc5e   : > { %v3992_v30 = vmul.f32 1.442695, %v3986_v26 }
 0xc60   : > { %12773 = vpow2.f32 %v3992_v30  ;;  %v12885_v30 = vld [vmem:[%s13108_s25 + $0x10] sm:$0xff] }
 0xc66   : > { %v12772_v45 = vpop.eup %12771 }
 0xc67   : > { %v3996_v46 = vsel %vm794_vm10, %v12772_v45, 0.0 }
 0xc6a   : > { %v12774_v48 = vpop.eup %12773 }
 0xc6b   : > { %v4002_v49 = vsel %vm794_vm10, %v12774_v48, 0.0 }
 0xc87   : > { %v3206_v14 = vpop.f32.mrb[30].mxu0 }
 0xc88   : > { %v12141_v15 = vpop.f32.mrb[31].mxu0  ;;  %v3210_v17 = vadd.f32 %v3206_v14, %v13358_v8 }
 0xc89   : > { %v4623_v15 = vsel %vm581_vm0, %v13585_v11, 0.0 }
 0xc8b   : > { %v3356_v19 = vpop.f32.mrb[32].mxu0 }
 0xc8c   : > { %v3360_v20 = vadd.f32 %v3356_v19, %v3210_v17  ;;  %v12151_v21 = vpop.f32.mrb[33].mxu0 }
 0xc8f   : > { %v3506_v22 = vpop.f32.mrb[34].mxu0 }
 0xc90   : > { %v3510_v25 = vadd.f32 %v3506_v22, %v3360_v20  ;;  %v12161_v42 = vpop.f32.mrb[35].mxu0 }
 0xc93   : > { %v3656_v27 = vpop.f32.mrb[36].mxu0 }
 0xc94   : > { %v13555_v37 = vadd.f32 %v3656_v27, %v3510_v25  ;;  %v12171_v41 = vpop.f32.mrb[37].mxu0 }
 0xc9a   : > { %v3812_v31 = vpop.f32.mrb[38].mxu0 }
 0xc9b   : > { %v3813_v32 = vadd.f32 %v3812_v31, %v574_v47  ;;  %v12181_v33 = vpop.f32.mrb[39].mxu0  ;;  %v13605_v31 = vadd.f32 %v12885_v30, %v13555_v37  ;;  %v13611_v37 = vsub.s32 2, %v13150_v44  ;;  %v4824_v30 = vld [vmem:[%s14986_s9 + $0x18] sm:$0xff] }
 0xc9d   : > { %v3975_v34 = vsel %vm794_vm10, %v3813_v32, -inf  ;;  %v4626_v33 = vsel %vm581_vm0, %v13605_v31, 0.0 }
 0xc9e   : > { %3976 = vmax.xlane.f32.xlu1 %v3975_v34  ;;  %v3968_v35 = vpop.f32.mrb[40].mxu0 }
 0xc9f   : > { %v3969_v36 = vadd.f32 %v3968_v35, %v574_v47  ;;  %v12191_v39 = vpop.f32.mrb[41].mxu0 }
 0xca1   : > { %v3981_v40 = vsel %vm794_vm10, %v3969_v36, -inf }
 0xca2   : > { %3982 = vmax.xlane.f32.xlu0 %v3981_v40 }
 0xca6   : > { %3997 = vadd.xlane.f32.xlu0 %v3996_v46 }
 0xcaa   : > { %4003 = vadd.xlane.f32.xlu0 %v4002_v49  ;;  %v13621_v49 = vld [vmem:[%s14981_s4] sm:$0xff] }
 0xcab   : > { %v13625_v53 = vrot.slane %v13621_v49, %v13611_v37 }
 0xcaf   : > { %4166 = vrot.lane.b32.xlu1 %v13477_v29, %s15055_s29  ;;  %s11537_s29 = sshll.u32 %s13074_s22, 9 }
 0xcb3   : > { %4316 = vrot.lane.b32.xlu1 %v13477_v29, %s15047_s24  ;;  %s13778_s24 = scalar_lea.vmem %s14980_s3, %s13102_s16 }
 0xcc0   : > { %4016 = vrot.lane.b32.xlu0 %v13477_v29, %s15048_s27 }
 0xcdf   : > { %4621 = vadd.xlane.f32.xlu0 %v4620_v54  ;;  %v13628_v54 = vsub.s32 3, %v13150_v44 }
 0xd2b   : > { %v3977_v56 = vpop.xlane.xlu1 %3976 }
 0xd2c   : > { %v3985_v57 = vsub.f32 %v3813_v32, %v3977_v56 }
 0xd2e   : > { %v3990_v58 = vmul.f32 1.442695, %v3985_v57 }
 0xd2f   : > { %v3983_v59 = vpop.xlane.xlu0 %3982  ;;  %v4167_v5 = vpop.permute.xlu1 %4166 }
 0xd30   : > { %12775 = vpow2.f32 %v3990_v58  ;;  %v3987_v60 = vsub.f32 %v3969_v36, %v3983_v59 }
 0xd32   : > { %v3994_v61 = vmul.f32 1.442695, %v3987_v60  ;;  %v4716_v60 = vld [vmem:[%s15056_s8] sm:$0xff] }
 0xd33   : > { %v3998_v63 = vpop.xlane.xlu0 %3997  ;;  %v4317_v17 = vpop.permute.xlu1 %4316 }
 0xd34   : > { %12777 = vpow2.f32 %v3994_v61  ;;  %v4717_v61 = vld [vmem:[%s15056_s8 + $0x8] sm:$0xff] }
 0xd35   : > { %12779 = vrcp.f32 %v3998_v63  ;;  %v12508_v63 = vpack.c.bf16 %v4717_v61, %v4716_v60 }
 0xd37   : > { %v4004_v0 = vpop.xlane.xlu0 %4003 }
 0xd3a   : > { %v12776_v1 = vpop.eup %12775 }
 0xd3b   : > { %v4017_v2 = vpop.permute.xlu0 %4016  ;;  %v3999_v24 = vsel %vm794_vm10, %v12776_v1, 0.0 }
 0xd3c   : > { %4000 = vadd.xlane.f32.xlu1 %v3999_v24  ;;  %12193 = vmatpush3.msra.mxu1 %v4017_v2 }
 0xd3d   : > { %12202 = vmatprep.subr.mxu1 %v12956_v13 }
 0xd3e   : > { %v12778_v47 = vpop.eup %12777 }
 0xd3f   : > { %v12780_v3 = vpop.eup %12779  ;;  %v4005_v4 = vsel %vm794_vm10, %v12778_v47, 0.0 }
 0xd40   : > { %v4012_v51 = vmul.f32 %v12780_v3, %v12772_v45  ;;  %4006 = vadd.xlane.f32.xlu1 %v4005_v4 }
 0xd42   : > { %12195 = vmatmul.mubr.msk.f32.vlgmr.msra.gmra.mrb[42].mxu1 %vm794_vm10, %v4012_v51 }
 0xd43   : > { %12203 = vmatpush3.msra.mxu1 %v4167_v5  ;;  %12204 = vmatprep.mubr.msk.f32.mxu1 %vm12957_vm9, %v12956_v13 }
 0xd44   : > { %12212 = vmatprep.subr.mxu1 %v12956_v13 }
 0xd51   : > { %4466 = vrot.lane.b32.xlu1 %v13477_v29, %s15051_s20  ;;  %s14928_s20 = scalar_lea.hbm %s15058_s21, %s11537_s29 }
 0xd6c   : > { %v4622_v6 = vpop.xlane.xlu0 %4621 }
 0xd6d   : > { %v4632_v16 = vmul.f32 0.03125, %v4622_v6 }
 0xd6f   : > { %v4636_v9 = vsub.f32 %v13569_v38, %v4632_v16 }
 0xd71   : > { %v4640_v12 = vmul.f32 %v4636_v9, %v4636_v9  ;;  %v4692_v56 = vmul.f32 %v13625_v53, %v4636_v9 }
 0xd73   : > { %v4644_v14 = vsel %vm581_vm0, %v4640_v12, 0.0 }
 0xd74   : > { %4645 = vadd.xlane.f32.xlu0 %v4644_v14 }
 0xd75   : > { %4624 = vadd.xlane.f32.xlu1 %v4623_v15 }
 0xdc9   : > { %v4001_v18 = vpop.xlane.xlu1 %4000 }
 0xdca   : > { %12781 = vrcp.f32 %v4001_v18 }
 0xdcb   : > { %12783 = vrcp.f32 %v4004_v0  ;;  %v4718_v0 = vld [vmem:[%s15056_s8 + $0x10] sm:$0xff] }
 0xdcd   : > { %v4007_v29 = vpop.xlane.xlu1 %4006 }
 0xdce   : > { %12785 = vrcp.f32 %v4007_v29  ;;  %v12887_v29 = vld [vmem:[%s15046_s7 + $0x10] sm:$0xff] }
 0xdd1   : > { %v4467_v23 = vpop.permute.xlu1 %4466 }
 0xdd4   : > { %v12782_v19 = vpop.eup %12781 }
 0xdd5   : > { %v4013_v20 = vmul.f32 %v12782_v19, %v12776_v1  ;;  %v12784_v21 = vpop.eup %12783  ;;  %v4719_v1 = vld [vmem:[%s15056_s8 + $0x18] sm:$0xff]  ;;  %s15059_s8 = smov %s15058_s21 }
 0xdd6   : > { %v4014_v62 = vmul.f32 %v12784_v21, %v12774_v48  ;;  %v12512_v2 = vpack.c.bf16 %v4719_v1, %v4718_v0  ;;  %v12888_v21 = vld [vmem:[%s15046_s7 + $0x18] sm:$0xff]  ;;  %s13687_s7 = scalar_lea.vmem %s14978_s1, %s13102_s16 }
 0xdd7   : > { %12205 = vmatmul.mubr.msk.f32.vlgmr.msra.gmra.mrb[44].mxu1 %vm794_vm10, %v4013_v20 }
 0xdd8   : > { %12213 = vmatpush3.msra.mxu1 %v4317_v17  ;;  %12214 = vmatprep.mubr.msk.f32.mxu1 %vm12957_vm9, %v12956_v13  ;;  %v12786_v22 = vpop.eup %12785 }
 0xdd9   : > { %12222 = vmatprep.subr.mxu1 %v12956_v13  ;;  %v4015_v25 = vmul.f32 %v12786_v22, %v12778_v47 }
 0xddb   : > { %12215 = vmatmul.mubr.msk.f32.vlgmr.msra.gmra.mrb[46].mxu1 %vm794_vm10, %v4014_v62 }
 0xddc   : > { %12223 = vmatpush3.msra.mxu1 %v4467_v23  ;;  %12224 = vmatprep.mubr.msk.f32.mxu1 %vm12957_vm9, %v12956_v13 }
 0xddd   : > { %12509 = vmatprep.subr.bf16.mxu1 %v12508_v63 }
 0xddf   : > { %12225 = vmatmul.mubr.msk.f32.vlgmr.msra.gmra.mrb[48].mxu1 %vm794_vm10, %v4015_v25 }
 0xde0   : > { %12511 = vmatpush3.bf16.msra.mxu1 %v12508_v63 }
 0xde1   : > { %12513 = vmatprep.subr.bf16.mxu1 %v12512_v2 }
 0xde4   : > { %12515 = vmatpush3.bf16.msra.mxu1 %v12512_v2 }
 0xde5   : > { %12260 = vmatprep.subr.mxu1 %v12956_v13 }
 0xe01   : > { %v4646_v42 = vpop.xlane.xlu0 %4645 }
 0xe02   : > { %v4656_v52 = vmul.f32 0.032258064, %v4646_v42  ;;  %v4625_v27 = vpop.xlane.xlu1 %4624 }
 0xe03   : > { %v4633_v28 = vmul.f32 0.03125, %v4625_v27  ;;  %v4821_v27 = vld [vmem:[%s14986_s9] sm:$0xff] }
 0xe04   : > { %12787 = vrsqrt.f32 %v4656_v52  ;;  %vm4662_vm11 = vcmp.eq.f32.partialorder %v4656_v52, inf  ;;  %v4665_v36 = vand.u32 2147483648, %v4656_v52  ;;  %vm4664_vm12 = vcmp.eq.f32.partialorder %v4656_v52, 0.0 }
 0xe05   : > { %v13599_v26 = vsub.f32 %v13585_v11, %v4633_v28  ;;  %v4822_v28 = vld [vmem:[%s14986_s9 + $0x8] sm:$0xff] }
 0xe07   : > { %v4641_v41 = vmul.f32 %v13599_v26, %v13599_v26  ;;  %v4693_v23 = vmul.f32 %v13625_v53, %v13599_v26  ;;  %v12516_v26 = vpack.c.bf16 %v4822_v28, %v4821_v27 }
 0xe09   : > { %v4647_v32 = vsel %vm581_vm0, %v4641_v41, 0.0  ;;  %v4823_v41 = vld [vmem:[%s14986_s9 + $0x10] sm:$0xff] }
 0xe0a   : > { %4648 = vadd.xlane.f32.xlu0 %v4647_v32  ;;  %v567_v32 = vld [vmem:[%s13687_s7] sm:$0xff] }
 0xe0e   : > { %v12788_v34 = vpop.eup %12787  ;;  %4627 = vadd.xlane.f32.xlu0 %v4626_v33  ;;  %v12520_v33 = vpack.c.bf16 %v4824_v30, %v4823_v41 }
 0xe0f   : > { %v4661_v35 = vmul.f32 %v12788_v34, %v4656_v52  ;;  %v568_v34 = vld [vmem:[%s13687_s7 + $0x8] sm:$0xff] }
 0xe11   : > { %v4663_v39 = vsel %vm4662_vm11, %v4656_v52, %v4661_v35 }
 0xe12   : > { %v4666_v40 = vsel %vm4664_vm12, %v4665_v36, %v4663_v39 }
 0xe13   : > { %v4696_v45 = vadd.f32 1e-06, %v4666_v40 }
 0xe15   : > { %v4088_v46 = vpop.f32.mrb[42].mxu1  ;;  %12789 = vrcp.f32 %v4696_v45 }
 0xe16   : > { %v12196_v48 = vpop.f32.mrb[43].mxu1  ;;  %12200 = vmatmul.mubr.msk.f32.vlgmr.msra.gmra.mrb[42].mxu0 %vm794_vm10, %v4088_v46 }
 0xe17   : > { %12208 = vmatpush3.msra.mxu0 %v13308_v43  ;;  %12209 = vmatprep.mubr.msk.f32.mxu0 %vm12957_vm9, %v12956_v13  ;;  %v13633_v43 = vrot.slane %v13621_v49, %v13628_v54 }
 0xe18   : > { %12217 = vmatprep.subr.mxu0 %v12956_v13 }
 0xe1f   : > { %v12790_v57 = vpop.eup %12789 }
 0xe20   : > { %v4704_v58 = vmul.f32 %v12790_v57, %v4692_v56 }
 0xe22   : > { %v4712_v59 = vadd.f32 %v13633_v43, %v4704_v58 }
 0xe24   : > { %12240 = vmatprep.mubr.msk.f32.mxu1 %vm581_vm0, %v4712_v59 }
 0xe97   : > { %v4649_v24 = vpop.xlane.xlu0 %4648 }
 0xe98   : > { %v4657_v47 = vmul.f32 0.032258064, %v4649_v24 }
 0xe9a   : > { %12791 = vrsqrt.f32 %v4657_v47  ;;  %vm4669_vm13 = vcmp.eq.f32.partialorder %v4657_v47, inf  ;;  %v4672_v10 = vand.u32 2147483648, %v4657_v47  ;;  %vm4671_vm14 = vcmp.eq.f32.partialorder %v4657_v47, 0.0 }
 0xe9b   : > { %v4628_v3 = vpop.xlane.xlu0 %4627 }
 0xe9c   : > { %v4634_v4 = vmul.f32 0.03125, %v4628_v3 }
 0xe9e   : > { %v13651_v51 = vsub.f32 %v13605_v31, %v4634_v4 }
 0xea0   : > { %v4642_v5 = vmul.f32 %v13651_v51, %v13651_v51  ;;  %v4694_v59 = vmul.f32 %v13625_v53, %v13651_v51 }
 0xea2   : > { %v4650_v6 = vsel %vm581_vm0, %v4642_v5, 0.0 }
 0xea3   : > { %4651 = vadd.xlane.f32.xlu0 %v4650_v6 }
 0xea4   : > { %v12792_v16 = vpop.eup %12791 }
 0xea5   : > { %v4668_v9 = vmul.f32 %v12792_v16, %v4657_v47 }
 0xea7   : > { %v4670_v12 = vsel %vm4669_vm13, %v4657_v47, %v4668_v9  ;;  %v12889_v9 = vld [vmem:[%s13108_s25 + $0x18] sm:$0xff] }
 0xea8   : > { %v4673_v14 = vsel %vm4671_vm14, %v4672_v10, %v4670_v12 }
 0xea9   : > { %v4697_v15 = vadd.f32 1e-06, %v4673_v14  ;;  %v13712_v14 = vld [vmem:[%s14987_s10] ss:$0 sm:$0xff] }
 0xeaa   : > { %v4238_v17 = vpop.f32.mrb[44].mxu1 }
 0xeab   : > { %12793 = vrcp.f32 %v4697_v15  ;;  %v12206_v18 = vpop.f32.mrb[45].mxu1  ;;  %12210 = vmatmul.mubr.msk.f32.vlgmr.msra.gmra.mrb[44].mxu0 %vm794_vm10, %v4238_v17 }
 0xeac   : > { %12218 = vmatpush3.msra.mxu0 %v12887_v29  ;;  %12219 = vmatprep.mubr.msk.f32.mxu0 %vm12957_vm9, %v12956_v13  ;;  %v569_v29 = vld [vmem:[%s13687_s7 + $0x10] sm:$0xff] }
 0xead   : > { %12227 = vmatprep.subr.mxu0 %v12956_v13 }
 0xeae   : > { %v4388_v19 = vpop.f32.mrb[46].mxu1 }
 0xeaf   : > { %v12216_v20 = vpop.f32.mrb[47].mxu1  ;;  %12220 = vmatmul.mubr.msk.f32.vlgmr.msra.gmra.mrb[46].mxu0 %vm794_vm10, %v4388_v19 }
 0xeb0   : > { %12228 = vmatpush3.msra.mxu0 %v12888_v21  ;;  %12229 = vmatprep.mubr.msk.f32.mxu0 %vm12957_vm9, %v12956_v13 }
 0xeb1   : > { %12517 = vmatprep.subr.bf16.mxu0 %v12516_v26 }
 0xeb2   : > { %v4538_v62 = vpop.f32.mrb[48].mxu1 }
 0xeb3   : > { %v12226_v22 = vpop.f32.mrb[49].mxu1  ;;  %12230 = vmatmul.mubr.msk.f32.vlgmr.msra.gmra.mrb[48].mxu0 %vm794_vm10, %v4538_v62 }
 0xeb4   : > { %12254 = vmatprep.mubr.msk.f32.mxu0 %vm581_vm0, %v567_v32  ;;  %12519 = vmatpush3.bf16.msra.mxu0 %v12516_v26 }
 0xeb5   : > { %v12794_v25 = vpop.eup %12793  ;;  %12521 = vmatprep.subr.bf16.mxu0 %v12520_v33 }
 0xeb6   : > { %v4705_v42 = vmul.f32 %v12794_v25, %v4693_v23  ;;  %v13731_v23 = vsub.s32 7, %v13150_v44 }
 0xeb8   : > { %v4713_v52 = vadd.f32 %v13633_v43, %v4705_v42  ;;  %12523 = vmatpush3.bf16.msra.mxu0 %v12520_v33  ;;  %v13735_v25 = vrot.slane %v13621_v49, %v13731_v23 }
 0xeb9   : > { %12265 = vmatprep.subr.mxu0 %v12956_v13 }
 0xeba   : > { %12241 = vmatmul.mubr.msk.f32.vlgmr.msra.gmra.mrb[50].mxu1 %vm581_vm0, %v4713_v52  ;;  %v570_v52 = vld [vmem:[%s13687_s7 + $0x18] sm:$0xff] }
 0xebb   : > { %12255 = vmatmul.mubr.msk.f32.vlgmr.msra.gmra.mrb[50].mxu0 %vm581_vm0, %v568_v34 }
 0xebc   : > { %12257 = vmatprep.mubr.msk.f32.mxu0 %vm581_vm0, %v569_v29 }
 0xebf   : > { %12258 = vmatmul.mubr.msk.f32.gmra.mrb[52].mxu0 %vm581_vm0, %v570_v52 }
 0xec0   : > { %12267 = vmatprep.mubr.msk.f32.mxu0 %vm12957_vm9, %v12956_v13 }
 0xee9   : > { %v4161_v35 = vpop.f32.mrb[42].mxu0 }
 0xeea   : > { %v12201_v36 = vpop.f32.mrb[43].mxu0  ;;  %v4165_v0 = vadd.f32 %v4161_v35, %v13358_v8 }
 0xf30   : > { %v4652_v39 = vpop.xlane.xlu0 %4651 }
 0xf31   : > { %v4658_v40 = vmul.f32 0.032258064, %v4652_v39 }
 0xf33   : > { %12795 = vrsqrt.f32 %v4658_v40  ;;  %vm4676_vm15 = vcmp.eq.f32.partialorder %v4658_v40, inf  ;;  %v4679_v48 = vand.u32 2147483648, %v4658_v40  ;;  %vm4678_vm1 = vcmp.eq.f32.partialorder %v4658_v40, 0.0 }
 0xf3d   : > { %v12796_v45 = vpop.eup %12795 }
 0xf3e   : > { %v4675_v46 = vmul.f32 %v12796_v45, %v4658_v40 }
 0xf40   : > { %v4677_v56 = vsel %vm4676_vm15, %v4658_v40, %v4675_v46 }
 0xf41   : > { %v4680_v57 = vsel %vm4678_vm1, %v4679_v48, %v4677_v56 }
 0xf42   : > { %v4698_v58 = vadd.f32 1e-06, %v4680_v57 }
 0xf44   : > { %12797 = vrcp.f32 %v4698_v58  ;;  %v575_v58 = vld [vmem:[%s13778_s24] sm:$0xff] }
 0xf4e   : > { %v12798_v60 = vpop.eup %12797 }
 0xf4f   : > { %v4706_v61 = vmul.f32 %v12798_v60, %v4694_v59 }
 0xf51   : > { %v4714_v63 = vadd.f32 %v13633_v43, %v4706_v61 }
 0xf53   : > { %12243 = vmatprep.mubr.msk.f32.mxu1 %vm581_vm0, %v4714_v63 }
 0xf7e   : > { %v4311_v1 = vpop.f32.mrb[44].mxu0 }
 0xf7f   : > { %v4315_v2 = vadd.f32 %v4311_v1, %v4165_v0  ;;  %v12211_v24 = vpop.f32.mrb[45].mxu0 }
 0xf82   : > { %v4461_v47 = vpop.f32.mrb[46].mxu0 }
 0xf83   : > { %v4465_v3 = vadd.f32 %v4461_v47, %v4315_v2  ;;  %v12221_v4 = vpop.f32.mrb[47].mxu0 }
 0xf86   : > { %v4611_v5 = vpop.f32.mrb[48].mxu0 }
 0xf87   : > { %v4615_v6 = vadd.f32 %v4611_v5, %v4465_v3  ;;  %v12231_v16 = vpop.f32.mrb[49].mxu0 }
 0xf89   : > { %v13703_v51 = vadd.f32 %v12889_v9, %v4615_v6 }
 0xf8b   : > { %v4629_v10 = vsel %vm581_vm0, %v13703_v51, 0.0 }
 0xf8c   : > { %4630 = vadd.xlane.f32.xlu1 %v4629_v10 }
 0xf8d   : > { %v13707_v12 = vpop.f32.mrb[50].mxu1 }
 0xf8e   : > { %v4802_v8 = vpop.f32.mrb[51].mxu1  ;;  %v13714_v15 = vpop.f32.mrb[50].mxu0 }
 0xf8f   : > { %v4910_v17 = vpop.f32.mrb[51].mxu0  ;;  %v4803_v42 = vadd.f32 %v4802_v8, %v13735_v25 }
 0xf90   : > { %v13717_v18 = vadd.f32 %v13712_v14, %v4910_v17 }
 0xf92   : > { %5011 = vrot.lane.b32.xlu0 %v13717_v18, %s15050_s17  ;;  %12261 = vmatpush3.xpose.msk.msra.mxu1 %vm794_vm10, %v13717_v18 }
 0xf93   : > { %12270 = vmatprep.subr.mxu1 %v12956_v13 }
 0xf96   : > { %5167 = vrot.lane.b32.xlu0 %v13717_v18, %s15045_s0 }
0x1004   : > { %v5012_v27 = vpop.permute.xlu0 %5011 }
0x1005   : > { %12266 = vmatpush3.xpose.msk.msra.mxu0 %vm794_vm10, %v5012_v27 }
0x1006   : > { %12275 = vmatprep.subr.mxu0 %v12956_v13 }
0x1008   : > { %v5168_v41 = vpop.permute.xlu0 %5167 }
0x1019   : > { %v4631_v19 = vpop.xlane.xlu1 %4630 }
0x101a   : > { %v4635_v20 = vmul.f32 0.03125, %v4631_v19 }
0x101c   : > { %v4639_v21 = vsub.f32 %v13703_v51, %v4635_v20 }
0x101e   : > { %v4643_v62 = vmul.f32 %v4639_v21, %v4639_v21  ;;  %v4695_v46 = vmul.f32 %v13625_v53, %v4639_v21  ;;  %v13770_v53 = vpop.f32.mrb[52].mxu0 }
0x1020   : > { %v4653_v22 = vsel %vm581_vm0, %v4643_v62, 0.0 }
0x1021   : > { %4654 = vadd.xlane.f32.xlu1 %v4653_v22 }
0x1032   : > { %5009 = vrot.lane.b32.xlu1 %v4803_v42, %s15050_s17 }
0x1036   : > { %5089 = vrot.lane.b32.xlu1 %v13717_v18, %s15044_s26 }
0x103a   : > { %5087 = vrot.lane.b32.xlu1 %v4803_v42, %s15044_s26 }
0x103e   : > { %5165 = vrot.lane.b32.xlu1 %v4803_v42, %s15045_s0 }
0x10ae   : > { %v4655_v49 = vpop.xlane.xlu1 %4654 }
0x10af   : > { %v4659_v28 = vmul.f32 0.032258064, %v4655_v49 }
0x10b1   : > { %12799 = vrsqrt.f32 %v4659_v28  ;;  %vm4683_vm2 = vcmp.eq.f32.partialorder %v4659_v28, inf  ;;  %v4686_v35 = vand.u32 2147483648, %v4659_v28  ;;  %vm4685_vm3 = vcmp.eq.f32.partialorder %v4659_v28, 0.0 }
0x10b2   : > { %v5010_v26 = vpop.permute.xlu1 %5009 }
0x10b3   : > { %12268 = vmatmul.mubr.msk.f32.vlgmr.msra.gmra.mrb[54].mxu0 %vm794_vm10, %v5010_v26 }
0x10b4   : > { %12276 = vmatpush3.xpose.msk.msra.mxu0 %vm794_vm10, %v5168_v41  ;;  %12277 = vmatprep.mubr.msk.f32.mxu0 %vm12957_vm9, %v12956_v13 }
0x10b5   : > { %12285 = vmatprep.subr.mxu0 %v12956_v13 }
0x10b6   : > { %v5090_v30 = vpop.permute.xlu1 %5089 }
0x10ba   : > { %v5088_v32 = vpop.permute.xlu1 %5087 }
0x10bb   : > { %v12800_v33 = vpop.eup %12799 }
0x10bc   : > { %v4682_v34 = vmul.f32 %v12800_v33, %v4659_v28 }
0x10be   : > { %v4684_v36 = vsel %vm4683_vm2, %v4659_v28, %v4682_v34  ;;  %v5166_v39 = vpop.permute.xlu1 %5165 }
0x10bf   : > { %v4687_v40 = vsel %vm4685_vm3, %v4686_v35, %v4684_v36  ;;  %12278 = vmatmul.mubr.msk.f32.vlgmr.msra.gmra.mrb[56].mxu0 %vm794_vm10, %v5166_v39 }
0x10c0   : > { %v4699_v45 = vadd.f32 1e-06, %v4687_v40  ;;  %12287 = vmatprep.mubr.msk.f32.mxu0 %vm12957_vm9, %v12956_v13  ;;  %v13799_v40 = vadd.f32 %v13714_v15, %v13712_v14 }
0x10c2   : > { %12801 = vrcp.f32 %v4699_v45  ;;  %v4808_v45 = vadd.f32 %v13707_v12, %v13735_v25 }
0x10cc   : > { %v12802_v48 = vpop.eup %12801 }
0x10cd   : > { %v4707_v56 = vmul.f32 %v12802_v48, %v4695_v46 }
0x10cf   : > { %v4715_v57 = vadd.f32 %v13633_v43, %v4707_v56  ;;  %v13772_v43 = vpop.f32.mrb[53].mxu0 }
0x10d1   : > { %12244 = vmatmul.mubr.msk.f32.gmra.mrb[52].mxu1 %vm581_vm0, %v4715_v57 }
0x10d2   : > { %12262 = vmatprep.mubr.msk.f32.mxu1 %vm12957_vm9, %v12956_v13 }
0x10d5   : > { %12263 = vmatmul.mubr.msk.f32.vlgmr.msra.gmra.mrb[54].mxu1 %vm794_vm10, %v4803_v42 }
0x10d6   : > { %12271 = vmatpush3.xpose.msk.msra.mxu1 %vm794_vm10, %v5090_v30  ;;  %12272 = vmatprep.mubr.msk.f32.mxu1 %vm12957_vm9, %v12956_v13 }
0x10d7   : > { %12280 = vmatprep.subr.mxu1 %v12956_v13 }
0x10d9   : > { %12273 = vmatmul.mubr.msk.f32.vlgmr.msra.gmra.mrb[56].mxu1 %vm794_vm10, %v5088_v32 }
0x10da   : > { %12282 = vmatprep.mubr.msk.f32.mxu1 %vm12957_vm9, %v12956_v13 }
0x1186   : > { %v5083_v59 = vpop.f32.mrb[54].mxu0 }
0x1187   : > { %v5084_v60 = vadd.f32 %v5083_v59, %v575_v58  ;;  %v12269_v61 = vpop.f32.mrb[55].mxu0 }
0x1189   : > { %v5246_v63 = vsel %vm794_vm10, %v5084_v60, -inf }
0x118a   : > { %5247 = vmax.xlane.f32.xlu1 %v5246_v63 }
0x1192   : > { %v5239_v0 = vpop.f32.mrb[56].mxu0 }
0x1193   : > { %v12279_v1 = vpop.f32.mrb[57].mxu0  ;;  %v5240_v10 = vadd.f32 %v5239_v0, %v575_v58 }
0x1195   : > { %v5252_v17 = vsel %vm794_vm10, %v5240_v10, -inf }
0x11a4   : > { %v13782_v2 = vpop.f32.mrb[52].mxu1 }
0x11a5   : > { %v13784_v24 = vpop.f32.mrb[53].mxu1 }
0x11a8   : > { %v5005_v47 = vpop.f32.mrb[54].mxu1 }
0x11a9   : > { %v5006_v3 = vadd.f32 %v5005_v47, %v575_v58  ;;  %v12264_v4 = vpop.f32.mrb[55].mxu1 }
0x11ab   : > { %v5243_v5 = vsel %vm794_vm10, %v5006_v3, -inf }
0x11ac   : > { %5244 = vmax.xlane.f32.xlu0 %v5243_v5  ;;  %v5161_v6 = vpop.f32.mrb[56].mxu1 }
0x11ad   : > { %v5162_v16 = vadd.f32 %v5161_v6, %v575_v58  ;;  %v12274_v9 = vpop.f32.mrb[57].mxu1 }
0x11ae   : > { %v13846_v9 = vld [vmem:[%s14988_s11] sm:$0xff] }
0x11af   : > { %v5249_v8 = vsel %vm794_vm10, %v5162_v16, -inf  ;;  %12286 = vmatpush3.msra.mxu0 %v13846_v9 }
0x11b0   : > { %5250 = vmax.xlane.f32.xlu0 %v5249_v8  ;;  %12295 = vmatprep.subr.mxu0 %v12956_v13 }
0x11b4   : > { %5253 = vmax.xlane.f32.xlu0 %v5252_v17 }
0x1217   : > { %v5248_v29 = vpop.xlane.xlu1 %5247 }
0x1218   : > { %v5256_v19 = vsub.f32 %v5084_v60, %v5248_v29  ;;  %v13863_v29 = vld [vmem:[%s14988_s11 + $0x10] sm:$0xff] }
0x121a   : > { %v5261_v20 = vmul.f32 1.442695, %v5256_v19 }
0x121c   : > { %12803 = vpow2.f32 %v5261_v20 }
0x1226   : > { %v12804_v21 = vpop.eup %12803 }
0x1227   : > { %v5270_v62 = vsel %vm794_vm10, %v12804_v21, 0.0 }
0x1228   : > { %5271 = vadd.xlane.f32.xlu1 %v5270_v62 }
0x1239   : > { %v5245_v22 = vpop.xlane.xlu0 %5244 }
0x123a   : > { %v5255_v42 = vsub.f32 %v5006_v3, %v5245_v22 }
0x123c   : > { %v5259_v52 = vmul.f32 1.442695, %v5255_v42 }
0x123d   : > { %v5251_v27 = vpop.xlane.xlu0 %5250 }
0x123e   : > { %12805 = vpow2.f32 %v5259_v52  ;;  %v5257_v49 = vsub.f32 %v5162_v16, %v5251_v27  ;;  %v576_v27 = vld [vmem:[%s13778_s24 + $0x8] sm:$0xff] }
0x1240   : > { %v5263_v28 = vmul.f32 1.442695, %v5257_v49 }
0x1241   : > { %v5254_v41 = vpop.xlane.xlu0 %5253 }
0x1242   : > { %12807 = vpow2.f32 %v5263_v28  ;;  %v5258_v26 = vsub.f32 %v5240_v10, %v5254_v41  ;;  %v13853_v10 = vld [vmem:[%s14988_s11 + $0x8] sm:$0xff] }
0x1244   : > { %v5265_v30 = vmul.f32 1.442695, %v5258_v26 }
0x1246   : > { %12809 = vpow2.f32 %v5265_v30 }
0x1248   : > { %v12806_v32 = vpop.eup %12805 }
0x1249   : > { %v5267_v33 = vsel %vm794_vm10, %v12806_v32, 0.0 }
0x124a   : > { %5268 = vadd.xlane.f32.xlu0 %v5267_v33 }
0x124c   : > { %v12808_v34 = vpop.eup %12807 }
0x124d   : > { %v5273_v35 = vsel %vm794_vm10, %v12808_v34, 0.0 }
0x124e   : > { %5274 = vadd.xlane.f32.xlu0 %v5273_v35 }
0x1250   : > { %v12810_v36 = vpop.eup %12809 }
0x1251   : > { %v5276_v39 = vsel %vm794_vm10, %v12810_v36, 0.0 }
0x1252   : > { %5277 = vadd.xlane.f32.xlu1 %v5276_v39  ;;  %v580_v39 = vld [vmem:[%s14981_s4 + $0x8] sm:$0x3] }
0x1263   : > { %5441 = vrot.lane.b32.xlu1 %v13717_v18, %s15052_s2 }
0x1264   : > { %5287 = vrot.lane.b32.xlu0 %v13717_v18, %s15049_s30 }
0x1267   : > { %5591 = vrot.lane.b32.xlu1 %v13717_v18, %s15053_s5 }
0x1268   : > { %5969 = vrot.lane.b32.xlu0 %v13799_v40, %s15050_s17 }
0x126b   : > { %5741 = vrot.lane.b32.xlu1 %v13717_v18, %s15054_s6 }
0x126c   : > { %6047 = vrot.lane.b32.xlu0 %v13799_v40, %s15044_s26 }
0x126f   : > { %5967 = vrot.lane.b32.xlu1 %v4808_v45, %s15050_s17 }
0x1270   : > { %6125 = vrot.lane.b32.xlu0 %v13799_v40, %s15045_s0 }
0x1273   : > { %6045 = vrot.lane.b32.xlu1 %v4808_v45, %s15044_s26 }
0x1277   : > { %6123 = vrot.lane.b32.xlu1 %v4808_v45, %s15045_s0 }
0x12b5   : > { %v5272_v15 = vpop.xlane.xlu1 %5271 }
0x12d7   : > { %v5269_v46 = vpop.xlane.xlu0 %5268 }
0x12d8   : > { %12811 = vrcp.f32 %v5269_v46 }
0x12d9   : > { %12813 = vrcp.f32 %v5272_v15 }
0x12db   : > { %v5275_v18 = vpop.xlane.xlu0 %5274 }
0x12dc   : > { %12815 = vrcp.f32 %v5275_v18 }
0x12df   : > { %v5278_v48 = vpop.xlane.xlu1 %5277  ;;  %v5288_v56 = vpop.permute.xlu0 %5287 }
0x12e0   : > { %12281 = vmatpush3.msra.mxu1 %v5288_v56  ;;  %12817 = vrcp.f32 %v5278_v48 }
0x12e1   : > { %12290 = vmatprep.subr.mxu1 %v12956_v13 }
0x12e2   : > { %v12812_v12 = vpop.eup %12811 }
0x12e3   : > { %v5283_v57 = vmul.f32 %v12812_v12, %v12806_v32  ;;  %v5442_v58 = vpop.permute.xlu1 %5441  ;;  %v12814_v59 = vpop.eup %12813 }
0x12e4   : > { %v5284_v60 = vmul.f32 %v12814_v59, %v12804_v21  ;;  %v5970_v4 = vpop.permute.xlu0 %5969  ;;  %v13873_v21 = vld [vmem:[%s14988_s11 + $0x18] sm:$0xff] }
0x12e5   : > { %12283 = vmatmul.mubr.msk.f32.vlgmr.msra.gmra.mrb[58].mxu1 %vm794_vm10, %v5283_v57 }
0x12e6   : > { %12291 = vmatpush3.msra.mxu1 %v5442_v58  ;;  %12292 = vmatprep.mubr.msk.f32.mxu1 %vm12957_vm9, %v12956_v13  ;;  %v12816_v63 = vpop.eup %12815 }
0x12e7   : > { %v5592_v61 = vpop.permute.xlu1 %5591  ;;  %12300 = vmatprep.subr.mxu1 %v12956_v13  ;;  %v5285_v0 = vmul.f32 %v12816_v63, %v12808_v34 }
0x12e8   : > { %v6048_v6 = vpop.permute.xlu0 %6047 }
0x12e9   : > { %12293 = vmatmul.mubr.msk.f32.vlgmr.msra.gmra.mrb[60].mxu1 %vm794_vm10, %v5284_v60 }
0x12ea   : > { %12301 = vmatpush3.msra.mxu1 %v5592_v61  ;;  %12302 = vmatprep.mubr.msk.f32.mxu1 %vm12957_vm9, %v12956_v13  ;;  %v12818_v47 = vpop.eup %12817 }
0x12eb   : > { %v5742_v1 = vpop.permute.xlu1 %5741  ;;  %12310 = vmatprep.subr.mxu1 %v12956_v13  ;;  %v5286_v3 = vmul.f32 %v12818_v47, %v12810_v36 }
0x12ec   : > { %v6126_v28 = vpop.permute.xlu0 %6125 }
0x12ed   : > { %12303 = vmatmul.mubr.msk.f32.vlgmr.msra.gmra.mrb[62].mxu1 %vm794_vm10, %v5285_v0 }
0x12ee   : > { %12311 = vmatpush3.msra.mxu1 %v5742_v1  ;;  %12312 = vmatprep.mubr.msk.f32.mxu1 %vm12957_vm9, %v12956_v13 }
0x12ef   : > { %12320 = vmatprep.subr.mxu1 %v12956_v13  ;;  %v5968_v5 = vpop.permute.xlu1 %5967 }
0x12f1   : > { %12313 = vmatmul.mubr.msk.f32.vlgmr.msra.gmra.mrb[64].mxu1 %vm794_vm10, %v5286_v3 }
0x12f2   : > { %12322 = vmatprep.mubr.msk.f32.mxu1 %vm12957_vm9, %v12956_v13 }
0x12f3   : > { %v6046_v16 = vpop.permute.xlu1 %6045 }
0x12f5   : > { %12321 = vmatpush3.xpose.msk.msra.mxu1 %vm794_vm10, %v13799_v40 }
0x12f6   : > { %12330 = vmatprep.subr.mxu1 %v12956_v13 }
0x12f7   : > { %v6124_v32 = vpop.permute.xlu1 %6123 }
0x12f8   : > { %12323 = vmatmul.mubr.msk.f32.vlgmr.msra.gmra.mrb[66].mxu1 %vm794_vm10, %v4808_v45  ;;  %v13902_v45 = vrot.slane %v580_v39, %v13153_v50 }
0x12f9   : > { %12331 = vmatpush3.xpose.msk.msra.mxu1 %vm794_vm10, %v6048_v6  ;;  %12332 = vmatprep.mubr.msk.f32.mxu1 %vm12957_vm9, %v12956_v13 }
0x12fa   : > { %12340 = vmatprep.subr.mxu1 %v12956_v13 }
0x12fc   : > { %12333 = vmatmul.mubr.msk.f32.vlgmr.msra.gmra.mrb[68].mxu1 %vm794_vm10, %v6046_v16 }
0x12fd   : > { %12342 = vmatprep.mubr.msk.f32.mxu1 %vm12957_vm9, %v12956_v13 }
0x13b8   : > { %v5359_v8 = vpop.f32.mrb[58].mxu1 }
0x13b9   : > { %v12284_v17 = vpop.f32.mrb[59].mxu1  ;;  %12288 = vmatmul.mubr.msk.f32.vlgmr.msra.gmra.mrb[58].mxu0 %vm794_vm10, %v5359_v8 }
0x13ba   : > { %12296 = vmatpush3.msra.mxu0 %v13853_v10  ;;  %12297 = vmatprep.mubr.msk.f32.mxu0 %vm12957_vm9, %v12956_v13 }
0x13bb   : > { %12305 = vmatprep.subr.mxu0 %v12956_v13 }
0x13bc   : > { %v5513_v19 = vpop.f32.mrb[60].mxu1 }
0x13bd   : > { %v12294_v20 = vpop.f32.mrb[61].mxu1  ;;  %12298 = vmatmul.mubr.msk.f32.vlgmr.msra.gmra.mrb[60].mxu0 %vm794_vm10, %v5513_v19 }
0x13be   : > { %12306 = vmatpush3.msra.mxu0 %v13863_v29  ;;  %12307 = vmatprep.mubr.msk.f32.mxu0 %vm12957_vm9, %v12956_v13 }
0x13bf   : > { %12315 = vmatprep.subr.mxu0 %v12956_v13 }
0x13c0   : > { %v5663_v62 = vpop.f32.mrb[62].mxu1 }
0x13c1   : > { %v12304_v22 = vpop.f32.mrb[63].mxu1  ;;  %12308 = vmatmul.mubr.msk.f32.vlgmr.msra.gmra.mrb[62].mxu0 %vm794_vm10, %v5663_v62 }
0x13c2   : > { %12316 = vmatpush3.msra.mxu0 %v13873_v21  ;;  %12317 = vmatprep.mubr.msk.f32.mxu0 %vm12957_vm9, %v12956_v13 }
0x13c3   : > { %12325 = vmatprep.subr.mxu0 %v12956_v13 }
0x13c4   : > { %v5813_v42 = vpop.f32.mrb[64].mxu1 }
0x13c5   : > { %v12314_v52 = vpop.f32.mrb[65].mxu1  ;;  %12318 = vmatmul.mubr.msk.f32.vlgmr.msra.gmra.mrb[64].mxu0 %vm794_vm10, %v5813_v42 }
0x13c6   : > { %12327 = vmatprep.mubr.msk.f32.mxu0 %vm12957_vm9, %v12956_v13 }
0x13c9   : > { %12326 = vmatpush3.xpose.msk.msra.mxu0 %vm794_vm10, %v5970_v4 }
0x13ca   : > { %12335 = vmatprep.subr.mxu0 %v12956_v13 }
0x13cb   : > { %v5963_v49 = vpop.f32.mrb[66].mxu1 }
0x13cc   : > { %v5964_v41 = vadd.f32 %v5963_v49, %v576_v27  ;;  %v12324_v26 = vpop.f32.mrb[67].mxu1  ;;  %12328 = vmatmul.mubr.msk.f32.vlgmr.msra.gmra.mrb[66].mxu0 %vm794_vm10, %v5968_v5 }
0x13cd   : > { %12336 = vmatpush3.xpose.msk.msra.mxu0 %vm794_vm10, %v6126_v28  ;;  %12337 = vmatprep.mubr.msk.f32.mxu0 %vm12957_vm9, %v12956_v13 }
0x13ce   : > { %v6201_v30 = vsel %vm794_vm10, %v5964_v41, -inf  ;;  %12345 = vmatprep.subr.mxu0 %v12956_v13 }
0x13cf   : > { %6202 = vmax.xlane.f32.xlu0 %v6201_v30  ;;  %v6119_v33 = vpop.f32.mrb[68].mxu1 }
0x13d0   : > { %v6120_v34 = vadd.f32 %v6119_v33, %v576_v27  ;;  %v12334_v35 = vpop.f32.mrb[69].mxu1  ;;  %12338 = vmatmul.mubr.msk.f32.vlgmr.msra.gmra.mrb[68].mxu0 %vm794_vm10, %v6124_v32 }
0x13d1   : > { %12346 = vmatpush3.msra.mxu0 %v13846_v9  ;;  %12347 = vmatprep.mubr.msk.f32.mxu0 %vm12957_vm9, %v12956_v13 }
0x13d2   : > { %v6207_v36 = vsel %vm794_vm10, %v6120_v34, -inf  ;;  %12355 = vmatprep.subr.mxu0 %v12956_v13 }
0x13d3   : > { %6208 = vmax.xlane.f32.xlu0 %v6207_v36 }
0x145c   : > { %v6203_v48 = vpop.xlane.xlu0 %6202 }
0x145d   : > { %v6213_v59 = vsub.f32 %v5964_v41, %v6203_v48 }
0x145f   : > { %v6217_v1 = vmul.f32 1.442695, %v6213_v59 }
0x1460   : > { %v6209_v63 = vpop.xlane.xlu0 %6208 }
0x1461   : > { %v6215_v47 = vsub.f32 %v6120_v34, %v6209_v63  ;;  %12819 = vpow2.f32 %v6217_v1 }
0x1463   : > { %v6221_v5 = vmul.f32 1.442695, %v6215_v47 }
0x1465   : > { %12821 = vpow2.f32 %v6221_v5 }
0x146b   : > { %v12820_v42 = vpop.eup %12819 }
0x146c   : > { %v6225_v52 = vsel %vm794_vm10, %v12820_v42, 0.0 }
0x146f   : > { %v12822_v49 = vpop.eup %12821 }
0x1470   : > { %v6231_v28 = vsel %vm794_vm10, %v12822_v49, 0.0 }
0x148c   : > { %v5432_v15 = vpop.f32.mrb[58].mxu0 }
0x148d   : > { %v12289_v46 = vpop.f32.mrb[59].mxu0  ;;  %v5440_v18 = vadd.f32 %v13902_v45, %v5432_v15 }
0x1490   : > { %v5586_v56 = vpop.f32.mrb[60].mxu0 }
0x1491   : > { %v5590_v12 = vadd.f32 %v5586_v56, %v5440_v18  ;;  %v12299_v57 = vpop.f32.mrb[61].mxu0 }
0x1492   : > { %v4813_v57 = vadd.f32 %v13784_v24, %v13735_v25 }
0x1494   : > { %v5736_v58 = vpop.f32.mrb[62].mxu0 }
0x1495   : > { %v5740_v60 = vadd.f32 %v5736_v58, %v5590_v12  ;;  %v12309_v61 = vpop.f32.mrb[63].mxu0 }
0x1498   : > { %v5886_v0 = vpop.f32.mrb[64].mxu0 }
0x1499   : > { %v13905_v3 = vadd.f32 %v5886_v0, %v5740_v60  ;;  %v12319_v4 = vpop.f32.mrb[65].mxu0 }
0x149f   : > { %v6041_v6 = vpop.f32.mrb[66].mxu0 }
0x14a0   : > { %v6042_v16 = vadd.f32 %v6041_v6, %v576_v27  ;;  %v12329_v8 = vpop.f32.mrb[67].mxu0 }
0x14a2   : > { %v6204_v17 = vsel %vm794_vm10, %v6042_v16, -inf }
0x14a3   : > { %6205 = vmax.xlane.f32.xlu1 %v6204_v17  ;;  %v6197_v19 = vpop.f32.mrb[68].mxu0 }
0x14a4   : > { %v6198_v20 = vadd.f32 %v6197_v19, %v576_v27  ;;  %v12339_v62 = vpop.f32.mrb[69].mxu0  ;;  %v13919_v27 = vadd.f32 %v13712_v14, %v13772_v43 }
0x14a6   : > { %v6210_v22 = vsel %vm794_vm10, %v6198_v20, -inf }
0x14a7   : > { %6211 = vmax.xlane.f32.xlu0 %v6210_v22 }
0x14ab   : > { %6226 = vadd.xlane.f32.xlu0 %v6225_v52 }
0x14af   : > { %6232 = vadd.xlane.f32.xlu0 %v6231_v28 }
0x14b4   : > { %6395 = vrot.lane.b32.xlu1 %v13799_v40, %s15052_s2 }
0x14b8   : > { %6545 = vrot.lane.b32.xlu1 %v13799_v40, %s15053_s5 }
0x14c5   : > { %6245 = vrot.lane.b32.xlu0 %v13799_v40, %s15049_s30 }
0x14c9   : > { %6923 = vrot.lane.b32.xlu0 %v13919_v27, %s15050_s17 }
0x14cd   : > { %7001 = vrot.lane.b32.xlu0 %v13919_v27, %s15044_s26 }
0x14d1   : > { %7079 = vrot.lane.b32.xlu0 %v13919_v27, %s15045_s0 }
0x1530   : > { %v6206_v41 = vpop.xlane.xlu1 %6205 }
0x1531   : > { %v6214_v26 = vsub.f32 %v6042_v16, %v6206_v41 }
0x1533   : > { %v6219_v30 = vmul.f32 1.442695, %v6214_v26 }
0x1534   : > { %v6212_v32 = vpop.xlane.xlu0 %6211  ;;  %v6396_v12 = vpop.permute.xlu1 %6395 }
0x1535   : > { %12823 = vpow2.f32 %v6219_v30  ;;  %v6216_v33 = vsub.f32 %v6198_v20, %v6212_v32 }
0x1537   : > { %v6223_v34 = vmul.f32 1.442695, %v6216_v33 }
0x1538   : > { %v6227_v35 = vpop.xlane.xlu0 %6226  ;;  %v6546_v58 = vpop.permute.xlu1 %6545 }
0x1539   : > { %12825 = vpow2.f32 %v6223_v34 }
0x153a   : > { %12827 = vrcp.f32 %v6227_v35 }
0x153c   : > { %v6233_v43 = vpop.xlane.xlu0 %6232 }
0x153f   : > { %v12824_v36 = vpop.eup %12823 }
0x1540   : > { %v6246_v39 = vpop.permute.xlu0 %6245  ;;  %v6228_v15 = vsel %vm794_vm10, %v12824_v36, 0.0 }
0x1541   : > { %6229 = vadd.xlane.f32.xlu1 %v6228_v15  ;;  %12341 = vmatpush3.msra.mxu1 %v6246_v39 }
0x1542   : > { %12350 = vmatprep.subr.mxu1 %v12956_v13 }
0x1543   : > { %v12826_v46 = vpop.eup %12825 }
0x1544   : > { %v12828_v18 = vpop.eup %12827  ;;  %v6234_v48 = vsel %vm794_vm10, %v12826_v46, 0.0  ;;  %v6924_v4 = vpop.permute.xlu0 %6923 }
0x1545   : > { %v6241_v56 = vmul.f32 %v12828_v18, %v12820_v42  ;;  %6235 = vadd.xlane.f32.xlu1 %v6234_v48 }
0x1547   : > { %12343 = vmatmul.mubr.msk.f32.vlgmr.msra.gmra.mrb[70].mxu1 %vm794_vm10, %v6241_v56 }
0x1548   : > { %12351 = vmatpush3.msra.mxu1 %v6396_v12  ;;  %12352 = vmatprep.mubr.msk.f32.mxu1 %vm12957_vm9, %v12956_v13  ;;  %v7002_v6 = vpop.permute.xlu0 %7001 }
0x1549   : > { %12360 = vmatprep.subr.mxu1 %v12956_v13 }
0x154c   : > { %v7080_v41 = vpop.permute.xlu0 %7079 }
0x1556   : > { %6695 = vrot.lane.b32.xlu1 %v13799_v40, %s15054_s6 }
0x155a   : > { %6921 = vrot.lane.b32.xlu1 %v4813_v57, %s15050_s17 }
0x155e   : > { %6999 = vrot.lane.b32.xlu1 %v4813_v57, %s15044_s26 }
0x1562   : > { %7077 = vrot.lane.b32.xlu1 %v4813_v57, %s15045_s0 }
0x15ce   : > { %v6230_v59 = vpop.xlane.xlu1 %6229 }
0x15cf   : > { %12829 = vrcp.f32 %v6230_v59 }
0x15d0   : > { %12831 = vrcp.f32 %v6233_v43 }
0x15d2   : > { %v6236_v60 = vpop.xlane.xlu1 %6235 }
0x15d3   : > { %12833 = vrcp.f32 %v6236_v60 }
0x15d6   : > { %v6696_v1 = vpop.permute.xlu1 %6695 }
0x15d9   : > { %v12830_v61 = vpop.eup %12829 }
0x15da   : > { %v6242_v63 = vmul.f32 %v12830_v61, %v12824_v36  ;;  %v12832_v0 = vpop.eup %12831  ;;  %v6922_v5 = vpop.permute.xlu1 %6921 }
0x15db   : > { %v6243_v24 = vmul.f32 %v12832_v0, %v12822_v49  ;;  %v577_v49 = vld [vmem:[%s13778_s24 + $0x10] sm:$0xff] }
0x15dc   : > { %12353 = vmatmul.mubr.msk.f32.vlgmr.msra.gmra.mrb[72].mxu1 %vm794_vm10, %v6242_v63 }
0x15dd   : > { %12361 = vmatpush3.msra.mxu1 %v6546_v58  ;;  %12362 = vmatprep.mubr.msk.f32.mxu1 %vm12957_vm9, %v12956_v13  ;;  %v12834_v40 = vpop.eup %12833 }
0x15de   : > { %12370 = vmatprep.subr.mxu1 %v12956_v13  ;;  %v6244_v47 = vmul.f32 %v12834_v40, %v12826_v46  ;;  %v7000_v16 = vpop.permute.xlu1 %6999 }
0x15e0   : > { %12363 = vmatmul.mubr.msk.f32.vlgmr.msra.gmra.mrb[74].mxu1 %vm794_vm10, %v6243_v24 }
0x15e1   : > { %12371 = vmatpush3.msra.mxu1 %v6696_v1  ;;  %12372 = vmatprep.mubr.msk.f32.mxu1 %vm12957_vm9, %v12956_v13 }
0x15e2   : > { %12380 = vmatprep.subr.mxu1 %v12956_v13  ;;  %v7078_v33 = vpop.permute.xlu1 %7077 }
0x15e4   : > { %12373 = vmatmul.mubr.msk.f32.vlgmr.msra.gmra.mrb[76].mxu1 %vm794_vm10, %v6244_v47 }
0x15e5   : > { %12382 = vmatprep.mubr.msk.f32.mxu1 %vm12957_vm9, %v12956_v13 }
0x15e8   : > { %12381 = vmatpush3.xpose.msk.msra.mxu1 %vm794_vm10, %v13919_v27 }
0x15e9   : > { %12390 = vmatprep.subr.mxu1 %v12956_v13 }
0x15eb   : > { %12383 = vmatmul.mubr.msk.f32.vlgmr.msra.gmra.mrb[78].mxu1 %vm794_vm10, %v4813_v57 }
0x15ec   : > { %12391 = vmatpush3.xpose.msk.msra.mxu1 %vm794_vm10, %v7002_v6  ;;  %12392 = vmatprep.mubr.msk.f32.mxu1 %vm12957_vm9, %v12956_v13 }
0x15ed   : > { %12400 = vmatprep.subr.mxu1 %v12956_v13 }
0x15ef   : > { %12393 = vmatmul.mubr.msk.f32.vlgmr.msra.gmra.mrb[80].mxu1 %vm794_vm10, %v7000_v16 }
0x15f0   : > { %12402 = vmatprep.mubr.msk.f32.mxu1 %vm12957_vm9, %v12956_v13 }
0x161a   : > { %v6317_v8 = vpop.f32.mrb[70].mxu1 }
0x161b   : > { %v12344_v17 = vpop.f32.mrb[71].mxu1  ;;  %12348 = vmatmul.mubr.msk.f32.vlgmr.msra.gmra.mrb[70].mxu0 %vm794_vm10, %v6317_v8 }
0x161c   : > { %12356 = vmatpush3.msra.mxu0 %v13853_v10  ;;  %12357 = vmatprep.mubr.msk.f32.mxu0 %vm12957_vm9, %v12956_v13 }
0x161d   : > { %12365 = vmatprep.subr.mxu0 %v12956_v13 }
0x16af   : > { %v6467_v19 = vpop.f32.mrb[72].mxu1 }
0x16b0   : > { %v12354_v20 = vpop.f32.mrb[73].mxu1  ;;  %12358 = vmatmul.mubr.msk.f32.vlgmr.msra.gmra.mrb[72].mxu0 %vm794_vm10, %v6467_v19 }
0x16b1   : > { %12366 = vmatpush3.msra.mxu0 %v13863_v29  ;;  %12367 = vmatprep.mubr.msk.f32.mxu0 %vm12957_vm9, %v12956_v13 }
0x16b2   : > { %12375 = vmatprep.subr.mxu0 %v12956_v13 }
0x16b3   : > { %v6617_v62 = vpop.f32.mrb[74].mxu1 }
0x16b4   : > { %v12364_v22 = vpop.f32.mrb[75].mxu1  ;;  %12368 = vmatmul.mubr.msk.f32.vlgmr.msra.gmra.mrb[74].mxu0 %vm794_vm10, %v6617_v62 }
0x16b5   : > { %12376 = vmatpush3.msra.mxu0 %v13873_v21  ;;  %12377 = vmatprep.mubr.msk.f32.mxu0 %vm12957_vm9, %v12956_v13 }
0x16b6   : > { %12385 = vmatprep.subr.mxu0 %v12956_v13 }
0x16b7   : > { %v6767_v42 = vpop.f32.mrb[76].mxu1 }
0x16b8   : > { %v12374_v52 = vpop.f32.mrb[77].mxu1  ;;  %12378 = vmatmul.mubr.msk.f32.vlgmr.msra.gmra.mrb[76].mxu0 %vm794_vm10, %v6767_v42 }
0x16b9   : > { %12387 = vmatprep.mubr.msk.f32.mxu0 %vm12957_vm9, %v12956_v13 }
0x16bc   : > { %12386 = vmatpush3.xpose.msk.msra.mxu0 %vm794_vm10, %v6924_v4 }
0x16bd   : > { %12395 = vmatprep.subr.mxu0 %v12956_v13 }
0x16be   : > { %v6917_v28 = vpop.f32.mrb[78].mxu1 }
0x16bf   : > { %v6918_v26 = vadd.f32 %v6917_v28, %v577_v49  ;;  %v12384_v30 = vpop.f32.mrb[79].mxu1  ;;  %12388 = vmatmul.mubr.msk.f32.vlgmr.msra.gmra.mrb[78].mxu0 %vm794_vm10, %v6922_v5 }
0x16c0   : > { %12396 = vmatpush3.xpose.msk.msra.mxu0 %vm794_vm10, %v7080_v41  ;;  %12397 = vmatprep.mubr.msk.f32.mxu0 %vm12957_vm9, %v12956_v13 }
0x16c1   : > { %v7155_v32 = vsel %vm794_vm10, %v6918_v26, -inf  ;;  %12405 = vmatprep.subr.mxu0 %v12956_v13 }
0x16c2   : > { %7156 = vmax.xlane.f32.xlu0 %v7155_v32  ;;  %v7073_v34 = vpop.f32.mrb[80].mxu1 }
0x16c3   : > { %v7074_v35 = vadd.f32 %v7073_v34, %v577_v49  ;;  %v12394_v43 = vpop.f32.mrb[81].mxu1  ;;  %12398 = vmatmul.mubr.msk.f32.vlgmr.msra.gmra.mrb[80].mxu0 %vm794_vm10, %v7078_v33 }
0x16c4   : > { %12406 = vmatpush3.msra.mxu0 %v13846_v9  ;;  %12407 = vmatprep.mubr.msk.f32.mxu0 %vm12957_vm9, %v12956_v13 }
0x16c5   : > { %v7161_v36 = vsel %vm794_vm10, %v7074_v35, -inf  ;;  %12415 = vmatprep.subr.mxu0 %v12956_v13 }
0x16c6   : > { %7162 = vmax.xlane.f32.xlu0 %v7161_v36 }
0x16ee   : > { %v6390_v39 = vpop.f32.mrb[70].mxu0 }
0x16ef   : > { %v12349_v15 = vpop.f32.mrb[71].mxu0  ;;  %v6394_v46 = vadd.f32 %v6390_v39, %v13902_v45 }
0x174f   : > { %v7157_v18 = vpop.xlane.xlu0 %7156 }
0x1750   : > { %v7167_v58 = vsub.f32 %v6918_v26, %v7157_v18 }
0x1752   : > { %v7171_v0 = vmul.f32 1.442695, %v7167_v58 }
0x1753   : > { %v7163_v61 = vpop.xlane.xlu0 %7162 }
0x1754   : > { %v7169_v24 = vsub.f32 %v7074_v35, %v7163_v61  ;;  %12835 = vpow2.f32 %v7171_v0 }
0x1756   : > { %v7175_v47 = vmul.f32 1.442695, %v7169_v24 }
0x1758   : > { %12837 = vpow2.f32 %v7175_v47 }
0x175e   : > { %v12836_v62 = vpop.eup %12835 }
0x175f   : > { %v7179_v22 = vsel %vm794_vm10, %v12836_v62, 0.0 }
0x1762   : > { %v12838_v42 = vpop.eup %12837 }
0x1763   : > { %v7185_v52 = vsel %vm794_vm10, %v12838_v42, 0.0 }
0x1783   : > { %v6540_v48 = vpop.f32.mrb[72].mxu0 }
0x1784   : > { %v6544_v56 = vadd.f32 %v6540_v48, %v6394_v46  ;;  %v12359_v12 = vpop.f32.mrb[73].mxu0  ;;  %v4818_v48 = vadd.f32 %v13782_v2, %v13735_v25 }
0x1787   : > { %v6690_v57 = vpop.f32.mrb[74].mxu0 }
0x1788   : > { %v6694_v59 = vadd.f32 %v6690_v57, %v6544_v56  ;;  %v12369_v60 = vpop.f32.mrb[75].mxu0 }
0x178b   : > { %v6840_v63 = vpop.f32.mrb[76].mxu0 }
0x178c   : > { %v13997_v40 = vadd.f32 %v6840_v63, %v6694_v59  ;;  %v12379_v1 = vpop.f32.mrb[77].mxu0 }
0x1792   : > { %v6995_v4 = vpop.f32.mrb[78].mxu0 }
0x1793   : > { %v6996_v5 = vadd.f32 %v6995_v4, %v577_v49  ;;  %v12389_v6 = vpop.f32.mrb[79].mxu0 }
0x1795   : > { %v7158_v16 = vsel %vm794_vm10, %v6996_v5, -inf }
0x1796   : > { %7159 = vmax.xlane.f32.xlu1 %v7158_v16  ;;  %v7151_v8 = vpop.f32.mrb[80].mxu0 }
0x1797   : > { %v7152_v17 = vadd.f32 %v7151_v8, %v577_v49  ;;  %v12399_v19 = vpop.f32.mrb[81].mxu0  ;;  %v14011_v49 = vadd.f32 %v13770_v53, %v13712_v14 }
0x1799   : > { %v7164_v20 = vsel %vm794_vm10, %v7152_v17, -inf }
0x179a   : > { %7165 = vmax.xlane.f32.xlu0 %v7164_v20  ;;  %v578_v20 = vld [vmem:[%s13778_s24 + $0x18] sm:$0xff] }
0x179e   : > { %7180 = vadd.xlane.f32.xlu0 %v7179_v22 }
0x17a2   : > { %7186 = vadd.xlane.f32.xlu0 %v7185_v52 }
0x17a7   : > { %7349 = vrot.lane.b32.xlu1 %v13919_v27, %s15052_s2 }
0x17ab   : > { %7499 = vrot.lane.b32.xlu1 %v13919_v27, %s15053_s5 }
0x17b8   : > { %7199 = vrot.lane.b32.xlu0 %v13919_v27, %s15049_s30 }
0x17bc   : > { %7877 = vrot.lane.b32.xlu0 %v14011_v49, %s15050_s17 }
0x17c0   : > { %7955 = vrot.lane.b32.xlu0 %v14011_v49, %s15044_s26 }
0x17c4   : > { %8033 = vrot.lane.b32.xlu0 %v14011_v49, %s15045_s0 }
0x1823   : > { %v7160_v28 = vpop.xlane.xlu1 %7159 }
0x1824   : > { %v7168_v41 = vsub.f32 %v6996_v5, %v7160_v28 }
0x1826   : > { %v7173_v26 = vmul.f32 1.442695, %v7168_v41 }
0x1827   : > { %v7166_v30 = vpop.xlane.xlu0 %7165  ;;  %v7350_v18 = vpop.permute.xlu1 %7349 }
0x1828   : > { %12839 = vpow2.f32 %v7173_v26  ;;  %v7170_v32 = vsub.f32 %v7152_v17, %v7166_v30 }
0x182a   : > { %v7177_v33 = vmul.f32 1.442695, %v7170_v32 }
0x182b   : > { %v7181_v34 = vpop.xlane.xlu0 %7180  ;;  %v7500_v56 = vpop.permute.xlu1 %7499 }
0x182c   : > { %12841 = vpow2.f32 %v7177_v33 }
0x182d   : > { %12843 = vrcp.f32 %v7181_v34 }
0x182f   : > { %v7187_v14 = vpop.xlane.xlu0 %7186 }
0x1832   : > { %v12840_v53 = vpop.eup %12839 }
0x1833   : > { %v7200_v35 = vpop.permute.xlu0 %7199  ;;  %v7182_v43 = vsel %vm794_vm10, %v12840_v53, 0.0 }
0x1834   : > { %7183 = vadd.xlane.f32.xlu1 %v7182_v43  ;;  %12401 = vmatpush3.msra.mxu1 %v7200_v35 }
0x1835   : > { %12410 = vmatprep.subr.mxu1 %v12956_v13 }
0x1836   : > { %v12842_v36 = vpop.eup %12841 }
0x1837   : > { %v12844_v39 = vpop.eup %12843  ;;  %v7188_v15 = vsel %vm794_vm10, %v12842_v36, 0.0  ;;  %v7878_v63 = vpop.permute.xlu0 %7877 }
0x1838   : > { %v7195_v46 = vmul.f32 %v12844_v39, %v12836_v62  ;;  %7189 = vadd.xlane.f32.xlu1 %v7188_v15 }
0x183a   : > { %12403 = vmatmul.mubr.msk.f32.vlgmr.msra.gmra.mrb[82].mxu1 %vm794_vm10, %v7195_v46 }
0x183b   : > { %12411 = vmatpush3.msra.mxu1 %v7350_v18  ;;  %12412 = vmatprep.mubr.msk.f32.mxu1 %vm12957_vm9, %v12956_v13  ;;  %v7956_v24 = vpop.permute.xlu0 %7955 }
0x183c   : > { %12420 = vmatprep.subr.mxu1 %v12956_v13 }
0x183f   : > { %v8034_v22 = vpop.permute.xlu0 %8033 }
0x1849   : > { %7649 = vrot.lane.b32.xlu1 %v13919_v27, %s15054_s6 }
0x184d   : > { %7875 = vrot.lane.b32.xlu1 %v4818_v48, %s15050_s17  ;;  %s534_s17 = sand.u32 1, %s12946_s19  }
0x184e   : > { %s11205_s24 = sshll.u32 %s534_s17, 5  ;;  %s14936_s22 = scalar_lea.sflag [#allocation3], %s534_s17 }
0x184f   : > { %s536_s16 = scalar_lea.vmem [#allocation2], %s11205_s24 }
0x1850   : > { %s11103_s23 = sshll.u32 %s536_s16, 4  ;;  %s14930_s23 = int_to_ptr.vmem [resolvable:$true] %s11103_s23 }
0x1851   : > { %7953 = vrot.lane.b32.xlu1 %v4818_v48, %s15044_s26  ;;  %s12892_s28 = scalar_lea.vmem %s14930_s23, 512 }
0x1852   : > { %p12893_p11 = scmp.ne.s32.totalorder %s14930_s23, %s12892_s28 }
0x1854   : > { %p12894_p12 = pnand %p12893_p11, %p13091_p5 }
0x1855   : > { %8031 = vrot.lane.b32.xlu1 %v4818_v48, %s15045_s0 }
0x1856   : > { %p12895_p13 = pneg %p12894_p12 }
0x18c1   : > { %v7184_v12 = vpop.xlane.xlu1 %7183 }
0x18c2   : > { %12845 = vrcp.f32 %v7184_v12 }
0x18c3   : > { %12847 = vrcp.f32 %v7187_v14 }
0x18c5   : > { %v7190_v57 = vpop.xlane.xlu1 %7189 }
0x18c6   : > { %12849 = vrcp.f32 %v7190_v57 }
0x18c9   : > { %v7650_v27 = vpop.permute.xlu1 %7649 }
0x18cc   : > { %v12846_v58 = vpop.eup %12845 }
0x18cd   : > { %v7196_v59 = vmul.f32 %v12846_v58, %v12840_v53  ;;  %v12848_v60 = vpop.eup %12847  ;;  %v7876_v0 = vpop.permute.xlu1 %7875 }
0x18ce   : > { %v7197_v25 = vmul.f32 %v12848_v60, %v12838_v42 }
0x18cf   : > { %12413 = vmatmul.mubr.msk.f32.vlgmr.msra.gmra.mrb[84].mxu1 %vm794_vm10, %v7196_v59 }
0x18d0   : > { %12421 = vmatpush3.msra.mxu1 %v7500_v56  ;;  %12422 = vmatprep.mubr.msk.f32.mxu1 %vm12957_vm9, %v12956_v13  ;;  %v12850_v2 = vpop.eup %12849 }
0x18d1   : > { %12430 = vmatprep.subr.mxu1 %v12956_v13  ;;  %v7198_v61 = vmul.f32 %v12850_v2, %v12842_v36  ;;  %v7954_v1 = vpop.permute.xlu1 %7953 }
0x18d3   : > { %12423 = vmatmul.mubr.msk.f32.vlgmr.msra.gmra.mrb[86].mxu1 %vm794_vm10, %v7197_v25 }
0x18d4   : > { %12431 = vmatpush3.msra.mxu1 %v7650_v27  ;;  %12432 = vmatprep.mubr.msk.f32.mxu1 %vm12957_vm9, %v12956_v13 }
0x18d5   : > { %12440 = vmatprep.subr.mxu1 %v12956_v13  ;;  %v8032_v41 = vpop.permute.xlu1 %8031 }
0x18d7   : > { %12433 = vmatmul.mubr.msk.f32.vlgmr.msra.gmra.mrb[88].mxu1 %vm794_vm10, %v7198_v61 }
0x18d8   : > { %12442 = vmatprep.mubr.msk.f32.mxu1 %vm12957_vm9, %v12956_v13 }
0x18db   : > { %12441 = vmatpush3.xpose.msk.msra.mxu1 %vm794_vm10, %v14011_v49 }
0x18dc   : > { %12450 = vmatprep.subr.mxu1 %v12956_v13 }
0x18de   : > { %12443 = vmatmul.mubr.msk.f32.vlgmr.msra.gmra.mrb[90].mxu1 %vm794_vm10, %v4818_v48 }
0x18df   : > { %12451 = vmatpush3.xpose.msk.msra.mxu1 %vm794_vm10, %v7956_v24  ;;  %12452 = vmatprep.mubr.msk.f32.mxu1 %vm12957_vm9, %v12956_v13 }
0x18e0   : > { %12460 = vmatprep.subr.mxu1 %v12956_v13 }
0x18e2   : > { %12453 = vmatmul.mubr.msk.f32.vlgmr.msra.gmra.mrb[92].mxu1 %vm794_vm10, %v7954_v1 }
0x18e3   : > { %12462 = vmatprep.mubr.msk.f32.mxu1 %vm12957_vm9, %v12956_v13 }
0x190d   : > { %v7271_v47 = vpop.f32.mrb[82].mxu1 }
0x190e   : > { %v12404_v4 = vpop.f32.mrb[83].mxu1  ;;  %12408 = vmatmul.mubr.msk.f32.vlgmr.msra.gmra.mrb[82].mxu0 %vm794_vm10, %v7271_v47 }
0x190f   : > { %12416 = vmatpush3.msra.mxu0 %v13853_v10  ;;  %12417 = vmatprep.mubr.msk.f32.mxu0 %vm12957_vm9, %v12956_v13 }
0x1910   : > { %12425 = vmatprep.subr.mxu0 %v12956_v13 }
0x19a2   : > { %v7421_v5 = vpop.f32.mrb[84].mxu1 }
0x19a3   : > { %v12414_v6 = vpop.f32.mrb[85].mxu1  ;;  %12418 = vmatmul.mubr.msk.f32.vlgmr.msra.gmra.mrb[84].mxu0 %vm794_vm10, %v7421_v5 }
0x19a4   : > { %12426 = vmatpush3.msra.mxu0 %v13863_v29  ;;  %12427 = vmatprep.mubr.msk.f32.mxu0 %vm12957_vm9, %v12956_v13 }
0x19a5   : > { %12435 = vmatprep.subr.mxu0 %v12956_v13 }
0x19a6   : > { %v7571_v16 = vpop.f32.mrb[86].mxu1 }
0x19a7   : > { %v12424_v8 = vpop.f32.mrb[87].mxu1  ;;  %12428 = vmatmul.mubr.msk.f32.vlgmr.msra.gmra.mrb[86].mxu0 %vm794_vm10, %v7571_v16  ;;  %v14101_v16 = vadd.f32 %v13905_v3, %v13569_v38 }
0x19a8   : > { %12436 = vmatpush3.msra.mxu0 %v13873_v21  ;;  %12437 = vmatprep.mubr.msk.f32.mxu0 %vm12957_vm9, %v12956_v13 }
0x19a9   : > { %12445 = vmatprep.subr.mxu0 %v12956_v13 }
0x19aa   : > { %v7721_v17 = vpop.f32.mrb[88].mxu1 }
0x19ab   : > { %v12434_v19 = vpop.f32.mrb[89].mxu1  ;;  %12438 = vmatmul.mubr.msk.f32.vlgmr.msra.gmra.mrb[88].mxu0 %vm794_vm10, %v7721_v17  ;;  %v8757_v17 = vsel %vm581_vm0, %v14101_v16, 0.0 }
0x19ac   : > { %12447 = vmatprep.mubr.msk.f32.mxu0 %vm12957_vm9, %v12956_v13 }
0x19af   : > { %12446 = vmatpush3.xpose.msk.msra.mxu0 %vm794_vm10, %v7878_v63 }
0x19b0   : > { %12455 = vmatprep.subr.mxu0 %v12956_v13 }
0x19b1   : > { %v7871_v62 = vpop.f32.mrb[90].mxu1 }
0x19b2   : > { %v7872_v42 = vadd.f32 %v7871_v62, %v578_v20  ;;  %v12444_v52 = vpop.f32.mrb[91].mxu1  ;;  %12448 = vmatmul.mubr.msk.f32.vlgmr.msra.gmra.mrb[90].mxu0 %vm794_vm10, %v7876_v0 }
0x19b3   : > { %12456 = vmatpush3.xpose.msk.msra.mxu0 %vm794_vm10, %v8034_v22  ;;  %12457 = vmatprep.mubr.msk.f32.mxu0 %vm12957_vm9, %v12956_v13 }
0x19b4   : > { %v8109_v28 = vsel %vm794_vm10, %v7872_v42, -inf  ;;  %12465 = vmatprep.subr.mxu0 %v12956_v13 }
0x19b5   : > { %8110 = vmax.xlane.f32.xlu0 %v8109_v28  ;;  %v8027_v26 = vpop.f32.mrb[92].mxu1 }
0x19b6   : > { %v8028_v30 = vadd.f32 %v8027_v26, %v578_v20  ;;  %v12454_v32 = vpop.f32.mrb[93].mxu1  ;;  %12458 = vmatmul.mubr.msk.f32.vlgmr.msra.gmra.mrb[92].mxu0 %vm794_vm10, %v8032_v41 }
0x19b7   : > { %12466 = vmatpush3.msra.mxu0 %v13846_v9  ;;  %12467 = vmatprep.mubr.msk.f32.mxu0 %vm12957_vm9, %v12956_v13 }
0x19b8   : > { %v8115_v33 = vsel %vm794_vm10, %v8028_v30, -inf  ;;  %12475 = vmatprep.subr.mxu0 %v12956_v13 }
0x19b9   : > { %8116 = vmax.xlane.f32.xlu0 %v8115_v33 }
0x19e1   : > { %v7344_v34 = vpop.f32.mrb[82].mxu0 }
0x19e2   : > { %v12409_v14 = vpop.f32.mrb[83].mxu0  ;;  %v7348_v53 = vadd.f32 %v7344_v34, %v13902_v45 }
0x1a42   : > { %v8111_v35 = vpop.xlane.xlu0 %8110 }
0x1a43   : > { %v8121_v46 = vsub.f32 %v7872_v42, %v8111_v35 }
0x1a45   : > { %v8125_v12 = vmul.f32 1.442695, %v8121_v46 }
0x1a46   : > { %v8117_v48 = vpop.xlane.xlu0 %8116 }
0x1a47   : > { %v8123_v57 = vsub.f32 %v8028_v30, %v8117_v48  ;;  %12851 = vpow2.f32 %v8125_v12 }
0x1a49   : > { %v8129_v60 = vmul.f32 1.442695, %v8123_v57 }
0x1a4b   : > { %12853 = vpow2.f32 %v8129_v60 }
0x1a51   : > { %v12852_v47 = vpop.eup %12851 }
0x1a52   : > { %v8133_v4 = vsel %vm794_vm10, %v12852_v47, 0.0 }
0x1a55   : > { %v12854_v5 = vpop.eup %12853 }
0x1a56   : > { %v8139_v6 = vsel %vm794_vm10, %v12854_v5, 0.0 }
0x1a76   : > { %v7494_v43 = vpop.f32.mrb[84].mxu0 }
0x1a77   : > { %v7498_v36 = vadd.f32 %v7494_v43, %v7348_v53  ;;  %v12419_v39 = vpop.f32.mrb[85].mxu0  ;;  %v14121_v53 = vadd.f32 %v13997_v40, %v13585_v11 }
0x1a79   : > { %v8760_v35 = vsel %vm581_vm0, %v14121_v53, 0.0 }
0x1a7a   : > { %v7644_v15 = vpop.f32.mrb[86].mxu0 }
0x1a7b   : > { %v7648_v18 = vadd.f32 %v7644_v15, %v7498_v36  ;;  %v12429_v9 = vpop.f32.mrb[87].mxu0 }
0x1a7e   : > { %v7794_v56 = vpop.f32.mrb[88].mxu0 }
0x1a7f   : > { %v7798_v58 = vadd.f32 %v7794_v56, %v7648_v18  ;;  %v12439_v59 = vpop.f32.mrb[89].mxu0 }
0x1a81   : > { %v14104_v8 = vadd.f32 %v7798_v58, %v13605_v31 }
0x1a83   : > { %v8763_v19 = vsel %vm581_vm0, %v14104_v8, 0.0 }
0x1a85   : > { %v7949_v25 = vpop.f32.mrb[90].mxu0 }
0x1a86   : > { %v7950_v2 = vadd.f32 %v7949_v25, %v578_v20  ;;  %v12449_v27 = vpop.f32.mrb[91].mxu0 }
0x1a88   : > { %v8112_v61 = vsel %vm794_vm10, %v7950_v2, -inf }
0x1a89   : > { %8113 = vmax.xlane.f32.xlu1 %v8112_v61  ;;  %v8105_v63 = vpop.f32.mrb[92].mxu0 }
0x1a8a   : > { %v8106_v0 = vadd.f32 %v8105_v63, %v578_v20  ;;  %v12459_v24 = vpop.f32.mrb[93].mxu0 }
0x1a8c   : > { %v8118_v1 = vsel %vm794_vm10, %v8106_v0, -inf }
0x1a8d   : > { %8119 = vmax.xlane.f32.xlu0 %v8118_v1 }
0x1a91   : > { %8134 = vadd.xlane.f32.xlu0 %v8133_v4 }
0x1a95   : > { %8140 = vadd.xlane.f32.xlu0 %v8139_v6 }
0x1a9a   : > { %8303 = vrot.lane.b32.xlu1 %v14011_v49, %s15052_s2  ;;  %s12970_s2 = smov [#allocation2]  }
0x1a9e   : > { %8453 = vrot.lane.b32.xlu1 %v14011_v49, %s15053_s5  ;;  %s12896_s5 = sshll.u32 %s12970_s2, 4  ;;  %s12897_s5 = int_to_ptr.vmem [resolvable:$false] %s12896_s5 }
0x1a9f   : > { %p12899_p0 = scmp.lt.s32.totalorder %s14930_s23, %s12897_s5 }
0x1aab   : > { %8153 = vrot.lane.b32.xlu0 %v14011_v49, %s15049_s30 }
0x1aca   : > { %8758 = vadd.xlane.f32.xlu0 %v8757_v17 }
0x1ace   : > { %8764 = vadd.xlane.f32.xlu0 %v8763_v19 }
0x1b16   : > { %v8114_v20 = vpop.xlane.xlu1 %8113 }
0x1b17   : > { %v8122_v62 = vsub.f32 %v7950_v2, %v8114_v20 }
0x1b19   : > { %v8127_v22 = vmul.f32 1.442695, %v8122_v62 }
0x1b1a   : > { %v8120_v42 = vpop.xlane.xlu0 %8119  ;;  %v8304_v14 = vpop.permute.xlu1 %8303 }
0x1b1b   : > { %12855 = vpow2.f32 %v8127_v22  ;;  %v8124_v52 = vsub.f32 %v8106_v0, %v8120_v42 }
0x1b1d   : > { %v8131_v28 = vmul.f32 1.442695, %v8124_v52 }
0x1b1e   : > { %v8135_v38 = vpop.xlane.xlu0 %8134  ;;  %v8454_v43 = vpop.permute.xlu1 %8453 }
0x1b1f   : > { %12857 = vpow2.f32 %v8131_v28 }
0x1b20   : > { %12859 = vrcp.f32 %v8135_v38 }
0x1b22   : > { %v8141_v31 = vpop.xlane.xlu0 %8140 }
0x1b25   : > { %v12856_v3 = vpop.eup %12855 }
0x1b26   : > { %v8154_v41 = vpop.permute.xlu0 %8153  ;;  %v8136_v26 = vsel %vm794_vm10, %v12856_v3, 0.0 }
0x1b27   : > { %8137 = vadd.xlane.f32.xlu1 %v8136_v26  ;;  %12461 = vmatpush3.msra.mxu1 %v8154_v41 }
0x1b28   : > { %12470 = vmatprep.subr.mxu1 %v12956_v13 }
0x1b29   : > { %v12858_v30 = vpop.eup %12857 }
0x1b2a   : > { %v12860_v32 = vpop.eup %12859  ;;  %v8142_v33 = vsel %vm794_vm10, %v12858_v30, 0.0 }
0x1b2b   : > { %v8149_v34 = vmul.f32 %v12860_v32, %v12852_v47  ;;  %8143 = vadd.xlane.f32.xlu1 %v8142_v33  ;;  %v8856_v32 = vld [vmem:[%s14989_s12 + $0x8] sm:$0xff] }
0x1b2d   : > { %12463 = vmatmul.mubr.msk.f32.vlgmr.msra.gmra.mrb[94].mxu1 %vm794_vm10, %v8149_v34  ;;  %v8864_v34 = vld [vmem:[%s14989_s12 + $0x48] sm:$0xff] }
0x1b2e   : > { %12471 = vmatpush3.msra.mxu1 %v8304_v14  ;;  %12472 = vmatprep.mubr.msk.f32.mxu1 %vm12957_vm9, %v12956_v13 }
0x1b2f   : > { %12480 = vmatprep.subr.mxu1 %v12956_v13 }
0x1b3c   : > { %8603 = vrot.lane.b32.xlu1 %v14011_v49, %s15054_s6  ;;  %s12898_s6 = scalar_lea.vmem %s12897_s5, 1024 }
0x1b3d   : > { %p12900_p1 = scmp.lt.s32.totalorder %s12898_s6, %s12892_s28 }
0x1b3f   : > { %p12901_p2 = por %p12900_p1, %p12899_p0 }
0x1b41   : > { %p12902_p3 = pnand %p12901_p2, %p12895_p13 }
0x1b57   : > { %v8759_v1 = vpop.xlane.xlu0 %8758 }
0x1b58   : > { %v8769_v17 = vmul.f32 0.03125, %v8759_v1 }
0x1b60   : > { %8761 = vadd.xlane.f32.xlu1 %v8760_v35  ;;  %v11358_v35 = vcombine.low %v8856_v32, %v8864_v34 }
0x1bb4   : > { %v8138_v36 = vpop.xlane.xlu1 %8137 }
0x1bb5   : > { %12861 = vrcp.f32 %v8138_v36  ;;  %v8871_v36 = vld [vmem:[%s14989_s12 + $0x80] sm:$0xff] }
0x1bb6   : > { %12863 = vrcp.f32 %v8141_v31 }
0x1bb8   : > { %v8144_v39 = vpop.xlane.xlu1 %8143 }
0x1bb9   : > { %12865 = vrcp.f32 %v8144_v39  ;;  %v8879_v39 = vld [vmem:[%s14989_s12 + $0xc0] sm:$0xff] }
0x1bbc   : > { %v8604_v49 = vpop.permute.xlu1 %8603 }
0x1bbf   : > { %v12862_v15 = vpop.eup %12861 }
0x1bc0   : > { %v8150_v46 = vmul.f32 %v12862_v15, %v12856_v3  ;;  %v12864_v18 = vpop.eup %12863  ;;  %v8872_v15 = vld [vmem:[%s14989_s12 + $0x88] sm:$0xff] }
0x1bc1   : > { %v8151_v11 = vmul.f32 %v12864_v18, %v12854_v5  ;;  %v8880_v18 = vld [vmem:[%s14989_s12 + $0xc8] sm:$0xff] }
0x1bc2   : > { %12473 = vmatmul.mubr.msk.f32.vlgmr.msra.gmra.mrb[96].mxu1 %vm794_vm10, %v8150_v46  ;;  %v11373_v46 = vcombine.high %v8871_v36, %v8879_v39 }
0x1bc3   : > { %12481 = vmatpush3.msra.mxu1 %v8454_v43  ;;  %12482 = vmatprep.mubr.msk.f32.mxu1 %vm12957_vm9, %v12956_v13  ;;  %v12866_v40 = vpop.eup %12865  ;;  %v11359_v43 = vcombine.high %v8856_v32, %v8864_v34  ;;  %v8866_v34 = vld [vmem:[%s14989_s12 + $0x58] sm:$0xff] }
0x1bc4   : > { %12490 = vmatprep.subr.mxu1 %v12956_v13  ;;  %v8152_v9 = vmul.f32 %v12866_v40, %v12858_v30  ;;  %v8863_v30 = vld [vmem:[%s14989_s12 + $0x40] sm:$0xff]  ;;  %v11374_v40 = vcombine.low %v8872_v15, %v8880_v18 }
0x1bc6   : > { %12483 = vmatmul.mubr.msk.f32.vlgmr.msra.gmra.mrb[98].mxu1 %vm794_vm10, %v8151_v11  ;;  %v11372_v11 = vcombine.low %v8871_v36, %v8879_v39  ;;  %v8881_v36 = vld [vmem:[%s14989_s12 + $0xd0] sm:$0xff]  ;;  %v8874_v39 = vld [vmem:[%s14989_s12 + $0x98] sm:$0xff] }
0x1bc7   : > { %12491 = vmatpush3.msra.mxu1 %v8604_v49  ;;  %12492 = vmatprep.mubr.msk.f32.mxu1 %vm12957_vm9, %v12956_v13  ;;  %v11375_v49 = vcombine.high %v8872_v15, %v8880_v18  ;;  %v8882_v18 = vld [vmem:[%s14989_s12 + $0xd8] sm:$0xff] }
0x1bca   : > { %12493 = vmatmul.mubr.msk.f32.vlgmr.msra.gmra.mrb[100].mxu1 %vm794_vm10, %v8152_v9  ;;  %v12969_v9 = vmov 0  }
0x1bcb   : > { %9169 = vmatprep.mubr.bf16.mxu1 %v12969_v9 }
0x1bed   : > { %v8762_v48 = vpop.xlane.xlu1 %8761 }
0x1bee   : > { %v8770_v56 = vmul.f32 0.03125, %v8762_v48 }
0x1bf0   : > { %v14134_v12 = vsub.f32 %v14121_v53, %v8770_v56 }
0x1bf2   : > { %v8778_v57 = vmul.f32 %v14134_v12, %v14134_v12 }
0x1bf4   : > { %v8784_v58 = vsel %vm581_vm0, %v8778_v57, 0.0 }
0x1bf5   : > { %8785 = vadd.xlane.f32.xlu1 %v8784_v58 }
0x1c00   : > { %v8225_v59 = vpop.f32.mrb[94].mxu1 }
0x1c01   : > { %v12464_v60 = vpop.f32.mrb[95].mxu1  ;;  %12468 = vmatmul.mubr.msk.f32.vlgmr.msra.gmra.mrb[94].mxu0 %vm794_vm10, %v8225_v59 }
0x1c02   : > { %12476 = vmatpush3.msra.mxu0 %v13853_v10  ;;  %12477 = vmatprep.mubr.msk.f32.mxu0 %vm12957_vm9, %v12956_v13 }
0x1c03   : > { %12485 = vmatprep.subr.mxu0 %v12956_v13 }
0x1c82   : > { %v8786_v48 = vpop.xlane.xlu1 %8785 }
0x1c83   : > { %v8794_v56 = vmul.f32 0.032258064, %v8786_v48  ;;  %v8867_v48 = vld [vmem:[%s14989_s12 + $0x60] sm:$0xff] }
0x1c85   : > { %12867 = vrsqrt.f32 %v8794_v56  ;;  %vm8806_vm4 = vcmp.eq.f32.partialorder %v8794_v56, inf  ;;  %vm8808_vm5 = vcmp.eq.f32.partialorder %v8794_v56, 0.0 }
0x1c8f   : > { %v12868_v59 = vpop.eup %12867 }
0x1c95   : > { %v8375_v25 = vpop.f32.mrb[96].mxu1 }
0x1c96   : > { %v12474_v2 = vpop.f32.mrb[97].mxu1  ;;  %12478 = vmatmul.mubr.msk.f32.vlgmr.msra.gmra.mrb[96].mxu0 %vm794_vm10, %v8375_v25 }
0x1c97   : > { %12486 = vmatpush3.msra.mxu0 %v13863_v29  ;;  %12487 = vmatprep.mubr.msk.f32.mxu0 %vm12957_vm9, %v12956_v13 }
0x1c98   : > { %12495 = vmatprep.subr.mxu0 %v12956_v13 }
0x1c99   : > { %v8525_v27 = vpop.f32.mrb[98].mxu1 }
0x1c9a   : > { %v12484_v61 = vpop.f32.mrb[99].mxu1  ;;  %12488 = vmatmul.mubr.msk.f32.vlgmr.msra.gmra.mrb[98].mxu0 %vm794_vm10, %v8525_v27 }
0x1c9b   : > { %12496 = vmatpush3.msra.mxu0 %v13873_v21  ;;  %12497 = vmatprep.mubr.msk.f32.mxu0 %vm12957_vm9, %v12956_v13  ;;  %v8765_v21 = vpop.xlane.xlu0 %8764  ;;  %v14156_v13 = vsub.f32 %v14101_v16, %v8769_v17  ;;  %v8805_v61 = vmul.f32 %v12868_v59, %v8794_v56 }
0x1c9c   : > { %v8771_v22 = vmul.f32 0.03125, %v8765_v21  ;;  %9190 = vmatprep.subr.bf16.mxu0 %v11359_v43  ;;  %v8873_v43 = vld [vmem:[%s14989_s12 + $0x90] sm:$0xff] }
0x1c9d   : > { %v8675_v10 = vpop.f32.mrb[100].mxu1  ;;  %v8777_v31 = vmul.f32 %v14156_v13, %v14156_v13  ;;  %v11376_v15 = vcombine.low %v8873_v43, %v8881_v36 }
0x1c9e   : > { %v12494_v63 = vpop.f32.mrb[101].mxu1  ;;  %12498 = vmatmul.mubr.msk.f32.vlgmr.msra.gmra.mrb[100].mxu0 %vm794_vm10, %v8675_v10 }
0x1c9f   : > { %v8781_v3 = vsel %vm581_vm0, %v8777_v31, 0.0  ;;  %9191 = vmatpush1.bf16.msra.mxu0 %v11358_v35  ;;  %9222 = vmatprep.mubr.bf16.mxu0 %v12969_v9  ;;  %v8807_v63 = vsel %vm8806_vm4, %v8794_v56, %v8805_v61 }
0x1ca0   : > { %9192 = vmatprep.subr.bf16.mxu0 %v11375_v49  ;;  %v8859_v49 = vld [vmem:[%s14989_s12 + $0x20] sm:$0xff] }
0x1ca1   : > { %v11364_v59 = vcombine.low %v8859_v49, %v8867_v48 }
0x1ca3   : > { %9193 = vmatpush1.bf16.msra.mxu0 %v11374_v40  ;;  %v11379_v40 = vcombine.high %v8874_v39, %v8882_v18 }
0x1cd4   : > { %v8298_v0 = vpop.f32.mrb[94].mxu0 }
0x1cd5   : > { %v12469_v29 = vpop.f32.mrb[95].mxu0  ;;  %v8302_v24 = vadd.f32 %v8298_v0, %v13902_v45  ;;  %v14162_v45 = vsub.f32 %v14104_v8, %v8771_v22  ;;  %v8809_v0 = vand.u32 2147483648, %v8794_v56  ;;  %v8860_v56 = vld [vmem:[%s14989_s12 + $0x28] sm:$0xff] }
0x1cd7   : > { %v8779_v41 = vmul.f32 %v14162_v45, %v14162_v45  ;;  %v8810_v29 = vsel %vm8808_vm5, %v8809_v0, %v8807_v63 }
0x1cd9   : > { %v8787_v26 = vsel %vm581_vm0, %v8779_v41, 0.0 }
0x1d69   : > { %v8448_v47 = vpop.f32.mrb[96].mxu0 }
0x1d6a   : > { %v8452_v4 = vadd.f32 %v8448_v47, %v8302_v24  ;;  %v12479_v5 = vpop.f32.mrb[97].mxu0  ;;  %v8834_v24 = vadd.f32 1e-06, %v8810_v29 }
0x1d6d   : > { %v8598_v6 = vpop.f32.mrb[98].mxu0 }
0x1d6e   : > { %v8602_v19 = vadd.f32 %v8598_v6, %v8452_v4  ;;  %v12489_v20 = vpop.f32.mrb[99].mxu0 }
0x1d6f   : > { %v12890_v20 = vld [vmem:[%s14981_s4] sm:$0xff] }
0x1d71   : > { %v8748_v62 = vpop.f32.mrb[100].mxu0 }
0x1d72   : > { %v8752_v42 = vadd.f32 %v8748_v62, %v8602_v19  ;;  %v12499_v52 = vpop.f32.mrb[101].mxu0  ;;  %v14205_v19 = vsub.s32 4, %v13150_v44  ;;  %v14214_v62 = vsub.s32 5, %v13150_v44  ;;  %v8857_v44 = vld [vmem:[%s14989_s12 + $0x10] sm:$0xff] }
0x1d74   : > { %v14159_v28 = vadd.f32 %v8752_v42, %v13703_v51  ;;  %v8855_v51 = vld [vmem:[%s14989_s12] sm:$0xff]  ;;  %v14211_v21 = vrot.slane %v12890_v20, %v14205_v19  ;;  %v14221_v31 = vrot.slane %v12890_v20, %v14214_v62 }
0x1d75   : > { %v11357_v33 = vcombine.high %v8855_v51, %v8863_v30  ;;  %v11356_v14 = vcombine.low %v8855_v51, %v8863_v30 }
0x1d76   : > { %v8766_v38 = vsel %vm581_vm0, %v14159_v28, 0.0  ;;  %v8830_v42 = vmul.f32 %v14211_v21, %v14134_v12  ;;  %v8829_v52 = vmul.f32 %v14211_v21, %v14156_v13  ;;  %v8865_v12 = vld [vmem:[%s14989_s12 + $0x50] sm:$0xff]  ;;  %v8858_v13 = vld [vmem:[%s14989_s12 + $0x18] sm:$0xff] }
0x1d77   : > { %8767 = vadd.xlane.f32.xlu0 %v8766_v38  ;;  %9137 = vmatprep.subr.bf16.mxu1 %v11357_v33  ;;  %v11360_v32 = vcombine.low %v8857_v44, %v8865_v12  ;;  %v11361_v33 = vcombine.high %v8857_v44, %v8865_v12  ;;  %v11363_v35 = vcombine.high %v8858_v13, %v8866_v34 }
0x1d78   : > { %9138 = vmatpush1.bf16.msra.mxu1 %v11356_v14  ;;  %v11362_v14 = vcombine.low %v8858_v13, %v8866_v34  ;;  %v8861_v34 = vld [vmem:[%s14989_s12 + $0x30] sm:$0xff] }
0x1d79   : > { %9139 = vmatprep.subr.bf16.mxu1 %v11373_v46  ;;  %9296 = vmatprep.subr.bf16.mxu0 %v11363_v35  ;;  %v11377_v46 = vcombine.high %v8873_v43, %v8881_v36  ;;  %v8862_v35 = vld [vmem:[%s14989_s12 + $0x38] sm:$0xff] }
0x1d7a   : > { %v8870_v43 = vld [vmem:[%s14989_s12 + $0x78] sm:$0xff] }
0x1d7b   : > { %8782 = vadd.xlane.f32.xlu0 %v8781_v3 }
0x1d7c   : > { %9140 = vmatpush1.bf16.msra.mxu1 %v11372_v11  ;;  %v11378_v11 = vcombine.low %v8874_v39, %v8882_v18  ;;  %v8877_v18 = vld [vmem:[%s14989_s12 + $0xb0] sm:$0xff] }
0x1d7d   : > { %9243 = vmatprep.subr.bf16.mxu1 %v11361_v33 }
0x1d7f   : > { %8788 = vadd.xlane.f32.xlu0 %v8787_v26 }
0x1e04   : > { %v8768_v57 = vpop.xlane.xlu0 %8767 }
0x1e05   : > { %v8772_v58 = vmul.f32 0.03125, %v8768_v57  ;;  %v11365_v57 = vcombine.high %v8859_v49, %v8867_v48  ;;  %v8886_v49 = vld [vmem:[%s14989_s12 + $0xf8] sm:$0xff] }
0x1e07   : > { %v14199_v60 = vsub.f32 %v14159_v28, %v8772_v58  ;;  %v8868_v58 = vld [vmem:[%s14989_s12 + $0x68] sm:$0xff] }
0x1e08   : > { %v8783_v25 = vpop.xlane.xlu0 %8782 }
0x1e09   : > { %v8793_v2 = vmul.f32 0.032258064, %v8783_v25  ;;  %v8780_v27 = vmul.f32 %v14199_v60, %v14199_v60  ;;  %v11366_v25 = vcombine.low %v8860_v56, %v8868_v58 }
0x1e0b   : > { %12869 = vrsqrt.f32 %v8793_v2  ;;  %v8790_v10 = vsel %vm581_vm0, %v8780_v27, 0.0  ;;  %vm8799_vm6 = vcmp.eq.f32.partialorder %v8793_v2, inf  ;;  %v8802_v4 = vand.u32 2147483648, %v8793_v2 }
0x1e0c   : > { %8791 = vadd.xlane.f32.xlu1 %v8790_v10  ;;  %12871 = vrcp.f32 %v8834_v24  ;;  %vm8801_vm7 = vcmp.eq.f32.partialorder %v8793_v2, 0.0  ;;  %v8789_v27 = vpop.xlane.xlu0 %8788 }
0x1e0d   : > { %v8795_v61 = vmul.f32 0.032258064, %v8789_v27  ;;  %v12580_v27 = vld [vmem:[%s14991_s14 + $0xc0] sm:$0xff]  }
0x1e0f   : > { %vm8813_vm8 = vcmp.eq.f32.partialorder %v8795_v61, inf  ;;  %vm8815_vm9 = vcmp.eq.f32.partialorder %v8795_v61, 0.0 }
0x1e15   : > { %v12870_v1 = vpop.eup %12869 }
0x1e16   : > { %v8798_v47 = vmul.f32 %v12870_v1, %v8793_v2  ;;  %v12872_v22 = vpop.eup %12871  ;;  %v8816_v1 = vand.u32 2147483648, %v8795_v61 }
0x1e17   : > { %v8842_v38 = vmul.f32 %v12872_v22, %v8830_v42 }
0x1e18   : > { %v8800_v5 = vsel %vm8799_vm6, %v8793_v2, %v8798_v47  ;;  %v11367_v2 = vcombine.high %v8860_v56, %v8868_v58  ;;  %v11370_v56 = vcombine.low %v8862_v35, %v8870_v43 }
0x1e19   : > { %v8803_v6 = vsel %vm8801_vm7, %v8802_v4, %v8800_v5  ;;  %v8850_v51 = vadd.f32 %v14221_v31, %v8842_v38  ;;  %v8831_v38 = vmul.f32 %v14211_v21, %v14162_v45  ;;  %v8875_v45 = vld [vmem:[%s14989_s12 + $0xa0] sm:$0xff] }
0x1e1a   : > { %v8833_v17 = vadd.f32 1e-06, %v8803_v6 }
0x1e1c   : > { %12873 = vrcp.f32 %v8833_v17 }
0x1e1d   : > { %12875 = vrsqrt.f32 %v8795_v61 }
0x1e26   : > { %v12874_v3 = vpop.eup %12873 }
0x1e27   : > { %v8841_v41 = vmul.f32 %v12874_v3, %v8829_v52  ;;  %v12876_v10 = vpop.eup %12875  ;;  %v8832_v3 = vmul.f32 %v14211_v21, %v14199_v60  ;;  %v8883_v60 = vld [vmem:[%s14989_s12 + $0xe0] sm:$0xff]  ;;  %v8876_v21 = vld [vmem:[%s14989_s12 + $0xa8] sm:$0xff] }
0x1e28   : > { %v8812_v29 = vmul.f32 %v12876_v10, %v8795_v61  ;;  %v11380_v36 = vcombine.low %v8875_v45, %v8883_v60  ;;  %v12582_v10 = vld [vmem:[%s14991_s14 + $0x80] sm:$0xff]  }
0x1e29   : > { %v8849_v26 = vadd.f32 %v14221_v31, %v8841_v41 }
0x1e2a   : > { %v8814_v24 = vsel %vm8813_vm8, %v8795_v61, %v8812_v29  ;;  %v12581_v61 = vld [vmem:[%s14991_s14] sm:$0xff]   ;;  %v12585_v29 = vld [vmem:[%s14991_s14 + $0x8] sm:$0xff]  }
0x1e2b   : > { %v14225_v30 = vpack.c.bf16 %v8850_v51, %v8849_v26  ;;  %v8817_v47 = vsel %vm8815_vm9, %v8816_v1, %v8814_v24  ;;  %v12586_v24 = vld [vmem:[%s14991_s14 + $0x88] sm:$0xff]   ;;  %v12587_v1 = vld [vmem:[%s14991_s14 + $0x50] sm:$0xff]  }
0x1e2c   : > { %v8835_v4 = vadd.f32 1e-06, %v8817_v47  ;;  %v12589_v47 = vld [vmem:[%s14991_s14 + $0x10] sm:$0xff]  }
0x1e2d   : > { %11388 = vmatmul.mubr.msk.bf16.vlgmr.msra.gmra.mrb[104].mxu1 %vm581_vm0, %v14225_v30  ;;  %11390 = vmatmul.mubr.msk.bf16.vlgmr.msra.gmra.mrb[104].mxu0 %vm581_vm0, %v14225_v30 }
0x1e2e   : > { %9179 = vmatprep.mubr.bf16.mxu1 %v12969_v9  ;;  %9232 = vmatprep.mubr.bf16.mxu0 %v12969_v9 }
0x1e2f   : > { %9244 = vmatpush1.bf16.msra.mxu1 %v11360_v32  ;;  %9297 = vmatpush1.bf16.msra.mxu0 %v11362_v14  ;;  %v11381_v32 = vcombine.high %v8875_v45, %v8883_v60  ;;  %v8869_v14 = vld [vmem:[%s14989_s12 + $0x70] sm:$0xff] }
0x1e30   : > { %9245 = vmatprep.subr.bf16.mxu1 %v11377_v46  ;;  %9298 = vmatprep.subr.bf16.mxu0 %v11379_v40  ;;  %v11371_v46 = vcombine.high %v8862_v35, %v8870_v43  ;;  %v8878_v40 = vld [vmem:[%s14989_s12 + $0xb8] sm:$0xff]  ;;  %v11368_v48 = vcombine.low %v8861_v34, %v8869_v14  ;;  %v12606_v45 = vld [vmem:[%s14991_s14 + $0xb0] sm:$0xff]  }
0x1e31   : > { %v11387_v58 = vcombine.high %v8878_v40, %v8886_v49  ;;  %v12609_v43 = vld [vmem:[%s14991_s14 + $0x38] sm:$0xff]  }
0x1e33   : > { %9246 = vmatpush1.bf16.msra.mxu1 %v11376_v15  ;;  %9299 = vmatpush1.bf16.msra.mxu0 %v11378_v11  ;;  %v11369_v15 = vcombine.high %v8861_v34, %v8869_v14  ;;  %v8885_v11 = vld [vmem:[%s14989_s12 + $0xf0] sm:$0xff] }
0x1e34   : > { %9349 = vmatprep.subr.bf16.mxu1 %v11365_v57  ;;  %9402 = vmatprep.subr.bf16.mxu0 %v11367_v2  ;;  %v11385_v57 = vcombine.high %v8877_v18, %v8885_v11  ;;  %v12579_v2 = vld [vmem:[%s14991_s14 + $0x40] sm:$0xff]  }
0x1e99   : > { %v8792_v63 = vpop.xlane.xlu1 %8791 }
0x1e9a   : > { %v8796_v0 = vmul.f32 0.032258064, %v8792_v63  ;;  %v12583_v63 = vld [vmem:[%s14991_s14 + $0x48] sm:$0xff]  }
0x1e9c   : > { %12877 = vrsqrt.f32 %v8796_v0  ;;  %vm8820_vm10 = vcmp.eq.f32.partialorder %v8796_v0, inf  ;;  %v8823_v17 = vand.u32 2147483648, %v8796_v0  ;;  %vm8822_vm11 = vcmp.eq.f32.partialorder %v8796_v0, 0.0 }
0x1e9d   : > { %12879 = vrcp.f32 %v8835_v4  ;;  %v12591_v4 = vld [vmem:[%s14991_s14 + $0x58] sm:$0xff]  }
0x1ea6   : > { %v12878_v5 = vpop.eup %12877 }
0x1ea7   : > { %v8819_v6 = vmul.f32 %v12878_v5, %v8796_v0  ;;  %v12880_v52 = vpop.eup %12879  ;;  %v12592_v5 = vld [vmem:[%s14991_s14 + $0xd8] sm:$0xff]  }
0x1ea8   : > { %v8843_v41 = vmul.f32 %v12880_v52, %v8831_v38  ;;  %v12598_v52 = vld [vmem:[%s14991_s14 + $0xa0] sm:$0xff]   ;;  %v12599_v38 = vld [vmem:[%s14991_s14 + $0x68] sm:$0xff]  }
0x1ea9   : > { %v8821_v20 = vsel %vm8820_vm10, %v8796_v0, %v8819_v6  ;;  %v12584_v0 = vld [vmem:[%s14991_s14 + $0xc8] sm:$0xff]   ;;  %v12593_v6 = vld [vmem:[%s14991_s14 + $0x18] sm:$0xff]  }
0x1eaa   : > { %v8824_v22 = vsel %vm8822_vm11, %v8823_v17, %v8821_v20  ;;  %v8851_v44 = vadd.f32 %v14221_v31, %v8843_v41  ;;  %v12594_v17 = vld [vmem:[%s14991_s14 + $0x98] sm:$0xff]   ;;  %v12595_v20 = vld [vmem:[%s14991_s14 + $0x60] sm:$0xff]   ;;  %v12601_v41 = vld [vmem:[%s14991_s14 + $0x28] sm:$0xff]  }
0x1eab   : > { %v8836_v42 = vadd.f32 1e-06, %v8824_v22  ;;  %v12596_v22 = vld [vmem:[%s14991_s14 + $0xe0] sm:$0xff]  }
0x1ead   : > { %12881 = vrcp.f32 %v8836_v42  ;;  %v12597_v42 = vld [vmem:[%s14991_s14 + $0x20] sm:$0xff]  }
0x1eb7   : > { %v12882_v26 = vpop.eup %12881 }
0x1eb8   : > { %v8844_v51 = vmul.f32 %v12882_v26, %v8832_v3  ;;  %v12600_v3 = vld [vmem:[%s14991_s14 + $0xe8] sm:$0xff]  }
0x1eb9   : > { %v12602_v26 = vld [vmem:[%s14991_s14 + $0xa8] sm:$0xff]  }
0x1eba   : > { %v8852_v12 = vadd.f32 %v14221_v31, %v8844_v51  ;;  %v8884_v31 = vld [vmem:[%s14989_s12 + $0xe8] sm:$0xff]  ;;  %v12603_v51 = vld [vmem:[%s14991_s14 + $0x70] sm:$0xff]  }
0x1ebb   : > { %v11383_v33 = vcombine.high %v8876_v21, %v8884_v31  ;;  %v11382_v39 = vcombine.low %v8876_v21, %v8884_v31  ;;  %v12607_v31 = vld [vmem:[%s14991_s14 + $0x78] sm:$0xff]  }
0x1ebc   : > { %v14275_v13 = vpack.c.bf16 %v8852_v12, %v8851_v44  ;;  %v12604_v44 = vld [vmem:[%s14991_s14 + $0xf0] sm:$0xff]   ;;  %v14434_v12 = vld [vmem:[%s14990_s13] sm:$0xff] }
0x1ebd   : > { %v14444_v60 = vrot.slane %v14434_v12, %v13153_v50  ;;  %v14448_v21 = vrot.slane %v14434_v12, %v13611_v37  ;;  %v14462_v34 = vrot.slane %v14434_v12, %v13628_v54 }
0x1ebe   : > { %11389 = vmatmul.mubr.msk.bf16.gmra.mrb[108].mxu1 %vm581_vm0, %v14275_v13  ;;  %11391 = vmatmul.mubr.msk.bf16.gmra.mrb[108].mxu0 %vm581_vm0, %v14275_v13 }
0x1ebf   : > { %9275 = vmatprep.mubr.bf16.mxu1 %v12969_v9  ;;  %9328 = vmatprep.mubr.bf16.mxu0 %v12969_v9 }
0x1ec6   : > { %11392 = vmatmul.mubr.msk.bf16.vlgmr.msra.gmra.mrb[112].mxu1 %vm581_vm0, %v14225_v30  ;;  %11394 = vmatmul.mubr.msk.bf16.vlgmr.msra.gmra.mrb[112].mxu0 %vm581_vm0, %v14225_v30 }
0x1ec7   : > { %9285 = vmatprep.mubr.bf16.mxu1 %v12969_v9  ;;  %9338 = vmatprep.mubr.bf16.mxu0 %v12969_v9 }
0x1ec8   : > { %9350 = vmatpush1.bf16.msra.mxu1 %v11364_v59  ;;  %9403 = vmatpush1.bf16.msra.mxu0 %v11366_v25  ;;  %v11384_v59 = vcombine.low %v8877_v18, %v8885_v11  ;;  %v11386_v25 = vcombine.low %v8878_v40, %v8886_v49  ;;  %v12611_v11 = vld [vmem:[%s14991_s14 + $0x140] sm:$0xff]  }
0x1ec9   : > { %9351 = vmatprep.subr.bf16.mxu1 %v11381_v32  ;;  %9404 = vmatprep.subr.bf16.mxu0 %v11383_v33  ;;  %v12608_v32 = vld [vmem:[%s14991_s14 + $0xf8] sm:$0xff]   ;;  %v14458_v33 = vrot.slane %v14434_v12, %v13163_v55  ;;  %v12612_v40 = vld [vmem:[%s14991_s14 + $0x1c0] sm:$0xff]  }
0x1ecc   : > { %9352 = vmatpush1.bf16.msra.mxu1 %v11380_v36  ;;  %9405 = vmatpush1.bf16.msra.mxu0 %v11382_v39  ;;  %v12610_v36 = vld [vmem:[%s14991_s14 + $0xb8] sm:$0xff]  }
0x1ecd   : > { %9455 = vmatprep.subr.bf16.mxu1 %v11369_v15  ;;  %9508 = vmatprep.subr.bf16.mxu0 %v11371_v46 }
0x1ece   : > { %11393 = vmatmul.mubr.msk.bf16.gmra.mrb[116].mxu1 %vm581_vm0, %v14275_v13  ;;  %11395 = vmatmul.mubr.msk.bf16.gmra.mrb[116].mxu0 %vm581_vm0, %v14275_v13 }
0x1ecf   : > { %9381 = vmatprep.mubr.bf16.mxu1 %v12969_v9  ;;  %9434 = vmatprep.mubr.bf16.mxu0 %v12969_v9 }
0x1ed6   : > { %11396 = vmatmul.mubr.msk.bf16.vlgmr.msra.gmra.mrb[120].mxu1 %vm581_vm0, %v14225_v30  ;;  %11398 = vmatmul.mubr.msk.bf16.vlgmr.msra.gmra.mrb[120].mxu0 %vm581_vm0, %v14225_v30 }
0x1ed7   : > { %9391 = vmatprep.mubr.bf16.mxu1 %v12969_v9  ;;  %9444 = vmatprep.mubr.bf16.mxu0 %v12969_v9 }
0x1ed8   : > { %9456 = vmatpush1.bf16.msra.mxu1 %v11368_v48  ;;  %9509 = vmatpush1.bf16.msra.mxu0 %v11370_v56 }
0x1ed9   : > { %9457 = vmatprep.subr.bf16.mxu1 %v11385_v57  ;;  %9510 = vmatprep.subr.bf16.mxu0 %v11387_v58 }
0x1edc   : > { %9458 = vmatpush1.bf16.msra.mxu1 %v11384_v59  ;;  %9511 = vmatpush1.bf16.msra.mxu0 %v11386_v25 }
0x1edd   : > { %11754 = vmatprep.subr.bf16.mxu1 %v12579_v2  ;;  %11782 = vmatprep.subr.bf16.mxu0 %v12580_v27 }
0x1ede   : > { %11397 = vmatmul.mubr.msk.bf16.gmra.mrb[124].mxu1 %vm581_vm0, %v14275_v13  ;;  %11399 = vmatmul.mubr.msk.bf16.gmra.mrb[124].mxu0 %vm581_vm0, %v14275_v13 }
0x1edf   : > { %9487 = vmatprep.mubr.bf16.mxu1 %v12969_v9  ;;  %9540 = vmatprep.mubr.bf16.mxu0 %v12969_v9 }
0x1ee6   : > { %11400 = vmatmul.mubr.msk.bf16.vlgmr.msra.gmra.mrb[128].mxu1 %vm581_vm0, %v14225_v30  ;;  %11402 = vmatmul.mubr.msk.bf16.vlgmr.msra.gmra.mrb[128].mxu0 %vm581_vm0, %v14225_v30  ;;  %v12588_v30 = vld [vmem:[%s14991_s14 + $0xd0] sm:$0xff]  }
0x1ee7   : > { %11755 = vmatpush3.bf16.msra.mxu1 %v12581_v61  ;;  %11783 = vmatpush3.bf16.msra.mxu0 %v12582_v10 }
0x1ee8   : > { %9497 = vmatprep.mubr.bf16.mxu1 %v12969_v9  ;;  %9550 = vmatprep.mubr.bf16.mxu0 %v12969_v9  ;;  %v12590_v9 = vld [vmem:[%s14991_s14 + $0x90] sm:$0xff]  }
0x1ee9   : > { %11756 = vmatprep.subr.bf16.mxu1 %v12583_v63  ;;  %11784 = vmatprep.subr.bf16.mxu0 %v12584_v0 }
0x1eeb   : > { %11757 = vmatpush3.bf16.msra.mxu1 %v12585_v29  ;;  %11785 = vmatpush3.bf16.msra.mxu0 %v12586_v24 }
0x1eec   : > { %11758 = vmatprep.subr.bf16.mxu1 %v12587_v1  ;;  %11786 = vmatprep.subr.bf16.mxu0 %v12588_v30 }
0x1eee   : > { %11401 = vmatmul.mubr.msk.bf16.gmra.mrb[132].mxu1 %vm581_vm0, %v14275_v13  ;;  %11403 = vmatmul.mubr.msk.bf16.gmra.mrb[132].mxu0 %vm581_vm0, %v14275_v13  ;;  %v12605_v13 = vld [vmem:[%s14991_s14 + $0x30] sm:$0xff]  }
0x1eef   : > { %11759 = vmatpush3.bf16.msra.mxu1 %v12589_v47  ;;  %11787 = vmatpush3.bf16.msra.mxu0 %v12590_v9 }
0x1ef0   : > { %11760 = vmatprep.subr.bf16.mxu1 %v12591_v4  ;;  %11788 = vmatprep.subr.bf16.mxu0 %v12592_v5 }
0x1ef3   : > { %11761 = vmatpush3.bf16.msra.mxu1 %v12593_v6  ;;  %11789 = vmatpush3.bf16.msra.mxu0 %v12594_v17  ;;  %v12613_v17 = vld [vmem:[%s14991_s14 + $0x100] sm:$0xff]  }
0x1ef4   : > { %11762 = vmatprep.subr.bf16.mxu1 %v12595_v20  ;;  %11790 = vmatprep.subr.bf16.mxu0 %v12596_v22  ;;  %v12614_v20 = vld [vmem:[%s14991_s14 + $0x180] sm:$0xff]   ;;  %v12615_v22 = vld [vmem:[%s14991_s14 + $0x148] sm:$0xff]  }
0x1ef7   : > { %11763 = vmatpush3.bf16.msra.mxu1 %v12597_v42  ;;  %11791 = vmatpush3.bf16.msra.mxu0 %v12598_v52  ;;  %v12616_v42 = vld [vmem:[%s14991_s14 + $0x1c8] sm:$0xff]  }
0x1ef8   : > { %11764 = vmatprep.subr.bf16.mxu1 %v12599_v38  ;;  %11792 = vmatprep.subr.bf16.mxu0 %v12600_v3  ;;  %v12617_v52 = vld [vmem:[%s14991_s14 + $0x108] sm:$0xff]   ;;  %v12619_v3 = vld [vmem:[%s14991_s14 + $0x150] sm:$0xff]  }
0x1ef9   : > { %v12618_v38 = vld [vmem:[%s14991_s14 + $0x188] sm:$0xff]  }
0x1efb   : > { %11765 = vmatpush3.bf16.msra.mxu1 %v12601_v41  ;;  %11793 = vmatpush3.bf16.msra.mxu0 %v12602_v26  ;;  %v12620_v41 = vld [vmem:[%s14991_s14 + $0x1d0] sm:$0xff]  }
0x1efc   : > { %11766 = vmatprep.subr.bf16.mxu1 %v12603_v51  ;;  %11794 = vmatprep.subr.bf16.mxu0 %v12604_v44  ;;  %v12621_v26 = vld [vmem:[%s14991_s14 + $0x110] sm:$0xff]   ;;  %v12623_v44 = vld [vmem:[%s14991_s14 + $0x158] sm:$0xff]  }
0x1efd   : > { %v12622_v51 = vld [vmem:[%s14991_s14 + $0x190] sm:$0xff]  }
0x1eff   : > { %11767 = vmatpush3.bf16.msra.mxu1 %v12605_v13  ;;  %11795 = vmatpush3.bf16.msra.mxu0 %v12606_v45  ;;  %v12624_v13 = vld [vmem:[%s14991_s14 + $0x1d8] sm:$0xff]  }
0x1f00   : > { %v9171_v14 = vpop.f32.mrb[104].mxu1  ;;  %v9224_v35 = vpop.f32.mrb[104].mxu0  ;;  %11768 = vmatprep.subr.bf16.mxu1 %v12607_v31  ;;  %11796 = vmatprep.subr.bf16.mxu0 %v12608_v32  ;;  %v12625_v45 = vld [vmem:[%s14991_s14 + $0x118] sm:$0xff]   ;;  %v12627_v32 = vld [vmem:[%s14991_s14 + $0x160] sm:$0xff]  }
0x1f01   : > { %v9172_v39 = vadd.f32 %v9171_v14, %v14444_v60  ;;  %v9225_v15 = vadd.f32 %v9224_v35, %v14448_v21  ;;  %v9173_v46 = vpop.f32.mrb[105].mxu1  ;;  %v9226_v18 = vpop.f32.mrb[105].mxu0  ;;  %v12626_v31 = vld [vmem:[%s14991_s14 + $0x198] sm:$0xff]   ;;  %v12628_v14 = vld [vmem:[%s14991_s14 + $0x1e0] sm:$0xff]  }
0x1f02   : > { %v9174_v49 = vadd.f32 %v9173_v46, %v14458_v33  ;;  %v9227_v48 = vadd.f32 %v9226_v18, %v14462_v34  ;;  %v9175_v56 = vpop.f32.mrb[106].mxu1  ;;  %v9228_v57 = vpop.f32.mrb[106].mxu0  ;;  %v12629_v35 = vld [vmem:[%s14991_s14 + $0x120] sm:$0xff]   ;;  %v12634_v46 = vld [vmem:[%s14991_s14 + $0x1a8] sm:$0xff]   ;;  %v12635_v18 = vld [vmem:[%s14991_s14 + $0x170] sm:$0xff]  }
0x1f03   : > { %v9176_v58 = vadd.f32 %v9175_v56, %v14444_v60  ;;  %v9229_v59 = vadd.f32 %v9228_v57, %v14448_v21  ;;  %v9177_v25 = vpop.f32.mrb[107].mxu1  ;;  %v9230_v2 = vpop.f32.mrb[107].mxu0  ;;  %11769 = vmatpush3.bf16.msra.mxu1 %v12609_v43  ;;  %11797 = vmatpush3.bf16.msra.mxu0 %v12610_v36  ;;  %v9561_v10 = vmax.f32 %v9172_v39, 0.0  ;;  %v9563_v63 = vmax.f32 %v9225_v15, 0.0  ;;  %v12630_v43 = vld [vmem:[%s14991_s14 + $0x1a0] sm:$0xff]   ;;  %v12631_v36 = vld [vmem:[%s14991_s14 + $0x168] sm:$0xff]  }
0x1f04   : > { %v9178_v27 = vadd.f32 %v9177_v25, %v14458_v33  ;;  %v9231_v61 = vadd.f32 %v9230_v2, %v14462_v34  ;;  %11810 = vmatprep.subr.bf16.mxu1 %v12611_v11  ;;  %11838 = vmatprep.subr.bf16.mxu0 %v12612_v40  ;;  %v9562_v24 = vmax.f32 %v9174_v49, 0.0  ;;  %v9564_v1 = vmax.f32 %v9227_v48, 0.0  ;;  %v12632_v39 = vld [vmem:[%s14991_s14 + $0x1e8] sm:$0xff]   ;;  %v12636_v11 = vld [vmem:[%s14991_s14 + $0x1f0] sm:$0xff]   ;;  %v12639_v48 = vld [vmem:[%s14991_s14 + $0x178] sm:$0xff]  }
0x1f05   : > { %v9577_v0 = vmax.f32 %v9176_v58, 0.0  ;;  %v9579_v29 = vmax.f32 %v9229_v59, 0.0  ;;  %v12633_v15 = vld [vmem:[%s14991_s14 + $0x128] sm:$0xff]   ;;  %v12637_v40 = vld [vmem:[%s14991_s14 + $0x130] sm:$0xff]   ;;  %v12640_v56 = vld [vmem:[%s14991_s14 + $0x1f8] sm:$0xff]  }
0x1f06   : > { %v9578_v30 = vmax.f32 %v9178_v27, 0.0  ;;  %v9580_v47 = vmax.f32 %v9231_v61, 0.0  ;;  %v12638_v49 = vld [vmem:[%s14991_s14 + $0x1b0] sm:$0xff]   ;;  %v12641_v57 = vld [vmem:[%s14991_s14 + $0x138] sm:$0xff]   ;;  %v12643_v59 = vld [vmem:[%s14991_s14 + $0x240] sm:$0xff]  }
0x1f07   : > { %v9625_v9 = vpack.c.bf16 %v9577_v0, %v9561_v10  ;;  %v9627_v4 = vpack.c.bf16 %v9579_v29, %v9563_v63  ;;  %v12642_v58 = vld [vmem:[%s14991_s14 + $0x1b8] sm:$0xff]   ;;  %v12644_v25 = vld [vmem:[%s14991_s14 + $0x2c0] sm:$0xff]  }
0x1f08   : > { %v9626_v5 = vpack.c.bf16 %v9578_v30, %v9562_v24  ;;  %v9628_v6 = vpack.c.bf16 %v9580_v47, %v9564_v1 }
0x1f0a   : > { %10713 = vmatprep.mubr.bf16.mxu1 %v9626_v5  ;;  %10762 = vmatprep.mubr.bf16.mxu0 %v9628_v6  ;;  %v14588_v6 = vrot.slane %v14434_v12, %v14205_v19 }
0x1f0b   : > { %10714 = vmatmul.mubr.bf16.vlgmr.msra.gmra.mrb[136].mxu1 %v9625_v9  ;;  %10763 = vmatmul.mubr.bf16.vlgmr.msra.gmra.mrb[136].mxu0 %v9627_v4 }
0x1f0c   : > { %11811 = vmatpush3.bf16.msra.mxu1 %v12613_v17  ;;  %11839 = vmatpush3.bf16.msra.mxu0 %v12614_v20  ;;  %v14592_v17 = vrot.slane %v14434_v12, %v13354_v7 }
0x1f0d   : > { %11812 = vmatprep.subr.bf16.mxu1 %v12615_v22  ;;  %11840 = vmatprep.subr.bf16.mxu0 %v12616_v42  ;;  %v14598_v42 = vrot.slane %v14434_v12, %v14214_v62 }
0x1f10   : > { %11813 = vmatpush3.bf16.msra.mxu1 %v12617_v52  ;;  %11841 = vmatpush3.bf16.msra.mxu0 %v12618_v38 }
0x1f11   : > { %11814 = vmatprep.subr.bf16.mxu1 %v12619_v3  ;;  %11842 = vmatprep.subr.bf16.mxu0 %v12620_v41 }
0x1f14   : > { %11815 = vmatpush3.bf16.msra.mxu1 %v12621_v26  ;;  %11843 = vmatpush3.bf16.msra.mxu0 %v12622_v51 }
0x1f15   : > { %11816 = vmatprep.subr.bf16.mxu1 %v12623_v44  ;;  %11844 = vmatprep.subr.bf16.mxu0 %v12624_v13 }
0x1f18   : > { %11817 = vmatpush3.bf16.msra.mxu1 %v12625_v45  ;;  %11845 = vmatpush3.bf16.msra.mxu0 %v12626_v31 }
0x1f19   : > { %11818 = vmatprep.subr.bf16.mxu1 %v12627_v32  ;;  %11846 = vmatprep.subr.bf16.mxu0 %v12628_v14 }
0x1f1c   : > { %11819 = vmatpush3.bf16.msra.mxu1 %v12629_v35  ;;  %11847 = vmatpush3.bf16.msra.mxu0 %v12630_v43 }
0x1f1d   : > { %11820 = vmatprep.subr.bf16.mxu1 %v12631_v36  ;;  %11848 = vmatprep.subr.bf16.mxu0 %v12632_v39 }
0x1f20   : > { %11821 = vmatpush3.bf16.msra.mxu1 %v12633_v15  ;;  %11849 = vmatpush3.bf16.msra.mxu0 %v12634_v46 }
0x1f21   : > { %11822 = vmatprep.subr.bf16.mxu1 %v12635_v18  ;;  %11850 = vmatprep.subr.bf16.mxu0 %v12636_v11 }
0x1f24   : > { %11823 = vmatpush3.bf16.msra.mxu1 %v12637_v40  ;;  %11851 = vmatpush3.bf16.msra.mxu0 %v12638_v49 }
0x1f25   : > { %11824 = vmatprep.subr.bf16.mxu1 %v12639_v48  ;;  %11852 = vmatprep.subr.bf16.mxu0 %v12640_v56 }
0x1f28   : > { %11825 = vmatpush3.bf16.msra.mxu1 %v12641_v57  ;;  %11853 = vmatpush3.bf16.msra.mxu0 %v12642_v58 }
0x1f29   : > { %11866 = vmatprep.subr.bf16.mxu1 %v12643_v59  ;;  %11894 = vmatprep.subr.bf16.mxu0 %v12644_v25 }
0x1f91   : > { %v9181_v2 = vpop.f32.mrb[108].mxu1  ;;  %v9234_v27 = vpop.f32.mrb[108].mxu0 }
0x1f92   : > { %v9182_v61 = vadd.f32 %v9181_v2, %v14444_v60  ;;  %v9235_v10 = vadd.f32 %v9234_v27, %v14448_v21  ;;  %v9183_v63 = vpop.f32.mrb[109].mxu1  ;;  %v9236_v0 = vpop.f32.mrb[109].mxu0 }
0x1f93   : > { %v9184_v29 = vadd.f32 %v9183_v63, %v14458_v33  ;;  %v9237_v24 = vadd.f32 %v9236_v0, %v14462_v34  ;;  %v9185_v1 = vpop.f32.mrb[110].mxu1  ;;  %v9238_v30 = vpop.f32.mrb[110].mxu0  ;;  %v14615_v63 = vld [vmem:[%s14990_s13 + $0x8] sm:$0xff] }
0x1f94   : > { %v9186_v47 = vadd.f32 %v9185_v1, %v14444_v60  ;;  %v9239_v9 = vadd.f32 %v9238_v30, %v14448_v21  ;;  %v9187_v4 = vpop.f32.mrb[111].mxu1  ;;  %v9240_v5 = vpop.f32.mrb[111].mxu0  ;;  %v14602_v60 = vrot.slane %v14434_v12, %v13731_v23  ;;  %v9593_v21 = vmax.f32 %v9182_v61, 0.0 }
0x1f95   : > { %v9188_v20 = vadd.f32 %v9187_v4, %v14458_v33  ;;  %v9241_v22 = vadd.f32 %v9240_v5, %v14462_v34  ;;  %v9595_v52 = vmax.f32 %v9235_v10, 0.0  ;;  %v9594_v41 = vmax.f32 %v9184_v29, 0.0  ;;  %v12646_v4 = vld [vmem:[%s14991_s14 + $0x280] sm:$0xff]  }
0x1f96   : > { %v9609_v38 = vmax.f32 %v9186_v47, 0.0  ;;  %v9611_v3 = vmax.f32 %v9239_v9, 0.0  ;;  %v9596_v26 = vmax.f32 %v9237_v24, 0.0  ;;  %v12645_v9 = vld [vmem:[%s14991_s14 + $0x200] sm:$0xff]  }
0x1f97   : > { %v9610_v51 = vmax.f32 %v9188_v20, 0.0  ;;  %v9612_v44 = vmax.f32 %v9241_v22, 0.0 }
0x1f98   : > { %v9641_v13 = vpack.c.bf16 %v9609_v38, %v9593_v21  ;;  %v9643_v33 = vpack.c.bf16 %v9611_v3, %v9595_v52  ;;  %v12647_v52 = vld [vmem:[%s14991_s14 + $0x248] sm:$0xff]   ;;  %v14633_v3 = vrot.slane %v14615_v63, %v13153_v50  ;;  %v14645_v50 = vrot.slane %v14615_v63, %v13163_v55 }
0x1f99   : > { %v9642_v45 = vpack.c.bf16 %v9610_v51, %v9594_v41  ;;  %v9644_v34 = vpack.c.bf16 %v9612_v44, %v9596_v26  ;;  %v9277_v31 = vpop.f32.mrb[112].mxu1  ;;  %v9330_v32 = vpop.f32.mrb[112].mxu0  ;;  %v12648_v38 = vld [vmem:[%s14991_s14 + $0x2c8] sm:$0xff]  }
0x1f9a   : > { %v9278_v14 = vadd.f32 %v9277_v31, %v14588_v6  ;;  %v9331_v35 = vadd.f32 %v9330_v32, %v14592_v17  ;;  %v9279_v12 = vpop.f32.mrb[113].mxu1  ;;  %v9332_v43 = vpop.f32.mrb[113].mxu0 }
0x1f9b   : > { %v9280_v36 = vadd.f32 %v9279_v12, %v14598_v42  ;;  %v9333_v39 = vadd.f32 %v9332_v43, %v14602_v60  ;;  %v9281_v15 = vpop.f32.mrb[114].mxu1  ;;  %v9334_v46 = vpop.f32.mrb[114].mxu0  ;;  %10721 = vmatprep.mubr.bf16.mxu1 %v9642_v45  ;;  %10770 = vmatprep.mubr.bf16.mxu0 %v9644_v34 }
0x1f9c   : > { %v9282_v18 = vadd.f32 %v9281_v15, %v14588_v6  ;;  %v9335_v11 = vadd.f32 %v9334_v46, %v14592_v17  ;;  %v9283_v40 = vpop.f32.mrb[115].mxu1  ;;  %v9336_v49 = vpop.f32.mrb[115].mxu0  ;;  %10722 = vmatmul.mubr.bf16.gmra.mrb[140].mxu1 %v9641_v13  ;;  %10771 = vmatmul.mubr.bf16.gmra.mrb[140].mxu0 %v9643_v33  ;;  %v9565_v57 = vmax.f32 %v9278_v14, 0.0  ;;  %v9567_v58 = vmax.f32 %v9331_v35, 0.0 }
0x1f9d   : > { %v9284_v48 = vadd.f32 %v9283_v40, %v14598_v42  ;;  %v9337_v56 = vadd.f32 %v9336_v49, %v14602_v60  ;;  %v9566_v2 = vmax.f32 %v9280_v36, 0.0  ;;  %v9568_v27 = vmax.f32 %v9333_v39, 0.0  ;;  %v12652_v36 = vld [vmem:[%s14991_s14 + $0x2d0] sm:$0xff]  }
0x1f9e   : > { %v9581_v59 = vmax.f32 %v9282_v18, 0.0  ;;  %v9583_v25 = vmax.f32 %v9335_v11, 0.0  ;;  %v14639_v13 = vrot.slane %v14615_v63, %v13611_v37  ;;  %v12649_v37 = vld [vmem:[%s14991_s14 + $0x208] sm:$0xff]  }
0x1f9f   : > { %v9582_v61 = vmax.f32 %v9284_v48, 0.0  ;;  %v9584_v10 = vmax.f32 %v9337_v56, 0.0 }
0x1fa0   : > { %v9629_v0 = vpack.c.bf16 %v9581_v59, %v9565_v57  ;;  %v9631_v29 = vpack.c.bf16 %v9583_v25, %v9567_v58  ;;  %v12653_v57 = vld [vmem:[%s14991_s14 + $0x210] sm:$0xff]  }
0x1fa1   : > { %v9630_v24 = vpack.c.bf16 %v9582_v61, %v9566_v2  ;;  %v9632_v1 = vpack.c.bf16 %v9584_v10, %v9568_v27  ;;  %v9287_v30 = vpop.f32.mrb[116].mxu1  ;;  %v9340_v47 = vpop.f32.mrb[116].mxu0  ;;  %v12654_v58 = vld [vmem:[%s14991_s14 + $0x290] sm:$0xff]   ;;  %v12655_v61 = vld [vmem:[%s14991_s14 + $0x258] sm:$0xff]  }
0x1fa2   : > { %v9288_v5 = vadd.f32 %v9287_v30, %v14588_v6  ;;  %v9341_v20 = vadd.f32 %v9340_v47, %v14592_v17  ;;  %v9289_v22 = vpop.f32.mrb[117].mxu1  ;;  %v9342_v21 = vpop.f32.mrb[117].mxu0  ;;  %v12656_v10 = vld [vmem:[%s14991_s14 + $0x2d8] sm:$0xff]  }
0x1fa3   : > { %v9290_v41 = vadd.f32 %v9289_v22, %v14598_v42  ;;  %v9343_v26 = vadd.f32 %v9342_v21, %v14602_v60  ;;  %v9291_v51 = vpop.f32.mrb[118].mxu1  ;;  %v9344_v44 = vpop.f32.mrb[118].mxu0  ;;  %10811 = vmatprep.mubr.bf16.mxu1 %v9630_v24  ;;  %10860 = vmatprep.mubr.bf16.mxu0 %v9632_v1  ;;  %v12657_v22 = vld [vmem:[%s14991_s14 + $0x218] sm:$0xff]  }
0x1fa4   : > { %v9292_v33 = vadd.f32 %v9291_v51, %v14588_v6  ;;  %v9345_v45 = vadd.f32 %v9344_v44, %v14592_v17  ;;  %v9293_v34 = vpop.f32.mrb[119].mxu1  ;;  %v9346_v31 = vpop.f32.mrb[119].mxu0  ;;  %10812 = vmatmul.mubr.bf16.vlgmr.msra.gmra.mrb[144].mxu1 %v9629_v0  ;;  %10861 = vmatmul.mubr.bf16.vlgmr.msra.gmra.mrb[144].mxu0 %v9631_v29  ;;  %v12650_v6 = vld [vmem:[%s14991_s14 + $0x288] sm:$0xff]   ;;  %v14657_v17 = vrot.slane %v14615_v63, %v13628_v54  ;;  %v9597_v35 = vmax.f32 %v9288_v5, 0.0  ;;  %v12658_v21 = vld [vmem:[%s14991_s14 + $0x298] sm:$0xff]   ;;  %v12659_v51 = vld [vmem:[%s14991_s14 + $0x260] sm:$0xff]  }
0x1fa5   : > { %v9294_v32 = vadd.f32 %v9293_v34, %v14598_v42  ;;  %v9347_v14 = vadd.f32 %v9346_v31, %v14602_v60  ;;  %11867 = vmatpush3.bf16.msra.mxu1 %v12645_v9  ;;  %11895 = vmatpush3.bf16.msra.mxu0 %v12646_v4  ;;  %v9599_v12 = vmax.f32 %v9341_v20, 0.0  ;;  %v12651_v60 = vld [vmem:[%s14991_s14 + $0x250] sm:$0xff]   ;;  %v9598_v39 = vmax.f32 %v9290_v41, 0.0  ;;  %v12660_v44 = vld [vmem:[%s14991_s14 + $0x2e0] sm:$0xff]  }
0x1fa6   : > { %v9613_v43 = vmax.f32 %v9292_v33, 0.0  ;;  %v9615_v42 = vmax.f32 %v9345_v45, 0.0  ;;  %11868 = vmatprep.subr.bf16.mxu1 %v12647_v52  ;;  %11896 = vmatprep.subr.bf16.mxu0 %v12648_v38  ;;  %v9600_v15 = vmax.f32 %v9343_v26, 0.0 }
0x1fa7   : > { %v9614_v46 = vmax.f32 %v9294_v32, 0.0  ;;  %v9616_v18 = vmax.f32 %v9347_v14, 0.0 }
0x1fa8   : > { %v9645_v54 = vpack.c.bf16 %v9613_v43, %v9597_v35  ;;  %v9647_v11 = vpack.c.bf16 %v9615_v42, %v9599_v12  ;;  %v12661_v43 = vld [vmem:[%s14991_s14 + $0x220] sm:$0xff]  }
0x1fa9   : > { %v9646_v40 = vpack.c.bf16 %v9614_v46, %v9598_v39  ;;  %v9648_v49 = vpack.c.bf16 %v9616_v18, %v9600_v15  ;;  %11869 = vmatpush3.bf16.msra.mxu1 %v12649_v37  ;;  %11897 = vmatpush3.bf16.msra.mxu0 %v12650_v6  ;;  %v9383_v48 = vpop.f32.mrb[120].mxu1  ;;  %v9436_v56 = vpop.f32.mrb[120].mxu0  ;;  %v12662_v42 = vld [vmem:[%s14991_s14 + $0x2a0] sm:$0xff]   ;;  %v12663_v46 = vld [vmem:[%s14991_s14 + $0x268] sm:$0xff]  }
0x1faa   : > { %v9384_v59 = vadd.f32 %v9383_v48, %v14633_v3  ;;  %v9437_v25 = vadd.f32 %v9436_v56, %v14639_v13  ;;  %v9385_v2 = vpop.f32.mrb[121].mxu1  ;;  %v9438_v27 = vpop.f32.mrb[121].mxu0  ;;  %11870 = vmatprep.subr.bf16.mxu1 %v12651_v60  ;;  %11898 = vmatprep.subr.bf16.mxu0 %v12652_v36  ;;  %v12664_v18 = vld [vmem:[%s14991_s14 + $0x2e8] sm:$0xff]   ;;  %v14719_v48 = vrot.slane %v14615_v63, %v14205_v19 }
0x1fab   : > { %v9386_v0 = vadd.f32 %v9385_v2, %v14645_v50  ;;  %v9439_v29 = vadd.f32 %v9438_v27, %v14657_v17  ;;  %v9387_v24 = vpop.f32.mrb[122].mxu1  ;;  %v9440_v1 = vpop.f32.mrb[122].mxu0  ;;  %10819 = vmatprep.mubr.bf16.mxu1 %v9646_v40  ;;  %10868 = vmatprep.mubr.bf16.mxu0 %v9648_v49  ;;  %v14729_v2 = vrot.slane %v14615_v63, %v14214_v62  ;;  %v12665_v19 = vld [vmem:[%s14991_s14 + $0x228] sm:$0xff]  }
0x1fac   : > { %v9388_v30 = vadd.f32 %v9387_v24, %v14633_v3  ;;  %v9441_v47 = vadd.f32 %v9440_v1, %v14639_v13  ;;  %v9389_v9 = vpop.f32.mrb[123].mxu1  ;;  %v9442_v4 = vpop.f32.mrb[123].mxu0  ;;  %10820 = vmatmul.mubr.bf16.gmra.mrb[148].mxu1 %v9645_v54  ;;  %10869 = vmatmul.mubr.bf16.gmra.mrb[148].mxu0 %v9647_v11  ;;  %v9569_v52 = vmax.f32 %v9384_v59, 0.0  ;;  %v9571_v38 = vmax.f32 %v9437_v25, 0.0 }
0x1fad   : > { %v9390_v5 = vadd.f32 %v9389_v9, %v14645_v50  ;;  %v9443_v20 = vadd.f32 %v9442_v4, %v14657_v17  ;;  %11871 = vmatpush3.bf16.msra.mxu1 %v12653_v57  ;;  %11899 = vmatpush3.bf16.msra.mxu0 %v12654_v58  ;;  %v9570_v33 = vmax.f32 %v9386_v0, 0.0  ;;  %v9572_v45 = vmax.f32 %v9439_v29, 0.0  ;;  %v12668_v0 = vld [vmem:[%s14991_s14 + $0x2f0] sm:$0xff]  }
0x1fae   : > { %v9585_v41 = vmax.f32 %v9388_v30, 0.0  ;;  %v9587_v26 = vmax.f32 %v9441_v47, 0.0  ;;  %11872 = vmatprep.subr.bf16.mxu1 %v12655_v61  ;;  %11900 = vmatprep.subr.bf16.mxu0 %v12656_v10  ;;  %v14725_v25 = vrot.slane %v14615_v63, %v13354_v7  ;;  %v14741_v7 = vrot.slane %v14615_v63, %v13731_v23 }
0x1faf   : > { %v9586_v34 = vmax.f32 %v9390_v5, 0.0  ;;  %v9588_v31 = vmax.f32 %v9443_v20, 0.0  ;;  %v12669_v20 = vld [vmem:[%s14991_s14 + $0x230] sm:$0xff]  }
0x1fb0   : > { %v14697_v32 = vpack.c.bf16 %v9585_v41, %v9569_v52  ;;  %v14699_v14 = vpack.c.bf16 %v9587_v26, %v9571_v38  ;;  %v12671_v26 = vld [vmem:[%s14991_s14 + $0x278] sm:$0xff]  }
0x1fb1   : > { %v9634_v37 = vpack.c.bf16 %v9586_v34, %v9570_v33  ;;  %v9636_v6 = vpack.c.bf16 %v9588_v31, %v9572_v45  ;;  %11873 = vmatpush3.bf16.msra.mxu1 %v12657_v22  ;;  %11901 = vmatpush3.bf16.msra.mxu0 %v12658_v21  ;;  %v9393_v35 = vpop.f32.mrb[124].mxu1  ;;  %v9446_v12 = vpop.f32.mrb[124].mxu0  ;;  %v12670_v22 = vld [vmem:[%s14991_s14 + $0x2b0] sm:$0xff]  }
0x1fb2   : > { %v9394_v60 = vadd.f32 %v9393_v35, %v14633_v3  ;;  %v9447_v36 = vadd.f32 %v9446_v12, %v14639_v13  ;;  %v9395_v39 = vpop.f32.mrb[125].mxu1  ;;  %v9448_v15 = vpop.f32.mrb[125].mxu0  ;;  %11874 = vmatprep.subr.bf16.mxu1 %v12659_v51  ;;  %11902 = vmatprep.subr.bf16.mxu0 %v12660_v44  ;;  %v12672_v51 = vld [vmem:[%s14991_s14 + $0x2f8] sm:$0xff]  }
0x1fb3   : > { %v9396_v54 = vadd.f32 %v9395_v39, %v14645_v50  ;;  %v9449_v11 = vadd.f32 %v9448_v15, %v14657_v17  ;;  %v9397_v40 = vpop.f32.mrb[126].mxu1  ;;  %v9450_v49 = vpop.f32.mrb[126].mxu0  ;;  %10909 = vmatprep.mubr.bf16.mxu1 %v9634_v37  ;;  %10958 = vmatprep.mubr.bf16.mxu0 %v9636_v6 }
0x1fb4   : > { %v9398_v56 = vadd.f32 %v9397_v40, %v14633_v3  ;;  %v9451_v57 = vadd.f32 %v9450_v49, %v14639_v13  ;;  %v9399_v58 = vpop.f32.mrb[127].mxu1  ;;  %v9452_v59 = vpop.f32.mrb[127].mxu0  ;;  %v12666_v3 = vld [vmem:[%s14991_s14 + $0x2a8] sm:$0xff]   ;;  %v9601_v62 = vmax.f32 %v9394_v60, 0.0  ;;  %v9603_v13 = vmax.f32 %v9447_v36, 0.0  ;;  %v12674_v60 = vld [vmem:[%s14991_s14 + $0x2b8] sm:$0xff]  }
0x1fb5   : > { %v9400_v27 = vadd.f32 %v9399_v58, %v14645_v50  ;;  %v9453_v61 = vadd.f32 %v9452_v59, %v14657_v17  ;;  %11875 = vmatpush3.bf16.msra.mxu1 %v12661_v43  ;;  %11903 = vmatpush3.bf16.msra.mxu0 %v12662_v42  ;;  %v12667_v17 = vld [vmem:[%s14991_s14 + $0x270] sm:$0xff]   ;;  %v9602_v29 = vmax.f32 %v9396_v54, 0.0  ;;  %v9604_v24 = vmax.f32 %v9449_v11, 0.0  ;;  %v12673_v42 = vld [vmem:[%s14991_s14 + $0x238] sm:$0xff]   ;;  %v12676_v54 = vld [vmem:[%s14991_s14 + $0x3c0] sm:$0xff]  }
0x1fb6   : > { %v9617_v10 = vmax.f32 %v9398_v56, 0.0  ;;  %v9619_v50 = vmax.f32 %v9451_v57, 0.0  ;;  %11876 = vmatprep.subr.bf16.mxu1 %v12663_v46  ;;  %11904 = vmatprep.subr.bf16.mxu0 %v12664_v18  ;;  %v12675_v18 = vld [vmem:[%s14991_s14 + $0x340] sm:$0xff]  }
0x1fb7   : > { %v9618_v1 = vmax.f32 %v9400_v27, 0.0  ;;  %v9620_v30 = vmax.f32 %v9453_v61, 0.0 }
0x1fb8   : > { %v14749_v23 = vpack.c.bf16 %v9617_v10, %v9601_v62  ;;  %v14751_v63 = vpack.c.bf16 %v9619_v50, %v9603_v13  ;;  %v12677_v50 = vld [vmem:[%s14991_s14 + $0x300] sm:$0xff]  }
0x1fb9   : > { %v14753_v47 = vpack.c.bf16 %v9618_v1, %v9602_v29  ;;  %v14755_v9 = vpack.c.bf16 %v9620_v30, %v9604_v24  ;;  %11877 = vmatpush3.bf16.msra.mxu1 %v12665_v19  ;;  %11905 = vmatpush3.bf16.msra.mxu0 %v12666_v3  ;;  %v9489_v4 = vpop.f32.mrb[128].mxu1  ;;  %v9542_v5 = vpop.f32.mrb[128].mxu0  ;;  %v12679_v30 = vld [vmem:[%s14991_s14 + $0x348] sm:$0xff]  }
0x1fba   : > { %v9490_v21 = vadd.f32 %v9489_v4, %v14719_v48  ;;  %v9543_v52 = vadd.f32 %v9542_v5, %v14725_v25  ;;  %v9491_v38 = vpop.f32.mrb[129].mxu1  ;;  %v9544_v41 = vpop.f32.mrb[129].mxu0  ;;  %11878 = vmatprep.subr.bf16.mxu1 %v12667_v17  ;;  %11906 = vmatprep.subr.bf16.mxu0 %v12668_v0  ;;  %v12678_v17 = vld [vmem:[%s14991_s14 + $0x380] sm:$0xff]   ;;  %v12680_v4 = vld [vmem:[%s14991_s14 + $0x3c8] sm:$0xff]  }
0x1fbb   : > { %v9492_v44 = vadd.f32 %v9491_v38, %v14729_v2  ;;  %v9545_v33 = vadd.f32 %v9544_v41, %v14741_v7  ;;  %v9493_v45 = vpop.f32.mrb[130].mxu1  ;;  %v9546_v34 = vpop.f32.mrb[130].mxu0 }
0x1fbc   : > { %v9494_v31 = vadd.f32 %v9493_v45, %v14719_v48  ;;  %v9547_v37 = vadd.f32 %v9546_v34, %v14725_v25  ;;  %v9495_v6 = vpop.f32.mrb[131].mxu1  ;;  %v9548_v35 = vpop.f32.mrb[131].mxu0  ;;  %v9573_v36 = vmax.f32 %v9490_v21, 0.0  ;;  %v9575_v39 = vmax.f32 %v9543_v52, 0.0 }
0x1fbd   : > { %v9496_v12 = vadd.f32 %v9495_v6, %v14729_v2  ;;  %v9549_v43 = vadd.f32 %v9548_v35, %v14741_v7  ;;  %11879 = vmatpush3.bf16.msra.mxu1 %v12669_v20  ;;  %11907 = vmatpush3.bf16.msra.mxu0 %v12670_v22  ;;  %v9574_v11 = vmax.f32 %v9492_v44, 0.0  ;;  %v9576_v40 = vmax.f32 %v9545_v33, 0.0  ;;  %v12684_v44 = vld [vmem:[%s14991_s14 + $0x3d0] sm:$0xff]   ;;  %v12687_v35 = vld [vmem:[%s14991_s14 + $0x358] sm:$0xff]  }
0x1fbe   : > { %v9589_v15 = vmax.f32 %v9494_v31, 0.0  ;;  %v9591_v46 = vmax.f32 %v9547_v37, 0.0  ;;  %11880 = vmatprep.subr.bf16.mxu1 %v12671_v26  ;;  %11908 = vmatprep.subr.bf16.mxu0 %v12672_v51  ;;  %v12685_v37 = vld [vmem:[%s14991_s14 + $0x310] sm:$0xff]  }
0x1fbf   : > { %v9590_v49 = vmax.f32 %v9496_v12, 0.0  ;;  %v9592_v56 = vmax.f32 %v9549_v43, 0.0  ;;  %v12686_v6 = vld [vmem:[%s14991_s14 + $0x390] sm:$0xff]   ;;  %v12688_v12 = vld [vmem:[%s14991_s14 + $0x3d8] sm:$0xff]  }
0x1fc0   : > { %v14789_v57 = vpack.c.bf16 %v9589_v15, %v9573_v36  ;;  %v14791_v58 = vpack.c.bf16 %v9591_v46, %v9575_v39  ;;  %v12689_v43 = vld [vmem:[%s14991_s14 + $0x318] sm:$0xff]   ;;  %v12694_v36 = vld [vmem:[%s14991_s14 + $0x3a0] sm:$0xff]   ;;  %v12695_v39 = vld [vmem:[%s14991_s14 + $0x368] sm:$0xff]  }
0x1fc1   : > { %v9638_v59 = vpack.c.bf16 %v9590_v49, %v9574_v11  ;;  %v9640_v27 = vpack.c.bf16 %v9592_v56, %v9576_v40  ;;  %11881 = vmatpush3.bf16.msra.mxu1 %v12673_v42  ;;  %11909 = vmatpush3.bf16.msra.mxu0 %v12674_v60  ;;  %v9499_v61 = vpop.f32.mrb[132].mxu1  ;;  %v9552_v19 = vpop.f32.mrb[132].mxu0  ;;  %v12690_v42 = vld [vmem:[%s14991_s14 + $0x398] sm:$0xff]   ;;  %v12693_v60 = vld [vmem:[%s14991_s14 + $0x320] sm:$0xff]   ;;  %v12696_v15 = vld [vmem:[%s14991_s14 + $0x3e8] sm:$0xff]  }
0x1fc2   : > { %v9500_v3 = vadd.f32 %v9499_v61, %v14719_v48  ;;  %v9553_v62 = vadd.f32 %v9552_v19, %v14725_v25  ;;  %v9501_v13 = vpop.f32.mrb[133].mxu1  ;;  %v9554_v10 = vpop.f32.mrb[133].mxu0  ;;  %11922 = vmatprep.subr.bf16.mxu1 %v12675_v18  ;;  %11950 = vmatprep.subr.bf16.mxu0 %v12676_v54  ;;  %v12697_v46 = vld [vmem:[%s14991_s14 + $0x328] sm:$0xff]   ;;  %v12699_v54 = vld [vmem:[%s14991_s14 + $0x370] sm:$0xff]   ;;  %v12703_v56 = vld [vmem:[%s14991_s14 + $0x378] sm:$0xff]  }
0x1fc3   : > { %v9502_v0 = vadd.f32 %v9501_v13, %v14729_v2  ;;  %v9555_v29 = vadd.f32 %v9554_v10, %v14741_v7  ;;  %v9503_v24 = vpop.f32.mrb[134].mxu1  ;;  %v9556_v1 = vpop.f32.mrb[134].mxu0  ;;  %v12698_v18 = vld [vmem:[%s14991_s14 + $0x3a8] sm:$0xff]   ;;  %v12700_v11 = vld [vmem:[%s14991_s14 + $0x3f0] sm:$0xff]   ;;  %v12706_v13 = vld [vmem:[%s14991_s14 + $0x3b8] sm:$0xff]  }
0x1fc4   : > { %v9504_v5 = vadd.f32 %v9503_v24, %v14719_v48  ;;  %v9557_v20 = vadd.f32 %v9556_v1, %v14725_v25  ;;  %10910 = vmatmul.mubr.bf16.vlgmr.msra.gmra.mrb[152].mxu1 %v14697_v32  ;;  %10959 = vmatmul.mubr.bf16.vlgmr.msra.gmra.mrb[152].mxu0 %v14699_v14  ;;  %v9505_v22 = vpop.f32.mrb[135].mxu1  ;;  %v9558_v21 = vpop.f32.mrb[135].mxu0  ;;  %v9605_v41 = vmax.f32 %v9500_v3, 0.0  ;;  %v9607_v26 = vmax.f32 %v9553_v62, 0.0  ;;  %v12681_v32 = vld [vmem:[%s14991_s14 + $0x308] sm:$0xff]   ;;  %v12701_v40 = vld [vmem:[%s14991_s14 + $0x330] sm:$0xff]  }
0x1fc5   : > { %v9506_v52 = vadd.f32 %v9505_v22, %v14729_v2  ;;  %v9559_v38 = vadd.f32 %v9558_v21, %v14741_v7  ;;  %10917 = vmatprep.mubr.bf16.mxu1 %v14753_v47  ;;  %10966 = vmatprep.mubr.bf16.mxu0 %v14755_v9  ;;  %v12682_v14 = vld [vmem:[%s14991_s14 + $0x388] sm:$0xff]   ;;  %v9606_v25 = vmax.f32 %v9502_v0, 0.0  ;;  %v9608_v2 = vmax.f32 %v9555_v29, 0.0  ;;  %v12683_v9 = vld [vmem:[%s14991_s14 + $0x350] sm:$0xff]   ;;  %v12705_v62 = vld [vmem:[%s14991_s14 + $0x338] sm:$0xff]  }
0x1fc6   : > { %v9621_v51 = vmax.f32 %v9504_v5, 0.0  ;;  %v9623_v48 = vmax.f32 %v9557_v20, 0.0  ;;  %11923 = vmatpush3.bf16.msra.mxu1 %v12677_v50  ;;  %11951 = vmatpush3.bf16.msra.mxu0 %v12678_v17  ;;  %v12702_v49 = vld [vmem:[%s14991_s14 + $0x3b0] sm:$0xff]  }
0x1fc7   : > { %v9622_v7 = vmax.f32 %v9506_v52, 0.0  ;;  %v9624_v47 = vmax.f32 %v9559_v38, 0.0  ;;  %11924 = vmatprep.subr.bf16.mxu1 %v12679_v30  ;;  %11952 = vmatprep.subr.bf16.mxu0 %v12680_v4 }
0x1fc8   : > { %v14829_v33 = vpack.c.bf16 %v9621_v51, %v9605_v41  ;;  %v14831_v45 = vpack.c.bf16 %v9623_v48, %v9607_v26 }
0x1fc9   : > { %v14833_v34 = vpack.c.bf16 %v9622_v7, %v9606_v25  ;;  %v14835_v31 = vpack.c.bf16 %v9624_v47, %v9608_v2 }
0x1fca   : > { %11925 = vmatpush3.bf16.msra.mxu1 %v12681_v32  ;;  %11953 = vmatpush3.bf16.msra.mxu0 %v12682_v14 }
0x1fcb   : > { %11926 = vmatprep.subr.bf16.mxu1 %v12683_v9  ;;  %11954 = vmatprep.subr.bf16.mxu0 %v12684_v44 }
0x1fcc   : > { %10918 = vmatmul.mubr.bf16.gmra.mrb[156].mxu1 %v14749_v23  ;;  %10967 = vmatmul.mubr.bf16.gmra.mrb[156].mxu0 %v14751_v63  ;;  %v12691_v23 = vld [vmem:[%s14991_s14 + $0x360] sm:$0xff]  }
0x1fcd   : > { %11007 = vmatprep.mubr.bf16.mxu1 %v9638_v59  ;;  %11056 = vmatprep.mubr.bf16.mxu0 %v9640_v27  ;;  %v12692_v63 = vld [vmem:[%s14991_s14 + $0x3e0] sm:$0xff]   ;;  %v12704_v59 = vld [vmem:[%s14991_s14 + $0x3f8] sm:$0xff]  }
0x1fce   : > { %11927 = vmatpush3.bf16.msra.mxu1 %v12685_v37  ;;  %11955 = vmatpush3.bf16.msra.mxu0 %v12686_v6 }
0x1fcf   : > { %11928 = vmatprep.subr.bf16.mxu1 %v12687_v35  ;;  %11956 = vmatprep.subr.bf16.mxu0 %v12688_v12 }
0x1fd2   : > { %11929 = vmatpush3.bf16.msra.mxu1 %v12689_v43  ;;  %11957 = vmatpush3.bf16.msra.mxu0 %v12690_v42 }
0x1fd3   : > { %11930 = vmatprep.subr.bf16.mxu1 %v12691_v23  ;;  %11958 = vmatprep.subr.bf16.mxu0 %v12692_v63 }
0x1fd6   : > { %11931 = vmatpush3.bf16.msra.mxu1 %v12693_v60  ;;  %11959 = vmatpush3.bf16.msra.mxu0 %v12694_v36 }
0x1fd7   : > { %11932 = vmatprep.subr.bf16.mxu1 %v12695_v39  ;;  %11960 = vmatprep.subr.bf16.mxu0 %v12696_v15 }
0x1fda   : > { %11933 = vmatpush3.bf16.msra.mxu1 %v12697_v46  ;;  %11961 = vmatpush3.bf16.msra.mxu0 %v12698_v18 }
0x1fdb   : > { %11934 = vmatprep.subr.bf16.mxu1 %v12699_v54  ;;  %11962 = vmatprep.subr.bf16.mxu0 %v12700_v11 }
0x1fde   : > { %v11770_v27 = vpop.f32.mrb[136].mxu1  ;;  %v11798_v61 = vpop.f32.mrb[136].mxu0  ;;  %11935 = vmatpush3.bf16.msra.mxu1 %v12701_v40  ;;  %11963 = vmatpush3.bf16.msra.mxu0 %v12702_v49 }
0x1fdf   : > { %v11771_v19 = vpop.f32.mrb[137].mxu1  ;;  %v11799_v3 = vpop.f32.mrb[137].mxu0  ;;  %11936 = vmatprep.subr.bf16.mxu1 %v12703_v56  ;;  %11964 = vmatprep.subr.bf16.mxu0 %v12704_v59 }
0x1fe0   : > { %v11772_v10 = vadd.f32 %v11771_v19, %v11770_v27  ;;  %v11800_v50 = vadd.f32 %v11799_v3, %v11798_v61  ;;  %v11773_v17 = vpop.f32.mrb[138].mxu1  ;;  %v11801_v0 = vpop.f32.mrb[138].mxu0 }
0x1fe1   : > { %v11774_v29 = vpop.f32.mrb[139].mxu1  ;;  %v11802_v24 = vpop.f32.mrb[139].mxu0 }
0x1fe2   : > { %v10765_v1 = vadd.f32 %v11800_v50, %v11772_v10  ;;  %v11775_v30 = vadd.f32 %v11774_v29, %v11773_v17  ;;  %v11803_v4 = vadd.f32 %v11802_v24, %v11801_v0  ;;  %11937 = vmatpush3.bf16.msra.mxu1 %v12705_v62  ;;  %11965 = vmatpush3.bf16.msra.mxu0 %v12706_v13 }
0x1fe4   : > { %v10768_v5 = vadd.f32 %v11803_v4, %v11775_v30 }
0x1fe5   : > { %11008 = vmatmul.mubr.bf16.vlgmr.msra.gmra.mrb[160].mxu1 %v14789_v57  ;;  %11057 = vmatmul.mubr.bf16.vlgmr.msra.gmra.mrb[160].mxu0 %v14791_v58 }
0x1fe6   : > { %11015 = vmatprep.mubr.bf16.mxu1 %v14833_v34  ;;  %11064 = vmatprep.mubr.bf16.mxu0 %v14835_v31 }
0x1fed   : > { %11016 = vmatmul.mubr.bf16.gmra.mrb[164].mxu1 %v14829_v33  ;;  %11065 = vmatmul.mubr.bf16.gmra.mrb[164].mxu0 %v14831_v45 }
0x206f   : > { %v11776_v20 = vpop.f32.mrb[140].mxu1  ;;  %v11804_v22 = vpop.f32.mrb[140].mxu0 }
0x2070   : > { %v11777_v21 = vpop.f32.mrb[141].mxu1  ;;  %v11805_v52 = vpop.f32.mrb[141].mxu0 }
0x2071   : > { %v11778_v38 = vadd.f32 %v11777_v21, %v11776_v20  ;;  %v11806_v41 = vadd.f32 %v11805_v52, %v11804_v22  ;;  %v11779_v26 = vpop.f32.mrb[142].mxu1  ;;  %v11807_v51 = vpop.f32.mrb[142].mxu0 }
0x2072   : > { %v11780_v48 = vpop.f32.mrb[143].mxu1  ;;  %v11808_v57 = vpop.f32.mrb[143].mxu0 }
0x2073   : > { %v10773_v32 = vadd.f32 %v11806_v41, %v11778_v38  ;;  %v11781_v58 = vadd.f32 %v11780_v48, %v11779_v26  ;;  %v11809_v14 = vadd.f32 %v11808_v57, %v11807_v51 }
0x2075   : > { %v10776_v25 = vadd.f32 %v11809_v14, %v11781_v58 }
0x2077   : > { %v11826_v2 = vpop.f32.mrb[144].mxu1  ;;  %v11854_v7 = vpop.f32.mrb[144].mxu0 }
0x2078   : > { %v11827_v47 = vpop.f32.mrb[145].mxu1  ;;  %v11855_v9 = vpop.f32.mrb[145].mxu0 }
0x2079   : > { %v11828_v44 = vadd.f32 %v11827_v47, %v11826_v2  ;;  %v11856_v33 = vadd.f32 %v11855_v9, %v11854_v7  ;;  %v11829_v45 = vpop.f32.mrb[146].mxu1  ;;  %v11857_v34 = vpop.f32.mrb[146].mxu0 }
0x207a   : > { %v11830_v31 = vpop.f32.mrb[147].mxu1  ;;  %v11858_v37 = vpop.f32.mrb[147].mxu0 }
0x207b   : > { %v10814_v6 = vadd.f32 %v11828_v44, %v10765_v1  ;;  %v11831_v35 = vadd.f32 %v11830_v31, %v11829_v45  ;;  %v11859_v12 = vadd.f32 %v11858_v37, %v11857_v34 }
0x207d   : > { %v10863_v43 = vadd.f32 %v11856_v33, %v10814_v6  ;;  %v10817_v42 = vadd.f32 %v11831_v35, %v10768_v5 }
0x207f   : > { %v10866_v23 = vadd.f32 %v11859_v12, %v10817_v42  ;;  %v11832_v63 = vpop.f32.mrb[148].mxu1  ;;  %v11860_v60 = vpop.f32.mrb[148].mxu0 }
0x2080   : > { %v11833_v36 = vpop.f32.mrb[149].mxu1  ;;  %v11861_v39 = vpop.f32.mrb[149].mxu0 }
0x2081   : > { %v11834_v15 = vadd.f32 %v11833_v36, %v11832_v63  ;;  %v11862_v46 = vadd.f32 %v11861_v39, %v11860_v60  ;;  %v11835_v18 = vpop.f32.mrb[150].mxu1  ;;  %v11863_v54 = vpop.f32.mrb[150].mxu0  ;;  %v12891_v36 = vld [vmem:[%s14981_s4 + $0x8] sm:$0x3] }
0x2082   : > { %v11836_v11 = vpop.f32.mrb[151].mxu1  ;;  %v11864_v40 = vpop.f32.mrb[151].mxu0  ;;  %v11080_v39 = vrot.slane %v12891_v36, %v13163_v55 }
0x2083   : > { %v10822_v49 = vadd.f32 %v11834_v15, %v10773_v32  ;;  %v11837_v56 = vadd.f32 %v11836_v11, %v11835_v18  ;;  %v11865_v59 = vadd.f32 %v11864_v40, %v11863_v54 }
0x2085   : > { %v10871_v27 = vadd.f32 %v11862_v46, %v10822_v49  ;;  %v10825_v61 = vadd.f32 %v11837_v56, %v10776_v25 }
0x2087   : > { %v10874_v19 = vadd.f32 %v11865_v59, %v10825_v61 }
0x2097   : > { %v11882_v3 = vpop.f32.mrb[152].mxu1  ;;  %v11910_v62 = vpop.f32.mrb[152].mxu0 }
0x2098   : > { %v11883_v13 = vpop.f32.mrb[153].mxu1  ;;  %v11911_v10 = vpop.f32.mrb[153].mxu0 }
0x2099   : > { %v11884_v50 = vadd.f32 %v11883_v13, %v11882_v3  ;;  %v11912_v17 = vadd.f32 %v11911_v10, %v11910_v62  ;;  %v11885_v0 = vpop.f32.mrb[154].mxu1  ;;  %v11913_v29 = vpop.f32.mrb[154].mxu0 }
0x209a   : > { %v11886_v24 = vpop.f32.mrb[155].mxu1  ;;  %v11914_v1 = vpop.f32.mrb[155].mxu0 }
0x209b   : > { %v10912_v30 = vadd.f32 %v11884_v50, %v10863_v43  ;;  %v11887_v4 = vadd.f32 %v11886_v24, %v11885_v0  ;;  %v11915_v5 = vadd.f32 %v11914_v1, %v11913_v29 }
0x209d   : > { %v10961_v20 = vadd.f32 %v11912_v17, %v10912_v30  ;;  %v10915_v22 = vadd.f32 %v11887_v4, %v10866_v23 }
0x209f   : > { %v10964_v21 = vadd.f32 %v11915_v5, %v10915_v22  ;;  %v11888_v52 = vpop.f32.mrb[156].mxu1  ;;  %v11916_v38 = vpop.f32.mrb[156].mxu0 }
0x20a0   : > { %v11889_v41 = vpop.f32.mrb[157].mxu1  ;;  %v11917_v26 = vpop.f32.mrb[157].mxu0 }
0x20a1   : > { %v11890_v51 = vadd.f32 %v11889_v41, %v11888_v52  ;;  %v11918_v48 = vadd.f32 %v11917_v26, %v11916_v38  ;;  %v11891_v57 = vpop.f32.mrb[158].mxu1  ;;  %v11919_v32 = vpop.f32.mrb[158].mxu0 }
0x20a2   : > { %v11892_v58 = vpop.f32.mrb[159].mxu1  ;;  %v11920_v14 = vpop.f32.mrb[159].mxu0 }
0x20a3   : > { %v10920_v25 = vadd.f32 %v11890_v51, %v10871_v27  ;;  %v11893_v2 = vadd.f32 %v11892_v58, %v11891_v57  ;;  %v11921_v7 = vadd.f32 %v11920_v14, %v11919_v32 }
0x20a5   : > { %v10969_v47 = vadd.f32 %v11918_v48, %v10920_v25  ;;  %v10923_v9 = vadd.f32 %v11893_v2, %v10874_v19 }
0x20a7   : > { %v10972_v44 = vadd.f32 %v11921_v7, %v10923_v9 }
0x20b8   : > { %v11938_v33 = vpop.f32.mrb[160].mxu1  ;;  %v11966_v45 = vpop.f32.mrb[160].mxu0 }
0x20b9   : > { %v11939_v34 = vpop.f32.mrb[161].mxu1  ;;  %v11967_v31 = vpop.f32.mrb[161].mxu0 }
0x20ba   : > { %v11940_v37 = vadd.f32 %v11939_v34, %v11938_v33  ;;  %v11968_v6 = vadd.f32 %v11967_v31, %v11966_v45  ;;  %v11941_v35 = vpop.f32.mrb[162].mxu1  ;;  %v11969_v12 = vpop.f32.mrb[162].mxu0 }
0x20bb   : > { %v11942_v43 = vpop.f32.mrb[163].mxu1  ;;  %v11970_v42 = vpop.f32.mrb[163].mxu0 }
0x20bc   : > { %v11010_v23 = vadd.f32 %v11940_v37, %v10961_v20  ;;  %v11943_v63 = vadd.f32 %v11942_v43, %v11941_v35  ;;  %v11971_v60 = vadd.f32 %v11970_v42, %v11969_v12 }
0x20be   : > { %v11059_v15 = vadd.f32 %v11968_v6, %v11010_v23  ;;  %v11013_v46 = vadd.f32 %v11943_v63, %v10964_v21 }
0x20c0   : > { %v11073_v18 = vadd.f32 %v11059_v15, %v14101_v16  ;;  %v11062_v54 = vadd.f32 %v11971_v60, %v11013_v46  ;;  %v11944_v11 = vpop.f32.mrb[164].mxu1  ;;  %v11972_v40 = vpop.f32.mrb[164].mxu0 }
0x20c1   : > { %v11945_v49 = vpop.f32.mrb[165].mxu1  ;;  %v11973_v56 = vpop.f32.mrb[165].mxu0 }
0x20c2   : > { %v11081_v59 = vadd.f32 %v11080_v39, %v11073_v18  ;;  %v11074_v27 = vadd.f32 %v11062_v54, %v14121_v53  ;;  %v11946_v61 = vadd.f32 %v11945_v49, %v11944_v11  ;;  %v11974_v19 = vadd.f32 %v11973_v56, %v11972_v40  ;;  %v11947_v3 = vpop.f32.mrb[166].mxu1  ;;  %v11975_v62 = vpop.f32.mrb[166].mxu0 }
0x20c3   : > { %v11948_v55 = vpop.f32.mrb[167].mxu1  ;;  %v11976_v13 = vpop.f32.mrb[167].mxu0 }
0x20c4   : > { %11085 = vst.msk [vmem:[%s536_s16] sm:$0xff] %vm581_vm0, %v11081_v59  ;;  %v11082_v10 = vadd.f32 %v11080_v39, %v11074_v27  ;;  %v11018_v16 = vadd.f32 %v11946_v61, %v10969_v47  ;;  %v11949_v50 = vadd.f32 %v11948_v55, %v11947_v3  ;;  %v11977_v17 = vadd.f32 %v11976_v13, %v11975_v62 }
0x20c6   : > { %11086 = vst.msk [vmem:[%s536_s16 + $0x8] sm:$0xff] %vm581_vm0, %v11082_v10  ;;  %v11067_v0 = vadd.f32 %v11974_v19, %v11018_v16  ;;  %v11021_v53 = vadd.f32 %v11949_v50, %v10972_v44 }
0x20c8   : > { %v11075_v29 = vadd.f32 %v11067_v0, %v14104_v8  ;;  %v11070_v24 = vadd.f32 %v11977_v17, %v11021_v53 }
0x20ca   : > { %v11083_v1 = vadd.f32 %v11080_v39, %v11075_v29  ;;  %v11076_v30 = vadd.f32 %v11070_v24, %v14159_v28 }
0x20cc   : > { %11087 = vst.msk [vmem:[%s536_s16 + $0x10] sm:$0xff] %vm581_vm0, %v11083_v1  ;;  %v11084_v4 = vadd.f32 %v11080_v39, %v11076_v30 }
0x20ce   : > { %11088 = vst.msk [vmem:[%s536_s16 + $0x18] sm:$0xff] %vm581_vm0, %v11084_v4 }
0x20cf   : > { %12905 = shalt.err (!%p12902_p3)
}
0x20d0   : > { %s12906_s26 = scalar_lea.hbm %s14928_s20, 512  ;;  %s12910_s17 = scalar_lea.hbm %s15059_s8, 1024 }
0x20d1   : > { %p12907_p4 = scmp.ne.s32.totalorder %s14928_s20, %s12906_s26  ;;  %p12911_p9 = scmp.lt.u32.totalorder %s14928_s20, %s15059_s8 }
0x20d2   : > { %p12912_p10 = scmp.lt.u32.totalorder %s12910_s17, %s12906_s26  ;;  %p12914_p12 = scmp.lt.u32.totalorder %s12906_s26, %s14928_s20 }
0x20d3   : > { %p12908_p7 = pnand %p12907_p4, %p13091_p5 }
0x20d4   : > { %p12913_p11 = por %p12912_p10, %p12911_p9 }
0x20d5   : > { %p12909_p8 = pneg %p12908_p7 }
0x20d6   : > { %p12915_p13 = por %p12914_p12, %p12913_p11 }
0x20d8   : > { %p12916_p0 = pnand %p12915_p13, %p12909_p8 }
0x20da   : > { %12919 = shalt.err (!%p12916_p0)
}
0x20db   : > { %s12971_s24 = smov 128   ;;  %s12972_s16 = smov 8  }
0x20dc   : > { %12524 = dma.vmem_to_hbm [thread:$0]  (%p13091_p5), %s14930_s23, 512, %s14928_s20, %s14936_s22, %s12971_s24, %s12971_s24, %s12972_s16  }
0x20dd PF: > { %s15060_s29 = sld [smem:[#allocation7_spill]]  ;;  %s15061_s15 = sld [smem:[#allocation5_spill]] }
0x20e3   : > { %p12530_p1 = scmp.ge.s32.totalorder %s15060_s29, 2  ;;  %s11118_s21 = sand.u32 1, %s15061_s15  }
0x20e4   : > { %s11119_s28 = scalar_lea.sflag [#allocation3], %s11118_s21 }
0x20e5   : > { %p12527_p2 = pnand %p12530_p1, %p13095_p6 }
0x20e7   : > { %12937 = dma.done.wait (!%p12527_p2), %s11119_s28, 512  }
0x20e8   : > { %12939 = vsyncadd (!%p12527_p2), %s11119_s28, 4294966784  ;;  %s15063_s21 = sld [smem:[#allocation8_spill]]  ;;  %s15064_s2 = sld [smem:[#allocation6_spill]] }
0x20e9   : > { %s15065_s20 = sld [smem:[#allocation9_spill]]  ;;  %s15066_s18 = smov %s12946_s19 }
0x20ee   : > { %p25_p3 = scmp.ge.s32.totalorder %s15063_s21, 4   ;;  %s15067_s19 = smov %s15064_s2 }
0x20f0   :  { %27 = sbr.rel (!%p25_p3) target bundleno = 11 (0xb), region = 124 }
0x20f7   :  { %11124 = vsyncpa [#allocation3], 1 }
0x20f8   :  { %11126 = vsyncpa [#allocation3 + $0x1], 1 }

</bundles_post_ra>
